<compile_context>
chip_gen: v7x
topology: tpu7x:2x2x1
jax: 0.10.0
libtpu: 0.0.40
codegen_flags: <defaults>
</compile_context>

<pallas_src>
import functools
import math

import jax
import jax.numpy as jnp
from jax import lax
from jax.experimental import pallas as pl
from jax.experimental.pallas import tpu as pltpu

_HALO = 8            # aligned left halo for all padded VMEM staging buffers
_NEG_INF = -1e30


# --------------------------- CNN feature extractor ---------------------------

def _cnn_kernel(x_ref, w1_ref, b1_ref, w2_ref, b2_ref, w3_ref, b3_ref, pe_ref,
                o_ref,
                cp1, pp1, cp2, pp2, cp3, pp3,
                *, L, lo1, l1, l2, s_out):
    """Whole Conv/BN/ReLU/MaxPool x3 chain (+ PE add) for one batch element."""
    f32 = jnp.float32
    bf16 = jnp.bfloat16

    # Clear the staging buffers (only the halo rows must stay zero, but a full
    # clear is just a handful of vector stores on KB-sized buffers).
    for buf in (cp1, pp1, cp2, pp2, cp3, pp3):
        buf[...] = jnp.zeros_like(buf)

    def conv_taps(src, start, n_out, stride, w_ref, b_ref):
        """out[l, :] = relu(sum_k src[start + stride*l + k, :] @ W[k] + bias)."""
        K = w_ref.shape[0]
        cout = w_ref.shape[-1]
        acc = jnp.zeros((n_out, cout), f32)
        for k in range(K):
            if stride == 1:
                idx = pl.ds(start + k, n_out)
            else:
                idx = pl.ds(start + k, n_out, stride=stride)
            lhs = src[idx, :].astype(bf16)
            acc = acc + jnp.dot(lhs, w_ref[k], preferred_element_type=f32)
        return jnp.maximum(acc + b_ref[...], 0.0)

    def maxpool_k3s2p1(buf, n_out):
        """MaxPool1d(k=3, s=2, p=1) over rows of a zero-padded staging buffer
        whose data starts at row _HALO (values >= 0 after ReLU)."""
        a = buf[pl.ds(_HALO - 1, n_out, stride=2), :]
        b = buf[pl.ds(_HALO, n_out, stride=2), :]
        c = buf[pl.ds(_HALO + 1, n_out, stride=2), :]
        return jnp.maximum(jnp.maximum(a, b), c)

    # stage 1: Conv1d(Cin -> 64, padded to 128, k=7, s=2, p=3) + BN + ReLU + pool
    cp1[pl.ds(_HALO, L), :] = x_ref[0]
    h = conv_taps(cp1, _HALO - 3, lo1, 2, w1_ref, b1_ref)
    pp1[pl.ds(_HALO, lo1), :] = h
    pooled = maxpool_k3s2p1(pp1, l1)

    # stage 2: Conv1d(128 -> 128, k=5, s=1, p=2) + BN + ReLU + pool
    cp2[pl.ds(_HALO, l1), :] = pooled
    h = conv_taps(cp2, _HALO - 2, l1, 1, w2_ref, b2_ref)
    pp2[pl.ds(_HALO, l1), :] = h
    pooled = maxpool_k3s2p1(pp2, l2)

    # stage 3: Conv1d(128 -> D, k=3, s=1, p=1) + BN + ReLU + pool
    cp3[pl.ds(_HALO, l2), :] = pooled
    h = conv_taps(cp3, _HALO - 1, l2, 1, w3_ref, b3_ref)
    pp3[pl.ds(_HALO, l2), :] = h
    pooled = maxpool_k3s2p1(pp3, s_out)

    # epilogue: fold in the positional-encoding add; emit (S, D) features.
    o_ref[0] = pooled + pe_ref[...]


def cnn_feature_extractor(x, params):
    """Conv/BN/ReLU/MaxPool x3 + positional encoding -> (B, S, D) features."""
    B, C, L = x.shape
    assert L % 16 == 0, "input_length must be a multiple of 16"
    cnn = params["cnn"]
    lo1 = (L + 2 * 3 - 7) // 2 + 1      # conv1 output length (stride 2)
    l1 = (lo1 - 1) // 2 + 1             # after maxpool1
    l2 = (l1 - 1) // 2 + 1              # after maxpool2 (conv2 keeps length)
    s_out = (l2 - 1) // 2 + 1           # after maxpool3 (conv3 keeps length)

    c1 = cnn["w1"].shape[-1]            # conv1 out channels (zero-padded, 128)
    c2 = cnn["w2"].shape[-1]            # conv2 out channels (128)
    d = cnn["w3"].shape[-1]             # embedding_dim
    pe = params["pe"][:s_out]           # (S, D)

    x_t = x.transpose(0, 2, 1)          # (B, L, Cin): length on sublanes

    kernel = functools.partial(_cnn_kernel, L=L, lo1=lo1, l1=l1, l2=l2,
                               s_out=s_out)
    return pl.pallas_call(
        kernel,
        out_shape=jax.ShapeDtypeStruct((B, s_out, d), jnp.float32),
        grid=(B,),
        in_specs=[
            pl.BlockSpec((1, L, C), lambda b: (b, 0, 0)),          # input signal
            pl.BlockSpec(cnn["w1"].shape, lambda b: (0, 0, 0)),    # conv1 taps
            pl.BlockSpec((1, c1), lambda b: (0, 0)),               # conv1 bias
            pl.BlockSpec(cnn["w2"].shape, lambda b: (0, 0, 0)),    # conv2 taps
            pl.BlockSpec((1, c2), lambda b: (0, 0)),               # conv2 bias
            pl.BlockSpec(cnn["w3"].shape, lambda b: (0, 0, 0)),    # conv3 taps
            pl.BlockSpec((1, d), lambda b: (0, 0)),                # conv3 bias
            pl.BlockSpec((s_out, d), lambda b: (0, 0)),            # pos. encoding
        ],
        out_specs=pl.BlockSpec((1, s_out, d), lambda b: (b, 0, 0)),
        scratch_shapes=[
            pltpu.VMEM((_HALO + L + _HALO, C), jnp.float32),       # conv1 pad in
            pltpu.VMEM((_HALO + lo1 + _HALO, c1), jnp.float32),    # pool1 staging
            pltpu.VMEM((_HALO + l1 + _HALO, c1), jnp.float32),     # conv2 pad in
            pltpu.VMEM((_HALO + l1 + _HALO, c2), jnp.float32),     # pool2 staging
            pltpu.VMEM((_HALO + l2 + _HALO, c2), jnp.float32),     # conv3 pad in
            pltpu.VMEM((_HALO + l2 + _HALO, d), jnp.float32),      # pool3 staging
        ],
        compiler_params=pltpu.CompilerParams(
            dimension_semantics=("parallel",)),
    )(x_t, cnn["w1"], cnn["b1"], cnn["w2"], cnn["b2"], cnn["w3"], cnn["b3"], pe)


# ------------------- transformer encoder + token predictor -------------------

def _encoder_stack_kernel(x_ref, bias_ref,
                          wqkv_ref, bqkv_ref, wo_ref, bo_ref,
                          g1_ref, be1_ref, w1_ref, b1_ref, w2_ref, b2_ref,
                          g2_ref, be2_ref,
                          tw1_ref, tb1_ref, tw2_ref, tb2_ref,
                          tok_ref,
                          resid, qp, kp, vp, attn_s,
                          *, nhead, num_layers, eps=1e-5):
    """grid=(NL+1,): steps 0..NL-1 run one post-LN encoder layer each on the
    VMEM-resident residual stream; step NL runs the fused token head."""
    l = pl.program_id(0)
    bf16 = jnp.bfloat16

    @pl.when(l == 0)
    def _():
        resid[...] = x_ref[...]            # features (+PE, added in conv kernel)

    @pl.when(l < num_layers)
    def _():
        x = resid[...]                     # (M, D) f32 residual stream
        M, D = x.shape
        H = nhead
        Dh = D // H

        def layer_norm(z, g, b):           # biased variance (PyTorch LayerNorm)
            mu = jnp.mean(z, axis=-1, keepdims=True)
            zc = z - mu
            var = jnp.mean(zc * zc, axis=-1, keepdims=True)
            return zc * lax.rsqrt(var + eps) * g + b

        # fused QKV projection (1/sqrt(Dh) pre-folded into the Q columns)
        qkv = jnp.dot(x.astype(bf16), wqkv_ref[0],
                      preferred_element_type=jnp.float32) + bqkv_ref[0]  # (M,3D)

        # pack all heads into rows: (M, D) -> (H*M, Dh), head-major
        for h in range(H):
            qp[h * M:(h + 1) * M, :] = qkv[:, h * Dh:(h + 1) * Dh].astype(bf16)
            kp[h * M:(h + 1) * M, :] = qkv[:, D + h * Dh:D + (h + 1) * Dh].astype(bf16)
            vp[h * M:(h + 1) * M, :] = qkv[:, 2 * D + h * Dh:2 * D + (h + 1) * Dh].astype(bf16)

        # one wide score matmul, masked to same-head & same-batch blocks
        s = lax.dot_general(qp[...], kp[...], (((1,), (1,)), ((), ())),
                            preferred_element_type=jnp.float32)          # (HM,HM)
        s = s + bias_ref[...]
        m = jnp.max(s, axis=-1, keepdims=True)
        e = jnp.exp(s - m)
        p = e * pl.reciprocal(jnp.sum(e, axis=-1, keepdims=True), approx=True)

        ctx = jnp.dot(p.astype(bf16), vp[...],
                      preferred_element_type=jnp.float32)                 # (HM,Dh)

        # unpack heads back to (M, D)
        for h in range(H):
            attn_s[:, h * Dh:(h + 1) * Dh] = ctx[h * M:(h + 1) * M, :]

        proj = jnp.dot(attn_s[...].astype(bf16), wo_ref[0],
                       preferred_element_type=jnp.float32) + bo_ref[0]
        x1 = layer_norm(x + proj, g1_ref[0], be1_ref[0])

        # feed-forward
        hdn = jnp.dot(x1.astype(bf16), w1_ref[0],
                      preferred_element_type=jnp.float32) + b1_ref[0]
        hdn = jnp.maximum(hdn, 0.0)
        ffn = jnp.dot(hdn.astype(bf16), w2_ref[0],
                      preferred_element_type=jnp.float32) + b2_ref[0]
        resid[...] = layer_norm(x1 + ffn, g2_ref[0], be2_ref[0])

    @pl.when(l == num_layers)
    def _():
        xe = resid[...]
        hdn = jnp.dot(xe.astype(bf16), tw1_ref[...],
                      preferred_element_type=jnp.float32) + tb1_ref[...]
        hdn = jnp.maximum(hdn, 0.0)
        tok_ref[...] = jnp.dot(hdn.astype(bf16), tw2_ref[...],
                               preferred_element_type=jnp.float32) + tb2_ref[...]


def transformer_encode_and_predict(feats, params, *, nhead):
    """All encoder layers + token predictor in ONE pallas_call, grid=(NL+1,)."""
    B, S, D = feats.shape
    assert D % nhead == 0
    M = B * S
    HM = nhead * M
    enc = params["enc"]
    NL = enc["wqkv"].shape[0]
    NT = params["tp2_w"].shape[1]

    # additive attention bias for the head-packed (H*M, H*M) score matrix:
    # rows r = h*M + b*S + s, so r // S encodes (head, batch) jointly.
    grp = jnp.arange(HM, dtype=jnp.int32) // S
    attn_bias = jnp.where(grp[:, None] == grp[None, :], 0.0,
                          _NEG_INF).astype(jnp.float32)

    x2d = feats.reshape(M, D)

    lmap3 = lambda l: (jnp.minimum(l, NL - 1), 0, 0)   # clamp at the head step
    cmap2 = lambda l: (0, 0)

    tokens = pl.pallas_call(
        functools.partial(_encoder_stack_kernel, nhead=nhead, num_layers=NL),
        out_shape=jax.ShapeDtypeStruct((M, NT), jnp.float32),
        grid=(NL + 1,),
        in_specs=[
            pl.BlockSpec((M, D), cmap2),              # features (+PE), resident
            pl.BlockSpec((HM, HM), cmap2),            # attention bias, resident
            pl.BlockSpec((1, D, 3 * D), lmap3),       # Wqkv (bf16, pre-transposed)
            pl.BlockSpec((1, 1, 3 * D), lmap3),       # bqkv
            pl.BlockSpec((1, D, D), lmap3),           # Wout (bf16)
            pl.BlockSpec((1, 1, D), lmap3),           # bout
            pl.BlockSpec((1, 1, D), lmap3),           # ln1 gamma
            pl.BlockSpec((1, 1, D), lmap3),           # ln1 beta
            pl.BlockSpec((1, D, 4 * D), lmap3),       # FFN W1 (bf16)
            pl.BlockSpec((1, 1, 4 * D), lmap3),       # FFN b1
            pl.BlockSpec((1, 4 * D, D), lmap3),       # FFN W2 (bf16)
            pl.BlockSpec((1, 1, D), lmap3),           # FFN b2
            pl.BlockSpec((1, 1, D), lmap3),           # ln2 gamma
            pl.BlockSpec((1, 1, D), lmap3),           # ln2 beta
            pl.BlockSpec((D, 2 * D), cmap2),          # token head W1 (bf16)
            pl.BlockSpec((1, 2 * D), cmap2),          # token head b1
            pl.BlockSpec((2 * D, NT), cmap2),         # token head W2 (bf16)
            pl.BlockSpec((1, NT), cmap2),             # token head b2
        ],
        out_specs=pl.BlockSpec((M, NT), cmap2),       # written at the last step
        scratch_shapes=[
            pltpu.VMEM((M, D), jnp.float32),                  # residual stream
            pltpu.VMEM((HM, D // nhead), jnp.bfloat16),       # packed Q
            pltpu.VMEM((HM, D // nhead), jnp.bfloat16),       # packed K
            pltpu.VMEM((HM, D // nhead), jnp.bfloat16),       # packed V
            pltpu.VMEM((M, D), jnp.float32),                  # unpacked attention
        ],
        compiler_params=pltpu.CompilerParams(
            dimension_semantics=("arbitrary",)),      # layers are sequential
    )(x2d, attn_bias,
      enc["wqkv"], enc["bqkv"], enc["wo"], enc["bo"],
      enc["ln1g"], enc["ln1b"], enc["w1"], enc["b1"],
      enc["w2"], enc["b2"], enc["ln2g"], enc["ln2b"],
      params["tp1_w"], params["tp1_b"], params["tp2_w"], params["tp2_b"])
    return tokens


# ------------------------------ forward wrapper -------------------------------

def brain_tokenizer_forward(x, params, *, nhead):
    feats = cnn_feature_extractor(x, params)             # (B, S, D), PE added
    B, S, _ = feats.shape
    tokens = transformer_encode_and_predict(feats, params, nhead=nhead)
    return tokens.reshape(B, S, -1)


# --------------------------------- parameters ---------------------------------

def make_positional_encoding(max_length, embedding_dim):
    assert embedding_dim % 2 == 0
    pos = jnp.arange(max_length, dtype=jnp.float32)[:, None]
    div = jnp.exp(jnp.arange(0, embedding_dim, 2, dtype=jnp.float32)
                  * (-jnp.log(10000.0) / embedding_dim))
    pe = jnp.zeros((max_length, embedding_dim), dtype=jnp.float32)
    pe = pe.at[:, 0::2].set(jnp.sin(pos * div))
    pe = pe.at[:, 1::2].set(jnp.cos(pos * div))
    return pe


def _fold_conv_bn(cp, *, cout_pad=0, cin_pad=0, eps=1e-5):
    """Fold eval-mode BatchNorm into the conv, pad channels to lane-dense
    widths, and emit tap-major (K, Cin, Cout) bf16 weights + f32 bias."""
    scale = cp["gamma"] / jnp.sqrt(cp["var"] + eps)
    w_eff = cp["w"] * scale[:, None, None]                 # (Cout, Cin, K)
    b_eff = (cp["b"] - cp["mean"]) * scale + cp["beta"]    # (Cout,)
    if cout_pad:
        w_eff = jnp.pad(w_eff, ((0, cout_pad), (0, 0), (0, 0)))
        b_eff = jnp.pad(b_eff, ((0, cout_pad),))
    if cin_pad:
        w_eff = jnp.pad(w_eff, ((0, 0), (0, cin_pad), (0, 0)))
    taps = jnp.transpose(w_eff, (2, 1, 0)).astype(jnp.bfloat16)  # (K, Cin, Cout)
    return taps, b_eff.reshape(1, -1).astype(jnp.float32)


def init_params(key, input_channels, input_length, embedding_dim, n_tokens,
                num_layers, nhead):
    keys = iter(jax.random.split(key, 64))

    def nrm(shape, scale=0.05):
        return scale * jax.random.normal(next(keys), shape, dtype=jnp.float32)

    D = embedding_dim
    NL = num_layers
    bf16 = jnp.bfloat16

    # raw Conv+BN parameters (as the PyTorch module holds them), then folded.
    conv_defs = [(input_channels, 64, 7), (64, 128, 5), (128, D, 3)]
    raw = []
    for cin, cout, k in conv_defs:
        raw.append(dict(w=nrm((cout, cin, k)), b=nrm((cout,)),
                        gamma=1.0 + nrm((cout,)), beta=nrm((cout,)),
                        mean=nrm((cout,)), var=0.5 + jnp.abs(nrm((cout,)))))
    w1t, b1f = _fold_conv_bn(raw[0], cout_pad=128 - 64)   # lane-dense conv1 out
    w2t, b2f = _fold_conv_bn(raw[1], cin_pad=128 - 64)
    w3t, b3f = _fold_conv_bn(raw[2])
    params = {"cnn": dict(w1=w1t, b1=b1f, w2=w2t, b2=b2f, w3=w3t, b3=b3f)}

    # Transformer: stacked per layer, pre-transposed to (K, N), bf16 weights;
    # 1/sqrt(Dh) folded into the Q columns of Wqkv / bqkv.
    dh = D // nhead
    qscale = 1.0 / math.sqrt(dh)
    wqkv = nrm((NL, D, 3 * D)).at[:, :, :D].multiply(qscale)
    bqkv = nrm((NL, 1, 3 * D)).at[:, :, :D].multiply(qscale)
    params["enc"] = dict(
        wqkv=wqkv.astype(bf16), bqkv=bqkv,
        wo=nrm((NL, D, D)).astype(bf16), bo=nrm((NL, 1, D)),
        ln1g=jnp.ones((NL, 1, D), jnp.float32),
        ln1b=jnp.zeros((NL, 1, D), jnp.float32),
        w1=nrm((NL, D, 4 * D)).astype(bf16), b1=nrm((NL, 1, 4 * D)),
        w2=nrm((NL, 4 * D, D)).astype(bf16), b2=nrm((NL, 1, D)),
        ln2g=jnp.ones((NL, 1, D), jnp.float32),
        ln2b=jnp.zeros((NL, 1, D), jnp.float32),
    )

    params["tp1_w"] = nrm((D, 2 * D)).astype(bf16)
    params["tp1_b"] = nrm((1, 2 * D))
    params["tp2_w"] = nrm((2 * D, n_tokens)).astype(bf16)
    params["tp2_b"] = nrm((1, n_tokens))

    # Positional-encoding table (max_length = CNNFeatureExtractor.output_length).
    params["pe"] = make_positional_encoding(input_length // 8, D)
    return params


# ------------------------------------ main ------------------------------------

if __name__ == "__main__":
    B, C, L = 2, 4, 128              # batch, input_channels, input_length
    D, H, NL, NT = 128, 8, 6, 512    # embedding_dim, nhead, layers, n_tokens

    key = jax.random.PRNGKey(0)
    kx, kp = jax.random.split(key)
    x = jax.random.normal(kx, (B, C, L), dtype=jnp.float32)
    params = init_params(kp, C, L, D, NT, NL, H)

    fwd = jax.jit(functools.partial(brain_tokenizer_forward, nhead=H))
    out = jax.block_until_ready(fwd(x, params))

    assert out.shape == (B, L // 16, NT), out.shape
    assert bool(jnp.all(jnp.isfinite(out)))
    print("KERNEL_OK")
</pallas_src>

<mosaic_0001>
module attributes {stable_mosaic.version = 11 : i64} {
  func.func @_cnn_kernel(%arg0: i32, %arg1: memref<1x128x4xf32, #tpu.memory_space<vmem>>, %arg2: memref<7x4x128xbf16, #tpu.memory_space<vmem>>, %arg3: memref<1x128xf32, #tpu.memory_space<vmem>>, %arg4: memref<5x128x128xbf16, #tpu.memory_space<vmem>>, %arg5: memref<1x128xf32, #tpu.memory_space<vmem>>, %arg6: memref<3x128x128xbf16, #tpu.memory_space<vmem>>, %arg7: memref<1x128xf32, #tpu.memory_space<vmem>>, %arg8: memref<8x128xf32, #tpu.memory_space<vmem>>, %arg9: memref<1x8x128xf32, #tpu.memory_space<vmem>>, %arg10: memref<144x4xf32, #tpu.memory_space<vmem>>, %arg11: memref<80x128xf32, #tpu.memory_space<vmem>>, %arg12: memref<48x128xf32, #tpu.memory_space<vmem>>, %arg13: memref<48x128xf32, #tpu.memory_space<vmem>>, %arg14: memref<32x128xf32, #tpu.memory_space<vmem>>, %arg15: memref<32x128xf32, #tpu.memory_space<vmem>>) attributes {dimension_semantics = [#tpu.dimension_semantics<parallel>], iteration_bounds = array<i64: 2>, scalar_prefetch = 0 : i64, scratch_operands = 6 : i64, tpu.core_type = #tpu.core_type<tc>, window_params = [{transform_indices = @transform_0, window_bounds = array<i64: 1, 128, 4>}, {pipeline_mode = #tpu.pipeline_mode<synchronous>, transform_indices = @transform_1, window_bounds = array<i64: 7, 4, 128>}, {pipeline_mode = #tpu.pipeline_mode<synchronous>, transform_indices = @transform_2, window_bounds = array<i64: 1, 128>}, {pipeline_mode = #tpu.pipeline_mode<synchronous>, transform_indices = @transform_3, window_bounds = array<i64: 5, 128, 128>}, {pipeline_mode = #tpu.pipeline_mode<synchronous>, transform_indices = @transform_4, window_bounds = array<i64: 1, 128>}, {pipeline_mode = #tpu.pipeline_mode<synchronous>, transform_indices = @transform_5, window_bounds = array<i64: 3, 128, 128>}, {pipeline_mode = #tpu.pipeline_mode<synchronous>, transform_indices = @transform_6, window_bounds = array<i64: 1, 128>}, {pipeline_mode = #tpu.pipeline_mode<synchronous>, transform_indices = @transform_7, window_bounds = array<i64: 8, 128>}, {transform_indices = @transform_8, window_bounds = array<i64: 1, 8, 128>}]} {
    %cst = arith.constant 0.000000e+00 : f32
    %0 = vector.broadcast %cst : f32 to vector<144x4xf32>
    %c0 = arith.constant 0 : index
    %c0_0 = arith.constant 0 : index
    %1 = vector.load %arg10[%c0, %c0_0] : memref<144x4xf32, #tpu.memory_space<vmem>>, vector<144x4xf32>
    tpu.vector_store %arg10[%c0, %c0_0], %0 {strides = array<i32>} : memref<144x4xf32, #tpu.memory_space<vmem>>, vector<144x4xf32>,
    %cst_1 = arith.constant 0.000000e+00 : f32
    %2 = vector.broadcast %cst_1 : f32 to vector<80x128xf32>
    %c0_2 = arith.constant 0 : index
    %c0_3 = arith.constant 0 : index
    %3 = vector.load %arg11[%c0_2, %c0_3] : memref<80x128xf32, #tpu.memory_space<vmem>>, vector<80x128xf32>
    tpu.vector_store %arg11[%c0_2, %c0_3], %2 {strides = array<i32>} : memref<80x128xf32, #tpu.memory_space<vmem>>, vector<80x128xf32>,
    %cst_4 = arith.constant 0.000000e+00 : f32
    %4 = vector.broadcast %cst_4 : f32 to vector<48x128xf32>
    %c0_5 = arith.constant 0 : index
    %c0_6 = arith.constant 0 : index
    %5 = vector.load %arg12[%c0_5, %c0_6] : memref<48x128xf32, #tpu.memory_space<vmem>>, vector<48x128xf32>
    tpu.vector_store %arg12[%c0_5, %c0_6], %4 {strides = array<i32>} : memref<48x128xf32, #tpu.memory_space<vmem>>, vector<48x128xf32>,
    %cst_7 = arith.constant 0.000000e+00 : f32
    %6 = vector.broadcast %cst_7 : f32 to vector<48x128xf32>
    %c0_8 = arith.constant 0 : index
    %c0_9 = arith.constant 0 : index
    %7 = vector.load %arg13[%c0_8, %c0_9] : memref<48x128xf32, #tpu.memory_space<vmem>>, vector<48x128xf32>
    tpu.vector_store %arg13[%c0_8, %c0_9], %6 {strides = array<i32>} : memref<48x128xf32, #tpu.memory_space<vmem>>, vector<48x128xf32>,
    %cst_10 = arith.constant 0.000000e+00 : f32
    %8 = vector.broadcast %cst_10 : f32 to vector<32x128xf32>
    %c0_11 = arith.constant 0 : index
    %c0_12 = arith.constant 0 : index
    %9 = vector.load %arg14[%c0_11, %c0_12] : memref<32x128xf32, #tpu.memory_space<vmem>>, vector<32x128xf32>
    tpu.vector_store %arg14[%c0_11, %c0_12], %8 {strides = array<i32>} : memref<32x128xf32, #tpu.memory_space<vmem>>, vector<32x128xf32>,
    %cst_13 = arith.constant 0.000000e+00 : f32
    %10 = vector.broadcast %cst_13 : f32 to vector<32x128xf32>
    %c0_14 = arith.constant 0 : index
    %c0_15 = arith.constant 0 : index
    %11 = vector.load %arg15[%c0_14, %c0_15] : memref<32x128xf32, #tpu.memory_space<vmem>>, vector<32x128xf32>
    tpu.vector_store %arg15[%c0_14, %c0_15], %10 {strides = array<i32>} : memref<32x128xf32, #tpu.memory_space<vmem>>, vector<32x128xf32>,
    %c0_16 = arith.constant 0 : index
    %c0_17 = arith.constant 0 : index
    %c0_18 = arith.constant 0 : index
    %12 = vector.load %arg1[%c0_16, %c0_17, %c0_18] : memref<1x128x4xf32, #tpu.memory_space<vmem>>, vector<1x128x4xf32>
    %13 = vector.shape_cast %12 : vector<1x128x4xf32> to vector<128x4xf32>
    %c8 = arith.constant 8 : index
    %c0_19 = arith.constant 0 : index
    %14 = vector.load %arg10[%c8, %c0_19] : memref<144x4xf32, #tpu.memory_space<vmem>>, vector<128x4xf32>
    tpu.vector_store %arg10[%c8, %c0_19], %13 {strides = array<i32>} : memref<144x4xf32, #tpu.memory_space<vmem>>, vector<128x4xf32>,
    %cst_20 = arith.constant 0.000000e+00 : f32
    %15 = vector.broadcast %cst_20 : f32 to vector<64x128xf32>
    %c5 = arith.constant 5 : index
    %c0_21 = arith.constant 0 : index
    %16 = tpu.strided_load %arg10[%c5, %c0_21] {strides = array<i32: 2, 1>} : memref<144x4xf32, #tpu.memory_space<vmem>>, vector<64x4xf32>
    %17 = arith.truncf %16 : vector<64x4xf32> to vector<64x4xbf16>
    %c0_22 = arith.constant 0 : index
    %c0_23 = arith.constant 0 : index
    %c0_24 = arith.constant 0 : index
    %18 = vector.load %arg2[%c0_22, %c0_23, %c0_24] : memref<7x4x128xbf16, #tpu.memory_space<vmem>>, vector<1x4x128xbf16>
    %19 = vector.shape_cast %18 : vector<1x4x128xbf16> to vector<4x128xbf16>
    %cst_25 = arith.constant dense<0.000000e+00> : vector<64x128xf32>
    %20 = tpu.matmul %17, %19, %cst_25 {dimension_numbers = #tpu.dot_dimension_numbers<[1], [0], [0], [1], [0, 0, 1, 1], [], []>} : vector<64x4xbf16>, vector<4x128xbf16>, vector<64x128xf32> -> vector<64x128xf32>
    %21 = arith.addf %15, %20 : vector<64x128xf32>
    %c6 = arith.constant 6 : index
    %c0_26 = arith.constant 0 : index
    %22 = tpu.strided_load %arg10[%c6, %c0_26] {strides = array<i32: 2, 1>} : memref<144x4xf32, #tpu.memory_space<vmem>>, vector<64x4xf32>
    %23 = arith.truncf %22 : vector<64x4xf32> to vector<64x4xbf16>
    %c1 = arith.constant 1 : index
    %c0_27 = arith.constant 0 : index
    %c0_28 = arith.constant 0 : index
    %24 = vector.load %arg2[%c1, %c0_27, %c0_28] : memref<7x4x128xbf16, #tpu.memory_space<vmem>>, vector<1x4x128xbf16>
    %25 = vector.shape_cast %24 : vector<1x4x128xbf16> to vector<4x128xbf16>
    %cst_29 = arith.constant dense<0.000000e+00> : vector<64x128xf32>
    %26 = tpu.matmul %23, %25, %cst_29 {dimension_numbers = #tpu.dot_dimension_numbers<[1], [0], [0], [1], [0, 0, 1, 1], [], []>} : vector<64x4xbf16>, vector<4x128xbf16>, vector<64x128xf32> -> vector<64x128xf32>
    %27 = arith.addf %21, %26 : vector<64x128xf32>
    %c7 = arith.constant 7 : index
    %c0_30 = arith.constant 0 : index
    %28 = tpu.strided_load %arg10[%c7, %c0_30] {strides = array<i32: 2, 1>} : memref<144x4xf32, #tpu.memory_space<vmem>>, vector<64x4xf32>
    %29 = arith.truncf %28 : vector<64x4xf32> to vector<64x4xbf16>
    %c2 = arith.constant 2 : index
    %c0_31 = arith.constant 0 : index
    %c0_32 = arith.constant 0 : index
    %30 = vector.load %arg2[%c2, %c0_31, %c0_32] : memref<7x4x128xbf16, #tpu.memory_space<vmem>>, vector<1x4x128xbf16>
    %31 = vector.shape_cast %30 : vector<1x4x128xbf16> to vector<4x128xbf16>
    %cst_33 = arith.constant dense<0.000000e+00> : vector<64x128xf32>
    %32 = tpu.matmul %29, %31, %cst_33 {dimension_numbers = #tpu.dot_dimension_numbers<[1], [0], [0], [1], [0, 0, 1, 1], [], []>} : vector<64x4xbf16>, vector<4x128xbf16>, vector<64x128xf32> -> vector<64x128xf32>
    %33 = arith.addf %27, %32 : vector<64x128xf32>
    %c8_34 = arith.constant 8 : index
    %c0_35 = arith.constant 0 : index
    %34 = tpu.strided_load %arg10[%c8_34, %c0_35] {strides = array<i32: 2, 1>} : memref<144x4xf32, #tpu.memory_space<vmem>>, vector<64x4xf32>
    %35 = arith.truncf %34 : vector<64x4xf32> to vector<64x4xbf16>
    %c3 = arith.constant 3 : index
    %c0_36 = arith.constant 0 : index
    %c0_37 = arith.constant 0 : index
    %36 = vector.load %arg2[%c3, %c0_36, %c0_37] : memref<7x4x128xbf16, #tpu.memory_space<vmem>>, vector<1x4x128xbf16>
    %37 = vector.shape_cast %36 : vector<1x4x128xbf16> to vector<4x128xbf16>
    %cst_38 = arith.constant dense<0.000000e+00> : vector<64x128xf32>
    %38 = tpu.matmul %35, %37, %cst_38 {dimension_numbers = #tpu.dot_dimension_numbers<[1], [0], [0], [1], [0, 0, 1, 1], [], []>} : vector<64x4xbf16>, vector<4x128xbf16>, vector<64x128xf32> -> vector<64x128xf32>
    %39 = arith.addf %33, %38 : vector<64x128xf32>
    %c9 = arith.constant 9 : index
    %c0_39 = arith.constant 0 : index
    %40 = tpu.strided_load %arg10[%c9, %c0_39] {strides = array<i32: 2, 1>} : memref<144x4xf32, #tpu.memory_space<vmem>>, vector<64x4xf32>
    %41 = arith.truncf %40 : vector<64x4xf32> to vector<64x4xbf16>
    %c4 = arith.constant 4 : index
    %c0_40 = arith.constant 0 : index
    %c0_41 = arith.constant 0 : index
    %42 = vector.load %arg2[%c4, %c0_40, %c0_41] : memref<7x4x128xbf16, #tpu.memory_space<vmem>>, vector<1x4x128xbf16>
    %43 = vector.shape_cast %42 : vector<1x4x128xbf16> to vector<4x128xbf16>
    %cst_42 = arith.constant dense<0.000000e+00> : vector<64x128xf32>
    %44 = tpu.matmul %41, %43, %cst_42 {dimension_numbers = #tpu.dot_dimension_numbers<[1], [0], [0], [1], [0, 0, 1, 1], [], []>} : vector<64x4xbf16>, vector<4x128xbf16>, vector<64x128xf32> -> vector<64x128xf32>
    %45 = arith.addf %39, %44 : vector<64x128xf32>
    %c10 = arith.constant 10 : index
    %c0_43 = arith.constant 0 : index
    %46 = tpu.strided_load %arg10[%c10, %c0_43] {strides = array<i32: 2, 1>} : memref<144x4xf32, #tpu.memory_space<vmem>>, vector<64x4xf32>
    %47 = arith.truncf %46 : vector<64x4xf32> to vector<64x4xbf16>
    %c5_44 = arith.constant 5 : index
    %c0_45 = arith.constant 0 : index
    %c0_46 = arith.constant 0 : index
    %48 = vector.load %arg2[%c5_44, %c0_45, %c0_46] : memref<7x4x128xbf16, #tpu.memory_space<vmem>>, vector<1x4x128xbf16>
    %49 = vector.shape_cast %48 : vector<1x4x128xbf16> to vector<4x128xbf16>
    %cst_47 = arith.constant dense<0.000000e+00> : vector<64x128xf32>
    %50 = tpu.matmul %47, %49, %cst_47 {dimension_numbers = #tpu.dot_dimension_numbers<[1], [0], [0], [1], [0, 0, 1, 1], [], []>} : vector<64x4xbf16>, vector<4x128xbf16>, vector<64x128xf32> -> vector<64x128xf32>
    %51 = arith.addf %45, %50 : vector<64x128xf32>
    %c11 = arith.constant 11 : index
    %c0_48 = arith.constant 0 : index
    %52 = tpu.strided_load %arg10[%c11, %c0_48] {strides = array<i32: 2, 1>} : memref<144x4xf32, #tpu.memory_space<vmem>>, vector<64x4xf32>
    %53 = arith.truncf %52 : vector<64x4xf32> to vector<64x4xbf16>
    %c6_49 = arith.constant 6 : index
    %c0_50 = arith.constant 0 : index
    %c0_51 = arith.constant 0 : index
    %54 = vector.load %arg2[%c6_49, %c0_50, %c0_51] : memref<7x4x128xbf16, #tpu.memory_space<vmem>>, vector<1x4x128xbf16>
    %55 = vector.shape_cast %54 : vector<1x4x128xbf16> to vector<4x128xbf16>
    %cst_52 = arith.constant dense<0.000000e+00> : vector<64x128xf32>
    %56 = tpu.matmul %53, %55, %cst_52 {dimension_numbers = #tpu.dot_dimension_numbers<[1], [0], [0], [1], [0, 0, 1, 1], [], []>} : vector<64x4xbf16>, vector<4x128xbf16>, vector<64x128xf32> -> vector<64x128xf32>
    %57 = arith.addf %51, %56 : vector<64x128xf32>
    %c0_53 = arith.constant 0 : index
    %c0_54 = arith.constant 0 : index
    %58 = vector.load %arg3[%c0_53, %c0_54] : memref<1x128xf32, #tpu.memory_space<vmem>>, vector<1x128xf32>
    %59 = vector.broadcast %58 : vector<1x128xf32> to vector<64x128xf32>
    %60 = arith.addf %57, %59 : vector<64x128xf32>
    %cst_55 = arith.constant 0.000000e+00 : f32
    %61 = vector.broadcast %cst_55 : f32 to vector<64x128xf32>
    %62 = arith.maximumf %60, %61 : vector<64x128xf32>
    %c8_56 = arith.constant 8 : index
    %c0_57 = arith.constant 0 : index
    %63 = vector.load %arg11[%c8_56, %c0_57] : memref<80x128xf32, #tpu.memory_space<vmem>>, vector<64x128xf32>
    tpu.vector_store %arg11[%c8_56, %c0_57], %62 {strides = array<i32>} : memref<80x128xf32, #tpu.memory_space<vmem>>, vector<64x128xf32>,
    %c7_58 = arith.constant 7 : index
    %c0_59 = arith.constant 0 : index
    %64 = tpu.strided_load %arg11[%c7_58, %c0_59] {strides = array<i32: 2, 1>} : memref<80x128xf32, #tpu.memory_space<vmem>>, vector<32x128xf32>
    %c8_60 = arith.constant 8 : index
    %c0_61 = arith.constant 0 : index
    %65 = tpu.strided_load %arg11[%c8_60, %c0_61] {strides = array<i32: 2, 1>} : memref<80x128xf32, #tpu.memory_space<vmem>>, vector<32x128xf32>
    %c9_62 = arith.constant 9 : index
    %c0_63 = arith.constant 0 : index
    %66 = tpu.strided_load %arg11[%c9_62, %c0_63] {strides = array<i32: 2, 1>} : memref<80x128xf32, #tpu.memory_space<vmem>>, vector<32x128xf32>
    %67 = arith.maximumf %64, %65 : vector<32x128xf32>
    %68 = arith.maximumf %67, %66 : vector<32x128xf32>
    %c8_64 = arith.constant 8 : index
    %c0_65 = arith.constant 0 : index
    %69 = vector.load %arg12[%c8_64, %c0_65] : memref<48x128xf32, #tpu.memory_space<vmem>>, vector<32x128xf32>
    tpu.vector_store %arg12[%c8_64, %c0_65], %68 {strides = array<i32>} : memref<48x128xf32, #tpu.memory_space<vmem>>, vector<32x128xf32>,
    %cst_66 = arith.constant 0.000000e+00 : f32
    %70 = vector.broadcast %cst_66 : f32 to vector<32x128xf32>
    %c6_67 = arith.constant 6 : index
    %c0_68 = arith.constant 0 : index
    %71 = vector.load %arg12[%c6_67, %c0_68] : memref<48x128xf32, #tpu.memory_space<vmem>>, vector<32x128xf32>
    %72 = arith.truncf %71 : vector<32x128xf32> to vector<32x128xbf16>
    %c0_69 = arith.constant 0 : index
    %c0_70 = arith.constant 0 : index
    %c0_71 = arith.constant 0 : index
    %73 = vector.load %arg4[%c0_69, %c0_70, %c0_71] : memref<5x128x128xbf16, #tpu.memory_space<vmem>>, vector<1x128x128xbf16>
    %74 = vector.shape_cast %73 : vector<1x128x128xbf16> to vector<128x128xbf16>
    %cst_72 = arith.constant dense<0.000000e+00> : vector<32x128xf32>
    %75 = tpu.matmul %72, %74, %cst_72 {dimension_numbers = #tpu.dot_dimension_numbers<[1], [0], [0], [1], [0, 0, 1, 1], [], []>} : vector<32x128xbf16>, vector<128x128xbf16>, vector<32x128xf32> -> vector<32x128xf32>
    %76 = arith.addf %70, %75 : vector<32x128xf32>
    %c7_73 = arith.constant 7 : index
    %c0_74 = arith.constant 0 : index
    %77 = vector.load %arg12[%c7_73, %c0_74] : memref<48x128xf32, #tpu.memory_space<vmem>>, vector<32x128xf32>
    %78 = arith.truncf %77 : vector<32x128xf32> to vector<32x128xbf16>
    %c1_75 = arith.constant 1 : index
    %c0_76 = arith.constant 0 : index
    %c0_77 = arith.constant 0 : index
    %79 = vector.load %arg4[%c1_75, %c0_76, %c0_77] : memref<5x128x128xbf16, #tpu.memory_space<vmem>>, vector<1x128x128xbf16>
    %80 = vector.shape_cast %79 : vector<1x128x128xbf16> to vector<128x128xbf16>
    %cst_78 = arith.constant dense<0.000000e+00> : vector<32x128xf32>
    %81 = tpu.matmul %78, %80, %cst_78 {dimension_numbers = #tpu.dot_dimension_numbers<[1], [0], [0], [1], [0, 0, 1, 1], [], []>} : vector<32x128xbf16>, vector<128x128xbf16>, vector<32x128xf32> -> vector<32x128xf32>
    %82 = arith.addf %76, %81 : vector<32x128xf32>
    %c8_79 = arith.constant 8 : index
    %c0_80 = arith.constant 0 : index
    %83 = vector.load %arg12[%c8_79, %c0_80] : memref<48x128xf32, #tpu.memory_space<vmem>>, vector<32x128xf32>
    %84 = arith.truncf %83 : vector<32x128xf32> to vector<32x128xbf16>
    %c2_81 = arith.constant 2 : index
    %c0_82 = arith.constant 0 : index
    %c0_83 = arith.constant 0 : index
    %85 = vector.load %arg4[%c2_81, %c0_82, %c0_83] : memref<5x128x128xbf16, #tpu.memory_space<vmem>>, vector<1x128x128xbf16>
    %86 = vector.shape_cast %85 : vector<1x128x128xbf16> to vector<128x128xbf16>
    %cst_84 = arith.constant dense<0.000000e+00> : vector<32x128xf32>
    %87 = tpu.matmul %84, %86, %cst_84 {dimension_numbers = #tpu.dot_dimension_numbers<[1], [0], [0], [1], [0, 0, 1, 1], [], []>} : vector<32x128xbf16>, vector<128x128xbf16>, vector<32x128xf32> -> vector<32x128xf32>
    %88 = arith.addf %82, %87 : vector<32x128xf32>
    %c9_85 = arith.constant 9 : index
    %c0_86 = arith.constant 0 : index
    %89 = vector.load %arg12[%c9_85, %c0_86] : memref<48x128xf32, #tpu.memory_space<vmem>>, vector<32x128xf32>
    %90 = arith.truncf %89 : vector<32x128xf32> to vector<32x128xbf16>
    %c3_87 = arith.constant 3 : index
    %c0_88 = arith.constant 0 : index
    %c0_89 = arith.constant 0 : index
    %91 = vector.load %arg4[%c3_87, %c0_88, %c0_89] : memref<5x128x128xbf16, #tpu.memory_space<vmem>>, vector<1x128x128xbf16>
    %92 = vector.shape_cast %91 : vector<1x128x128xbf16> to vector<128x128xbf16>
    %cst_90 = arith.constant dense<0.000000e+00> : vector<32x128xf32>
    %93 = tpu.matmul %90, %92, %cst_90 {dimension_numbers = #tpu.dot_dimension_numbers<[1], [0], [0], [1], [0, 0, 1, 1], [], []>} : vector<32x128xbf16>, vector<128x128xbf16>, vector<32x128xf32> -> vector<32x128xf32>
    %94 = arith.addf %88, %93 : vector<32x128xf32>
    %c10_91 = arith.constant 10 : index
    %c0_92 = arith.constant 0 : index
    %95 = vector.load %arg12[%c10_91, %c0_92] : memref<48x128xf32, #tpu.memory_space<vmem>>, vector<32x128xf32>
    %96 = arith.truncf %95 : vector<32x128xf32> to vector<32x128xbf16>
    %c4_93 = arith.constant 4 : index
    %c0_94 = arith.constant 0 : index
    %c0_95 = arith.constant 0 : index
    %97 = vector.load %arg4[%c4_93, %c0_94, %c0_95] : memref<5x128x128xbf16, #tpu.memory_space<vmem>>, vector<1x128x128xbf16>
    %98 = vector.shape_cast %97 : vector<1x128x128xbf16> to vector<128x128xbf16>
    %cst_96 = arith.constant dense<0.000000e+00> : vector<32x128xf32>
    %99 = tpu.matmul %96, %98, %cst_96 {dimension_numbers = #tpu.dot_dimension_numbers<[1], [0], [0], [1], [0, 0, 1, 1], [], []>} : vector<32x128xbf16>, vector<128x128xbf16>, vector<32x128xf32> -> vector<32x128xf32>
    %100 = arith.addf %94, %99 : vector<32x128xf32>
    %c0_97 = arith.constant 0 : index
    %c0_98 = arith.constant 0 : index
    %101 = vector.load %arg5[%c0_97, %c0_98] : memref<1x128xf32, #tpu.memory_space<vmem>>, vector<1x128xf32>
    %102 = vector.broadcast %101 : vector<1x128xf32> to vector<32x128xf32>
    %103 = arith.addf %100, %102 : vector<32x128xf32>
    %cst_99 = arith.constant 0.000000e+00 : f32
    %104 = vector.broadcast %cst_99 : f32 to vector<32x128xf32>
    %105 = arith.maximumf %103, %104 : vector<32x128xf32>
    %c8_100 = arith.constant 8 : index
    %c0_101 = arith.constant 0 : index
    %106 = vector.load %arg13[%c8_100, %c0_101] : memref<48x128xf32, #tpu.memory_space<vmem>>, vector<32x128xf32>
    tpu.vector_store %arg13[%c8_100, %c0_101], %105 {strides = array<i32>} : memref<48x128xf32, #tpu.memory_space<vmem>>, vector<32x128xf32>,
    %c7_102 = arith.constant 7 : index
    %c0_103 = arith.constant 0 : index
    %107 = tpu.strided_load %arg13[%c7_102, %c0_103] {strides = array<i32: 2, 1>} : memref<48x128xf32, #tpu.memory_space<vmem>>, vector<16x128xf32>
    %c8_104 = arith.constant 8 : index
    %c0_105 = arith.constant 0 : index
    %108 = tpu.strided_load %arg13[%c8_104, %c0_105] {strides = array<i32: 2, 1>} : memref<48x128xf32, #tpu.memory_space<vmem>>, vector<16x128xf32>
    %c9_106 = arith.constant 9 : index
    %c0_107 = arith.constant 0 : index
    %109 = tpu.strided_load %arg13[%c9_106, %c0_107] {strides = array<i32: 2, 1>} : memref<48x128xf32, #tpu.memory_space<vmem>>, vector<16x128xf32>
    %110 = arith.maximumf %107, %108 : vector<16x128xf32>
    %111 = arith.maximumf %110, %109 : vector<16x128xf32>
    %c8_108 = arith.constant 8 : index
    %c0_109 = arith.constant 0 : index
    %112 = vector.load %arg14[%c8_108, %c0_109] : memref<32x128xf32, #tpu.memory_space<vmem>>, vector<16x128xf32>
    tpu.vector_store %arg14[%c8_108, %c0_109], %111 {strides = array<i32>} : memref<32x128xf32, #tpu.memory_space<vmem>>, vector<16x128xf32>,
    %cst_110 = arith.constant 0.000000e+00 : f32
    %113 = vector.broadcast %cst_110 : f32 to vector<16x128xf32>
    %c7_111 = arith.constant 7 : index
    %c0_112 = arith.constant 0 : index
    %114 = vector.load %arg14[%c7_111, %c0_112] : memref<32x128xf32, #tpu.memory_space<vmem>>, vector<16x128xf32>
    %115 = arith.truncf %114 : vector<16x128xf32> to vector<16x128xbf16>
    %c0_113 = arith.constant 0 : index
    %c0_114 = arith.constant 0 : index
    %c0_115 = arith.constant 0 : index
    %116 = vector.load %arg6[%c0_113, %c0_114, %c0_115] : memref<3x128x128xbf16, #tpu.memory_space<vmem>>, vector<1x128x128xbf16>
    %117 = vector.shape_cast %116 : vector<1x128x128xbf16> to vector<128x128xbf16>
    %cst_116 = arith.constant dense<0.000000e+00> : vector<16x128xf32>
    %118 = tpu.matmul %115, %117, %cst_116 {dimension_numbers = #tpu.dot_dimension_numbers<[1], [0], [0], [1], [0, 0, 1, 1], [], []>} : vector<16x128xbf16>, vector<128x128xbf16>, vector<16x128xf32> -> vector<16x128xf32>
    %119 = arith.addf %113, %118 : vector<16x128xf32>
    %c8_117 = arith.constant 8 : index
    %c0_118 = arith.constant 0 : index
    %120 = vector.load %arg14[%c8_117, %c0_118] : memref<32x128xf32, #tpu.memory_space<vmem>>, vector<16x128xf32>
    %121 = arith.truncf %120 : vector<16x128xf32> to vector<16x128xbf16>
    %c1_119 = arith.constant 1 : index
    %c0_120 = arith.constant 0 : index
    %c0_121 = arith.constant 0 : index
    %122 = vector.load %arg6[%c1_119, %c0_120, %c0_121] : memref<3x128x128xbf16, #tpu.memory_space<vmem>>, vector<1x128x128xbf16>
    %123 = vector.shape_cast %122 : vector<1x128x128xbf16> to vector<128x128xbf16>
    %cst_122 = arith.constant dense<0.000000e+00> : vector<16x128xf32>
    %124 = tpu.matmul %121, %123, %cst_122 {dimension_numbers = #tpu.dot_dimension_numbers<[1], [0], [0], [1], [0, 0, 1, 1], [], []>} : vector<16x128xbf16>, vector<128x128xbf16>, vector<16x128xf32> -> vector<16x128xf32>
    %125 = arith.addf %119, %124 : vector<16x128xf32>
    %c9_123 = arith.constant 9 : index
    %c0_124 = arith.constant 0 : index
    %126 = vector.load %arg14[%c9_123, %c0_124] : memref<32x128xf32, #tpu.memory_space<vmem>>, vector<16x128xf32>
    %127 = arith.truncf %126 : vector<16x128xf32> to vector<16x128xbf16>
    %c2_125 = arith.constant 2 : index
    %c0_126 = arith.constant 0 : index
    %c0_127 = arith.constant 0 : index
    %128 = vector.load %arg6[%c2_125, %c0_126, %c0_127] : memref<3x128x128xbf16, #tpu.memory_space<vmem>>, vector<1x128x128xbf16>
    %129 = vector.shape_cast %128 : vector<1x128x128xbf16> to vector<128x128xbf16>
    %cst_128 = arith.constant dense<0.000000e+00> : vector<16x128xf32>
    %130 = tpu.matmul %127, %129, %cst_128 {dimension_numbers = #tpu.dot_dimension_numbers<[1], [0], [0], [1], [0, 0, 1, 1], [], []>} : vector<16x128xbf16>, vector<128x128xbf16>, vector<16x128xf32> -> vector<16x128xf32>
    %131 = arith.addf %125, %130 : vector<16x128xf32>
    %c0_129 = arith.constant 0 : index
    %c0_130 = arith.constant 0 : index
    %132 = vector.load %arg7[%c0_129, %c0_130] : memref<1x128xf32, #tpu.memory_space<vmem>>, vector<1x128xf32>
    %133 = vector.broadcast %132 : vector<1x128xf32> to vector<16x128xf32>
    %134 = arith.addf %131, %133 : vector<16x128xf32>
    %cst_131 = arith.constant 0.000000e+00 : f32
    %135 = vector.broadcast %cst_131 : f32 to vector<16x128xf32>
    %136 = arith.maximumf %134, %135 : vector<16x128xf32>
    %c8_132 = arith.constant 8 : index
    %c0_133 = arith.constant 0 : index
    %137 = vector.load %arg15[%c8_132, %c0_133] : memref<32x128xf32, #tpu.memory_space<vmem>>, vector<16x128xf32>
    tpu.vector_store %arg15[%c8_132, %c0_133], %136 {strides = array<i32>} : memref<32x128xf32, #tpu.memory_space<vmem>>, vector<16x128xf32>,
    %c7_134 = arith.constant 7 : index
    %c0_135 = arith.constant 0 : index
    %138 = tpu.strided_load %arg15[%c7_134, %c0_135] {strides = array<i32: 2, 1>} : memref<32x128xf32, #tpu.memory_space<vmem>>, vector<8x128xf32>
    %c8_136 = arith.constant 8 : index
    %c0_137 = arith.constant 0 : index
    %139 = tpu.strided_load %arg15[%c8_136, %c0_137] {strides = array<i32: 2, 1>} : memref<32x128xf32, #tpu.memory_space<vmem>>, vector<8x128xf32>
    %c9_138 = arith.constant 9 : index
    %c0_139 = arith.constant 0 : index
    %140 = tpu.strided_load %arg15[%c9_138, %c0_139] {strides = array<i32: 2, 1>} : memref<32x128xf32, #tpu.memory_space<vmem>>, vector<8x128xf32>
    %141 = arith.maximumf %138, %139 : vector<8x128xf32>
    %142 = arith.maximumf %141, %140 : vector<8x128xf32>
    %c0_140 = arith.constant 0 : index
    %c0_141 = arith.constant 0 : index
    %143 = vector.load %arg8[%c0_140, %c0_141] : memref<8x128xf32, #tpu.memory_space<vmem>>, vector<8x128xf32>
    %144 = arith.addf %142, %143 : vector<8x128xf32>
    %c0_142 = arith.constant 0 : index
    %c0_143 = arith.constant 0 : index
    %c0_144 = arith.constant 0 : index
    %145 = vector.load %arg9[%c0_142, %c0_143, %c0_144] : memref<1x8x128xf32, #tpu.memory_space<vmem>>, vector<1x8x128xf32>
    %146 = vector.shape_cast %145 : vector<1x8x128xf32> to vector<8x128xf32>
    %147 = vector.shape_cast %144 : vector<8x128xf32> to vector<1x8x128xf32>
    tpu.vector_store %arg9[%c0_142, %c0_143, %c0_144], %147 {strides = array<i32>} : memref<1x8x128xf32, #tpu.memory_space<vmem>>, vector<1x8x128xf32>,
    return
  }
  func.func @transform_0(%arg0: i32) -> (i32, i32, i32) {
    %c0_i32 = arith.constant 0 : i32
    %c0_i32_0 = arith.constant 0 : i32
    %c0_i32_1 = arith.constant 0 : i32
    return %arg0, %c0_i32, %c0_i32_0 : i32, i32, i32
  }
  func.func @transform_1(%arg0: i32) -> (i32, i32, i32) {
    %c0_i32 = arith.constant 0 : i32
    %c0_i32_0 = arith.constant 0 : i32
    %c0_i32_1 = arith.constant 0 : i32
    %c0_i32_2 = arith.constant 0 : i32
    return %c0_i32, %c0_i32_0, %c0_i32_1 : i32, i32, i32
  }
  func.func @transform_2(%arg0: i32) -> (i32, i32) {
    %c0_i32 = arith.constant 0 : i32
    %c0_i32_0 = arith.constant 0 : i32
    %c0_i32_1 = arith.constant 0 : i32
    return %c0_i32, %c0_i32_0 : i32, i32
  }
  func.func @transform_3(%arg0: i32) -> (i32, i32, i32) {
    %c0_i32 = arith.constant 0 : i32
    %c0_i32_0 = arith.constant 0 : i32
    %c0_i32_1 = arith.constant 0 : i32
    %c0_i32_2 = arith.constant 0 : i32
    return %c0_i32, %c0_i32_0, %c0_i32_1 : i32, i32, i32
  }
  func.func @transform_4(%arg0: i32) -> (i32, i32) {
    %c0_i32 = arith.constant 0 : i32
    %c0_i32_0 = arith.constant 0 : i32
    %c0_i32_1 = arith.constant 0 : i32
    return %c0_i32, %c0_i32_0 : i32, i32
  }
  func.func @transform_5(%arg0: i32) -> (i32, i32, i32) {
    %c0_i32 = arith.constant 0 : i32
    %c0_i32_0 = arith.constant 0 : i32
    %c0_i32_1 = arith.constant 0 : i32
    %c0_i32_2 = arith.constant 0 : i32
    return %c0_i32, %c0_i32_0, %c0_i32_1 : i32, i32, i32
  }
  func.func @transform_6(%arg0: i32) -> (i32, i32) {
    %c0_i32 = arith.constant 0 : i32
    %c0_i32_0 = arith.constant 0 : i32
    %c0_i32_1 = arith.constant 0 : i32
    return %c0_i32, %c0_i32_0 : i32, i32
  }
  func.func @transform_7(%arg0: i32) -> (i32, i32) {
    %c0_i32 = arith.constant 0 : i32
    %c0_i32_0 = arith.constant 0 : i32
    %c0_i32_1 = arith.constant 0 : i32
    return %c0_i32, %c0_i32_0 : i32, i32
  }
  func.func @transform_8(%arg0: i32) -> (i32, i32, i32) {
    %c0_i32 = arith.constant 0 : i32
    %c0_i32_0 = arith.constant 0 : i32
    %c0_i32_1 = arith.constant 0 : i32
    return %arg0, %c0_i32, %c0_i32_0 : i32, i32, i32
  }
}

module attributes {stable_mosaic.version = 11 : i64} {
  func.func @_encoder_stack_kernel(%arg0: i32, %arg1: memref<16x128xf32, #tpu.memory_space<vmem>>, %arg2: memref<128x128xf32, #tpu.memory_space<vmem>>, %arg3: memref<1x128x384xbf16, #tpu.memory_space<vmem>>, %arg4: memref<1x1x384xf32, #tpu.memory_space<vmem>>, %arg5: memref<1x128x128xbf16, #tpu.memory_space<vmem>>, %arg6: memref<1x1x128xf32, #tpu.memory_space<vmem>>, %arg7: memref<1x1x128xf32, #tpu.memory_space<vmem>>, %arg8: memref<1x1x128xf32, #tpu.memory_space<vmem>>, %arg9: memref<1x128x512xbf16, #tpu.memory_space<vmem>>, %arg10: memref<1x1x512xf32, #tpu.memory_space<vmem>>, %arg11: memref<1x512x128xbf16, #tpu.memory_space<vmem>>, %arg12: memref<1x1x128xf32, #tpu.memory_space<vmem>>, %arg13: memref<1x1x128xf32, #tpu.memory_space<vmem>>, %arg14: memref<1x1x128xf32, #tpu.memory_space<vmem>>, %arg15: memref<128x256xbf16, #tpu.memory_space<vmem>>, %arg16: memref<1x256xf32, #tpu.memory_space<vmem>>, %arg17: memref<256x512xbf16, #tpu.memory_space<vmem>>, %arg18: memref<1x512xf32, #tpu.memory_space<vmem>>, %arg19: memref<16x512xf32, #tpu.memory_space<vmem>>, %arg20: memref<16x128xf32, #tpu.memory_space<vmem>>, %arg21: memref<128x16xbf16, #tpu.memory_space<vmem>>, %arg22: memref<128x16xbf16, #tpu.memory_space<vmem>>, %arg23: memref<128x16xbf16, #tpu.memory_space<vmem>>, %arg24: memref<16x128xf32, #tpu.memory_space<vmem>>) attributes {dimension_semantics = [#tpu.dimension_semantics<arbitrary>], iteration_bounds = array<i64: 7>, scalar_prefetch = 0 : i64, scratch_operands = 5 : i64, tpu.core_type = #tpu.core_type<tc>, window_params = [{pipeline_mode = #tpu.pipeline_mode<synchronous>, transform_indices = @transform_0, window_bounds = array<i64: 16, 128>}, {pipeline_mode = #tpu.pipeline_mode<synchronous>, transform_indices = @transform_1, window_bounds = array<i64: 128, 128>}, {transform_indices = @transform_2, window_bounds = array<i64: 1, 128, 384>}, {transform_indices = @transform_3, window_bounds = array<i64: 1, 1, 384>}, {transform_indices = @transform_4, window_bounds = array<i64: 1, 128, 128>}, {transform_indices = @transform_5, window_bounds = array<i64: 1, 1, 128>}, {transform_indices = @transform_6, window_bounds = array<i64: 1, 1, 128>}, {transform_indices = @transform_7, window_bounds = array<i64: 1, 1, 128>}, {transform_indices = @transform_8, window_bounds = array<i64: 1, 128, 512>}, {transform_indices = @transform_9, window_bounds = array<i64: 1, 1, 512>}, {transform_indices = @transform_10, window_bounds = array<i64: 1, 512, 128>}, {transform_indices = @transform_11, window_bounds = array<i64: 1, 1, 128>}, {transform_indices = @transform_12, window_bounds = array<i64: 1, 1, 128>}, {transform_indices = @transform_13, window_bounds = array<i64: 1, 1, 128>}, {pipeline_mode = #tpu.pipeline_mode<synchronous>, transform_indices = @transform_14, window_bounds = array<i64: 128, 256>}, {pipeline_mode = #tpu.pipeline_mode<synchronous>, transform_indices = @transform_15, window_bounds = array<i64: 1, 256>}, {pipeline_mode = #tpu.pipeline_mode<synchronous>, transform_indices = @transform_16, window_bounds = array<i64: 256, 512>}, {pipeline_mode = #tpu.pipeline_mode<synchronous>, transform_indices = @transform_17, window_bounds = array<i64: 1, 512>}, {pipeline_mode = #tpu.pipeline_mode<synchronous>, transform_indices = @transform_18, window_bounds = array<i64: 16, 512>}]} {
    %c0_i32 = arith.constant 0 : i32
    %0 = arith.cmpi eq, %arg0, %c0_i32 : i32
    %1 = arith.extui %0 : i1 to i32
    %c0_i32_0 = arith.constant 0 : i32
    %2 = arith.cmpi ne, %1, %c0_i32_0 : i32
    scf.if %2 {
      %c0 = arith.constant 0 : index
      %c0_4 = arith.constant 0 : index
      %9 = vector.load %arg1[%c0, %c0_4] : memref<16x128xf32, #tpu.memory_space<vmem>>, vector<16x128xf32>
      %c0_5 = arith.constant 0 : index
      %c0_6 = arith.constant 0 : index
      %10 = vector.load %arg20[%c0_5, %c0_6] : memref<16x128xf32, #tpu.memory_space<vmem>>, vector<16x128xf32>
      tpu.vector_store %arg20[%c0_5, %c0_6], %9 {strides = array<i32>} : memref<16x128xf32, #tpu.memory_space<vmem>>, vector<16x128xf32>,
    } else {
    }
    %c6_i32 = arith.constant 6 : i32
    %3 = arith.cmpi slt, %arg0, %c6_i32 : i32
    %4 = arith.extui %3 : i1 to i32
    %c0_i32_1 = arith.constant 0 : i32
    %5 = arith.cmpi ne, %4, %c0_i32_1 : i32
    scf.if %5 {
      %c0 = arith.constant 0 : index
      %c0_4 = arith.constant 0 : index
      %9 = vector.load %arg20[%c0, %c0_4] : memref<16x128xf32, #tpu.memory_space<vmem>>, vector<16x128xf32>
      %10 = arith.truncf %9 : vector<16x128xf32> to vector<16x128xbf16>
      %c0_5 = arith.constant 0 : index
      %c0_6 = arith.constant 0 : index
      %c0_7 = arith.constant 0 : index
      %11 = vector.load %arg3[%c0_5, %c0_6, %c0_7] : memref<1x128x384xbf16, #tpu.memory_space<vmem>>, vector<1x128x384xbf16>
      %12 = vector.shape_cast %11 : vector<1x128x384xbf16> to vector<128x384xbf16>
      %cst = arith.constant dense<0.000000e+00> : vector<16x384xf32>
      %13 = tpu.matmul %10, %12, %cst {dimension_numbers = #tpu.dot_dimension_numbers<[1], [0], [0], [1], [0, 0, 1, 1], [], []>} : vector<16x128xbf16>, vector<128x384xbf16>, vector<16x384xf32> -> vector<16x384xf32>
      %c0_8 = arith.constant 0 : index
      %c0_9 = arith.constant 0 : index
      %c0_10 = arith.constant 0 : index
      %14 = vector.load %arg4[%c0_8, %c0_9, %c0_10] : memref<1x1x384xf32, #tpu.memory_space<vmem>>, vector<1x1x384xf32>
      %15 = vector.shape_cast %14 : vector<1x1x384xf32> to vector<1x384xf32>
      %16 = vector.broadcast %15 : vector<1x384xf32> to vector<16x384xf32>
      %17 = arith.addf %13, %16 : vector<16x384xf32>
      %18 = vector.extract_strided_slice %17 {offsets = [0, 0], sizes = [16, 16], strides = [1, 1]} : vector<16x384xf32> to vector<16x16xf32>
      %19 = arith.truncf %18 : vector<16x16xf32> to vector<16x16xbf16>
      %c0_11 = arith.constant 0 : index
      %c0_12 = arith.constant 0 : index
      %20 = vector.load %arg21[%c0_11, %c0_12] : memref<128x16xbf16, #tpu.memory_space<vmem>>, vector<16x16xbf16>
      tpu.vector_store %arg21[%c0_11, %c0_12], %19 {strides = array<i32>} : memref<128x16xbf16, #tpu.memory_space<vmem>>, vector<16x16xbf16>,
      %21 = vector.extract_strided_slice %17 {offsets = [0, 128], sizes = [16, 16], strides = [1, 1]} : vector<16x384xf32> to vector<16x16xf32>
      %22 = arith.truncf %21 : vector<16x16xf32> to vector<16x16xbf16>
      %c0_13 = arith.constant 0 : index
      %c0_14 = arith.constant 0 : index
      %23 = vector.load %arg22[%c0_13, %c0_14] : memref<128x16xbf16, #tpu.memory_space<vmem>>, vector<16x16xbf16>
      tpu.vector_store %arg22[%c0_13, %c0_14], %22 {strides = array<i32>} : memref<128x16xbf16, #tpu.memory_space<vmem>>, vector<16x16xbf16>,
      %24 = vector.extract_strided_slice %17 {offsets = [0, 256], sizes = [16, 16], strides = [1, 1]} : vector<16x384xf32> to vector<16x16xf32>
      %25 = arith.truncf %24 : vector<16x16xf32> to vector<16x16xbf16>
      %c0_15 = arith.constant 0 : index
      %c0_16 = arith.constant 0 : index
      %26 = vector.load %arg23[%c0_15, %c0_16] : memref<128x16xbf16, #tpu.memory_space<vmem>>, vector<16x16xbf16>
      tpu.vector_store %arg23[%c0_15, %c0_16], %25 {strides = array<i32>} : memref<128x16xbf16, #tpu.memory_space<vmem>>, vector<16x16xbf16>,
      %27 = vector.extract_strided_slice %17 {offsets = [0, 16], sizes = [16, 16], strides = [1, 1]} : vector<16x384xf32> to vector<16x16xf32>
      %28 = arith.truncf %27 : vector<16x16xf32> to vector<16x16xbf16>
      %c16 = arith.constant 16 : index
      %c0_17 = arith.constant 0 : index
      %29 = vector.load %arg21[%c16, %c0_17] : memref<128x16xbf16, #tpu.memory_space<vmem>>, vector<16x16xbf16>
      tpu.vector_store %arg21[%c16, %c0_17], %28 {strides = array<i32>} : memref<128x16xbf16, #tpu.memory_space<vmem>>, vector<16x16xbf16>,
      %30 = vector.extract_strided_slice %17 {offsets = [0, 144], sizes = [16, 16], strides = [1, 1]} : vector<16x384xf32> to vector<16x16xf32>
      %31 = arith.truncf %30 : vector<16x16xf32> to vector<16x16xbf16>
      %c16_18 = arith.constant 16 : index
      %c0_19 = arith.constant 0 : index
      %32 = vector.load %arg22[%c16_18, %c0_19] : memref<128x16xbf16, #tpu.memory_space<vmem>>, vector<16x16xbf16>
      tpu.vector_store %arg22[%c16_18, %c0_19], %31 {strides = array<i32>} : memref<128x16xbf16, #tpu.memory_space<vmem>>, vector<16x16xbf16>,
      %33 = vector.extract_strided_slice %17 {offsets = [0, 272], sizes = [16, 16], strides = [1, 1]} : vector<16x384xf32> to vector<16x16xf32>
      %34 = arith.truncf %33 : vector<16x16xf32> to vector<16x16xbf16>
      %c16_20 = arith.constant 16 : index
      %c0_21 = arith.constant 0 : index
      %35 = vector.load %arg23[%c16_20, %c0_21] : memref<128x16xbf16, #tpu.memory_space<vmem>>, vector<16x16xbf16>
      tpu.vector_store %arg23[%c16_20, %c0_21], %34 {strides = array<i32>} : memref<128x16xbf16, #tpu.memory_space<vmem>>, vector<16x16xbf16>,
      %36 = vector.extract_strided_slice %17 {offsets = [0, 32], sizes = [16, 16], strides = [1, 1]} : vector<16x384xf32> to vector<16x16xf32>
      %37 = arith.truncf %36 : vector<16x16xf32> to vector<16x16xbf16>
      %c32 = arith.constant 32 : index
      %c0_22 = arith.constant 0 : index
      %38 = vector.load %arg21[%c32, %c0_22] : memref<128x16xbf16, #tpu.memory_space<vmem>>, vector<16x16xbf16>
      tpu.vector_store %arg21[%c32, %c0_22], %37 {strides = array<i32>} : memref<128x16xbf16, #tpu.memory_space<vmem>>, vector<16x16xbf16>,
      %39 = vector.extract_strided_slice %17 {offsets = [0, 160], sizes = [16, 16], strides = [1, 1]} : vector<16x384xf32> to vector<16x16xf32>
      %40 = arith.truncf %39 : vector<16x16xf32> to vector<16x16xbf16>
      %c32_23 = arith.constant 32 : index
      %c0_24 = arith.constant 0 : index
      %41 = vector.load %arg22[%c32_23, %c0_24] : memref<128x16xbf16, #tpu.memory_space<vmem>>, vector<16x16xbf16>
      tpu.vector_store %arg22[%c32_23, %c0_24], %40 {strides = array<i32>} : memref<128x16xbf16, #tpu.memory_space<vmem>>, vector<16x16xbf16>,
      %42 = vector.extract_strided_slice %17 {offsets = [0, 288], sizes = [16, 16], strides = [1, 1]} : vector<16x384xf32> to vector<16x16xf32>
      %43 = arith.truncf %42 : vector<16x16xf32> to vector<16x16xbf16>
      %c32_25 = arith.constant 32 : index
      %c0_26 = arith.constant 0 : index
      %44 = vector.load %arg23[%c32_25, %c0_26] : memref<128x16xbf16, #tpu.memory_space<vmem>>, vector<16x16xbf16>
      tpu.vector_store %arg23[%c32_25, %c0_26], %43 {strides = array<i32>} : memref<128x16xbf16, #tpu.memory_space<vmem>>, vector<16x16xbf16>,
      %45 = vector.extract_strided_slice %17 {offsets = [0, 48], sizes = [16, 16], strides = [1, 1]} : vector<16x384xf32> to vector<16x16xf32>
      %46 = arith.truncf %45 : vector<16x16xf32> to vector<16x16xbf16>
      %c48 = arith.constant 48 : index
      %c0_27 = arith.constant 0 : index
      %47 = vector.load %arg21[%c48, %c0_27] : memref<128x16xbf16, #tpu.memory_space<vmem>>, vector<16x16xbf16>
      tpu.vector_store %arg21[%c48, %c0_27], %46 {strides = array<i32>} : memref<128x16xbf16, #tpu.memory_space<vmem>>, vector<16x16xbf16>,
      %48 = vector.extract_strided_slice %17 {offsets = [0, 176], sizes = [16, 16], strides = [1, 1]} : vector<16x384xf32> to vector<16x16xf32>
      %49 = arith.truncf %48 : vector<16x16xf32> to vector<16x16xbf16>
      %c48_28 = arith.constant 48 : index
      %c0_29 = arith.constant 0 : index
      %50 = vector.load %arg22[%c48_28, %c0_29] : memref<128x16xbf16, #tpu.memory_space<vmem>>, vector<16x16xbf16>
      tpu.vector_store %arg22[%c48_28, %c0_29], %49 {strides = array<i32>} : memref<128x16xbf16, #tpu.memory_space<vmem>>, vector<16x16xbf16>,
      %51 = vector.extract_strided_slice %17 {offsets = [0, 304], sizes = [16, 16], strides = [1, 1]} : vector<16x384xf32> to vector<16x16xf32>
      %52 = arith.truncf %51 : vector<16x16xf32> to vector<16x16xbf16>
      %c48_30 = arith.constant 48 : index
      %c0_31 = arith.constant 0 : index
      %53 = vector.load %arg23[%c48_30, %c0_31] : memref<128x16xbf16, #tpu.memory_space<vmem>>, vector<16x16xbf16>
      tpu.vector_store %arg23[%c48_30, %c0_31], %52 {strides = array<i32>} : memref<128x16xbf16, #tpu.memory_space<vmem>>, vector<16x16xbf16>,
      %54 = vector.extract_strided_slice %17 {offsets = [0, 64], sizes = [16, 16], strides = [1, 1]} : vector<16x384xf32> to vector<16x16xf32>
      %55 = arith.truncf %54 : vector<16x16xf32> to vector<16x16xbf16>
      %c64 = arith.constant 64 : index
      %c0_32 = arith.constant 0 : index
      %56 = vector.load %arg21[%c64, %c0_32] : memref<128x16xbf16, #tpu.memory_space<vmem>>, vector<16x16xbf16>
      tpu.vector_store %arg21[%c64, %c0_32], %55 {strides = array<i32>} : memref<128x16xbf16, #tpu.memory_space<vmem>>, vector<16x16xbf16>,
      %57 = vector.extract_strided_slice %17 {offsets = [0, 192], sizes = [16, 16], strides = [1, 1]} : vector<16x384xf32> to vector<16x16xf32>
      %58 = arith.truncf %57 : vector<16x16xf32> to vector<16x16xbf16>
      %c64_33 = arith.constant 64 : index
      %c0_34 = arith.constant 0 : index
      %59 = vector.load %arg22[%c64_33, %c0_34] : memref<128x16xbf16, #tpu.memory_space<vmem>>, vector<16x16xbf16>
      tpu.vector_store %arg22[%c64_33, %c0_34], %58 {strides = array<i32>} : memref<128x16xbf16, #tpu.memory_space<vmem>>, vector<16x16xbf16>,
      %60 = vector.extract_strided_slice %17 {offsets = [0, 320], sizes = [16, 16], strides = [1, 1]} : vector<16x384xf32> to vector<16x16xf32>
      %61 = arith.truncf %60 : vector<16x16xf32> to vector<16x16xbf16>
      %c64_35 = arith.constant 64 : index
      %c0_36 = arith.constant 0 : index
      %62 = vector.load %arg23[%c64_35, %c0_36] : memref<128x16xbf16, #tpu.memory_space<vmem>>, vector<16x16xbf16>
      tpu.vector_store %arg23[%c64_35, %c0_36], %61 {strides = array<i32>} : memref<128x16xbf16, #tpu.memory_space<vmem>>, vector<16x16xbf16>,
      %63 = vector.extract_strided_slice %17 {offsets = [0, 80], sizes = [16, 16], strides = [1, 1]} : vector<16x384xf32> to vector<16x16xf32>
      %64 = arith.truncf %63 : vector<16x16xf32> to vector<16x16xbf16>
      %c80 = arith.constant 80 : index
      %c0_37 = arith.constant 0 : index
      %65 = vector.load %arg21[%c80, %c0_37] : memref<128x16xbf16, #tpu.memory_space<vmem>>, vector<16x16xbf16>
      tpu.vector_store %arg21[%c80, %c0_37], %64 {strides = array<i32>} : memref<128x16xbf16, #tpu.memory_space<vmem>>, vector<16x16xbf16>,
      %66 = vector.extract_strided_slice %17 {offsets = [0, 208], sizes = [16, 16], strides = [1, 1]} : vector<16x384xf32> to vector<16x16xf32>
      %67 = arith.truncf %66 : vector<16x16xf32> to vector<16x16xbf16>
      %c80_38 = arith.constant 80 : index
      %c0_39 = arith.constant 0 : index
      %68 = vector.load %arg22[%c80_38, %c0_39] : memref<128x16xbf16, #tpu.memory_space<vmem>>, vector<16x16xbf16>
      tpu.vector_store %arg22[%c80_38, %c0_39], %67 {strides = array<i32>} : memref<128x16xbf16, #tpu.memory_space<vmem>>, vector<16x16xbf16>,
      %69 = vector.extract_strided_slice %17 {offsets = [0, 336], sizes = [16, 16], strides = [1, 1]} : vector<16x384xf32> to vector<16x16xf32>
      %70 = arith.truncf %69 : vector<16x16xf32> to vector<16x16xbf16>
      %c80_40 = arith.constant 80 : index
      %c0_41 = arith.constant 0 : index
      %71 = vector.load %arg23[%c80_40, %c0_41] : memref<128x16xbf16, #tpu.memory_space<vmem>>, vector<16x16xbf16>
      tpu.vector_store %arg23[%c80_40, %c0_41], %70 {strides = array<i32>} : memref<128x16xbf16, #tpu.memory_space<vmem>>, vector<16x16xbf16>,
      %72 = vector.extract_strided_slice %17 {offsets = [0, 96], sizes = [16, 16], strides = [1, 1]} : vector<16x384xf32> to vector<16x16xf32>
      %73 = arith.truncf %72 : vector<16x16xf32> to vector<16x16xbf16>
      %c96 = arith.constant 96 : index
      %c0_42 = arith.constant 0 : index
      %74 = vector.load %arg21[%c96, %c0_42] : memref<128x16xbf16, #tpu.memory_space<vmem>>, vector<16x16xbf16>
      tpu.vector_store %arg21[%c96, %c0_42], %73 {strides = array<i32>} : memref<128x16xbf16, #tpu.memory_space<vmem>>, vector<16x16xbf16>,
      %75 = vector.extract_strided_slice %17 {offsets = [0, 224], sizes = [16, 16], strides = [1, 1]} : vector<16x384xf32> to vector<16x16xf32>
      %76 = arith.truncf %75 : vector<16x16xf32> to vector<16x16xbf16>
      %c96_43 = arith.constant 96 : index
      %c0_44 = arith.constant 0 : index
      %77 = vector.load %arg22[%c96_43, %c0_44] : memref<128x16xbf16, #tpu.memory_space<vmem>>, vector<16x16xbf16>
      tpu.vector_store %arg22[%c96_43, %c0_44], %76 {strides = array<i32>} : memref<128x16xbf16, #tpu.memory_space<vmem>>, vector<16x16xbf16>,
      %78 = vector.extract_strided_slice %17 {offsets = [0, 352], sizes = [16, 16], strides = [1, 1]} : vector<16x384xf32> to vector<16x16xf32>
      %79 = arith.truncf %78 : vector<16x16xf32> to vector<16x16xbf16>
      %c96_45 = arith.constant 96 : index
      %c0_46 = arith.constant 0 : index
      %80 = vector.load %arg23[%c96_45, %c0_46] : memref<128x16xbf16, #tpu.memory_space<vmem>>, vector<16x16xbf16>
      tpu.vector_store %arg23[%c96_45, %c0_46], %79 {strides = array<i32>} : memref<128x16xbf16, #tpu.memory_space<vmem>>, vector<16x16xbf16>,
      %81 = vector.extract_strided_slice %17 {offsets = [0, 112], sizes = [16, 16], strides = [1, 1]} : vector<16x384xf32> to vector<16x16xf32>
      %82 = arith.truncf %81 : vector<16x16xf32> to vector<16x16xbf16>
      %c112 = arith.constant 112 : index
      %c0_47 = arith.constant 0 : index
      %83 = vector.load %arg21[%c112, %c0_47] : memref<128x16xbf16, #tpu.memory_space<vmem>>, vector<16x16xbf16>
      tpu.vector_store %arg21[%c112, %c0_47], %82 {strides = array<i32>} : memref<128x16xbf16, #tpu.memory_space<vmem>>, vector<16x16xbf16>,
      %84 = vector.extract_strided_slice %17 {offsets = [0, 240], sizes = [16, 16], strides = [1, 1]} : vector<16x384xf32> to vector<16x16xf32>
      %85 = arith.truncf %84 : vector<16x16xf32> to vector<16x16xbf16>
      %c112_48 = arith.constant 112 : index
      %c0_49 = arith.constant 0 : index
      %86 = vector.load %arg22[%c112_48, %c0_49] : memref<128x16xbf16, #tpu.memory_space<vmem>>, vector<16x16xbf16>
      tpu.vector_store %arg22[%c112_48, %c0_49], %85 {strides = array<i32>} : memref<128x16xbf16, #tpu.memory_space<vmem>>, vector<16x16xbf16>,
      %87 = vector.extract_strided_slice %17 {offsets = [0, 368], sizes = [16, 16], strides = [1, 1]} : vector<16x384xf32> to vector<16x16xf32>
      %88 = arith.truncf %87 : vector<16x16xf32> to vector<16x16xbf16>
      %c112_50 = arith.constant 112 : index
      %c0_51 = arith.constant 0 : index
      %89 = vector.load %arg23[%c112_50, %c0_51] : memref<128x16xbf16, #tpu.memory_space<vmem>>, vector<16x16xbf16>
      tpu.vector_store %arg23[%c112_50, %c0_51], %88 {strides = array<i32>} : memref<128x16xbf16, #tpu.memory_space<vmem>>, vector<16x16xbf16>,
      %c0_52 = arith.constant 0 : index
      %c0_53 = arith.constant 0 : index
      %90 = vector.load %arg21[%c0_52, %c0_53] : memref<128x16xbf16, #tpu.memory_space<vmem>>, vector<128x16xbf16>
      %c0_54 = arith.constant 0 : index
      %c0_55 = arith.constant 0 : index
      %91 = vector.load %arg22[%c0_54, %c0_55] : memref<128x16xbf16, #tpu.memory_space<vmem>>, vector<128x16xbf16>
      %cst_56 = arith.constant dense<0.000000e+00> : vector<128x128xf32>
      %92 = tpu.matmul %90, %91, %cst_56 {dimension_numbers = #tpu.dot_dimension_numbers<[1], [1], [0], [0], [0, 0, 1, 0], [], []>} : vector<128x16xbf16>, vector<128x16xbf16>, vector<128x128xf32> -> vector<128x128xf32>
      %c0_57 = arith.constant 0 : index
      %c0_58 = arith.constant 0 : index
      %93 = vector.load %arg2[%c0_57, %c0_58] : memref<128x128xf32, #tpu.memory_space<vmem>>, vector<128x128xf32>
      %94 = arith.addf %92, %93 : vector<128x128xf32>
      %cst_59 = arith.constant dense<0xFF800000> : vector<128xf32>
      %95 = vector.multi_reduction <maximumf>, %94, %cst_59 [1] : vector<128x128xf32> to vector<128xf32>
      %96 = vector.shape_cast %95 : vector<128xf32> to vector<128x1xf32>
      %97 = vector.broadcast %96 : vector<128x1xf32> to vector<128x128xf32>
      %98 = arith.subf %94, %97 : vector<128x128xf32>
      %99 = math.exp %98 : vector<128x128xf32>
      %cst_60 = arith.constant dense<0.000000e+00> : vector<128xf32>
      %100 = vector.multi_reduction <add>, %99, %cst_60 [1] : vector<128x128xf32> to vector<128xf32>
      %101 = vector.shape_cast %100 : vector<128xf32> to vector<128x1xf32>
      %102 = tpu.reciprocal %101 {approx = true} : vector<128x1xf32> -> vector<128x1xf32>
      %103 = vector.broadcast %102 : vector<128x1xf32> to vector<128x128xf32>
      %104 = arith.mulf %99, %103 : vector<128x128xf32>
      %105 = arith.truncf %104 : vector<128x128xf32> to vector<128x128xbf16>
      %c0_61 = arith.constant 0 : index
      %c0_62 = arith.constant 0 : index
      %106 = vector.load %arg23[%c0_61, %c0_62] : memref<128x16xbf16, #tpu.memory_space<vmem>>, vector<128x16xbf16>
      %cst_63 = arith.constant dense<0.000000e+00> : vector<128x16xf32>
      %107 = tpu.matmul %105, %106, %cst_63 {dimension_numbers = #tpu.dot_dimension_numbers<[1], [0], [0], [1], [0, 0, 1, 1], [], []>} : vector<128x128xbf16>, vector<128x16xbf16>, vector<128x16xf32> -> vector<128x16xf32>
      %108 = vector.extract_strided_slice %107 {offsets = [0, 0], sizes = [16, 16], strides = [1, 1]} : vector<128x16xf32> to vector<16x16xf32>
      %c0_64 = arith.constant 0 : index
      %c0_65 = arith.constant 0 : index
      %109 = vector.load %arg24[%c0_64, %c0_65] : memref<16x128xf32, #tpu.memory_space<vmem>>, vector<16x16xf32>
      tpu.vector_store %arg24[%c0_64, %c0_65], %108 {strides = array<i32>} : memref<16x128xf32, #tpu.memory_space<vmem>>, vector<16x16xf32>,
      %110 = vector.extract_strided_slice %107 {offsets = [16, 0], sizes = [16, 16], strides = [1, 1]} : vector<128x16xf32> to vector<16x16xf32>
      %c0_66 = arith.constant 0 : index
      %c16_67 = arith.constant 16 : index
      %111 = vector.load %arg24[%c0_66, %c16_67] : memref<16x128xf32, #tpu.memory_space<vmem>>, vector<16x16xf32>
      tpu.vector_store %arg24[%c0_66, %c16_67], %110 {strides = array<i32>} : memref<16x128xf32, #tpu.memory_space<vmem>>, vector<16x16xf32>,
      %112 = vector.extract_strided_slice %107 {offsets = [32, 0], sizes = [16, 16], strides = [1, 1]} : vector<128x16xf32> to vector<16x16xf32>
      %c0_68 = arith.constant 0 : index
      %c32_69 = arith.constant 32 : index
      %113 = vector.load %arg24[%c0_68, %c32_69] : memref<16x128xf32, #tpu.memory_space<vmem>>, vector<16x16xf32>
      tpu.vector_store %arg24[%c0_68, %c32_69], %112 {strides = array<i32>} : memref<16x128xf32, #tpu.memory_space<vmem>>, vector<16x16xf32>,
      %114 = vector.extract_strided_slice %107 {offsets = [48, 0], sizes = [16, 16], strides = [1, 1]} : vector<128x16xf32> to vector<16x16xf32>
      %c0_70 = arith.constant 0 : index
      %c48_71 = arith.constant 48 : index
      %115 = vector.load %arg24[%c0_70, %c48_71] : memref<16x128xf32, #tpu.memory_space<vmem>>, vector<16x16xf32>
      tpu.vector_store %arg24[%c0_70, %c48_71], %114 {strides = array<i32>} : memref<16x128xf32, #tpu.memory_space<vmem>>, vector<16x16xf32>,
      %116 = vector.extract_strided_slice %107 {offsets = [64, 0], sizes = [16, 16], strides = [1, 1]} : vector<128x16xf32> to vector<16x16xf32>
      %c0_72 = arith.constant 0 : index
      %c64_73 = arith.constant 64 : index
      %117 = vector.load %arg24[%c0_72, %c64_73] : memref<16x128xf32, #tpu.memory_space<vmem>>, vector<16x16xf32>
      tpu.vector_store %arg24[%c0_72, %c64_73], %116 {strides = array<i32>} : memref<16x128xf32, #tpu.memory_space<vmem>>, vector<16x16xf32>,
      %118 = vector.extract_strided_slice %107 {offsets = [80, 0], sizes = [16, 16], strides = [1, 1]} : vector<128x16xf32> to vector<16x16xf32>
      %c0_74 = arith.constant 0 : index
      %c80_75 = arith.constant 80 : index
      %119 = vector.load %arg24[%c0_74, %c80_75] : memref<16x128xf32, #tpu.memory_space<vmem>>, vector<16x16xf32>
      tpu.vector_store %arg24[%c0_74, %c80_75], %118 {strides = array<i32>} : memref<16x128xf32, #tpu.memory_space<vmem>>, vector<16x16xf32>,
      %120 = vector.extract_strided_slice %107 {offsets = [96, 0], sizes = [16, 16], strides = [1, 1]} : vector<128x16xf32> to vector<16x16xf32>
      %c0_76 = arith.constant 0 : index
      %c96_77 = arith.constant 96 : index
      %121 = vector.load %arg24[%c0_76, %c96_77] : memref<16x128xf32, #tpu.memory_space<vmem>>, vector<16x16xf32>
      tpu.vector_store %arg24[%c0_76, %c96_77], %120 {strides = array<i32>} : memref<16x128xf32, #tpu.memory_space<vmem>>, vector<16x16xf32>,
      %122 = vector.extract_strided_slice %107 {offsets = [112, 0], sizes = [16, 16], strides = [1, 1]} : vector<128x16xf32> to vector<16x16xf32>
      %c0_78 = arith.constant 0 : index
      %c112_79 = arith.constant 112 : index
      %123 = vector.load %arg24[%c0_78, %c112_79] : memref<16x128xf32, #tpu.memory_space<vmem>>, vector<16x16xf32>
      tpu.vector_store %arg24[%c0_78, %c112_79], %122 {strides = array<i32>} : memref<16x128xf32, #tpu.memory_space<vmem>>, vector<16x16xf32>,
      %c0_80 = arith.constant 0 : index
      %c0_81 = arith.constant 0 : index
      %124 = vector.load %arg24[%c0_80, %c0_81] : memref<16x128xf32, #tpu.memory_space<vmem>>, vector<16x128xf32>
      %125 = arith.truncf %124 : vector<16x128xf32> to vector<16x128xbf16>
      %c0_82 = arith.constant 0 : index
      %c0_83 = arith.constant 0 : index
      %c0_84 = arith.constant 0 : index
      %126 = vector.load %arg5[%c0_82, %c0_83, %c0_84] : memref<1x128x128xbf16, #tpu.memory_space<vmem>>, vector<1x128x128xbf16>
      %127 = vector.shape_cast %126 : vector<1x128x128xbf16> to vector<128x128xbf16>
      %cst_85 = arith.constant dense<0.000000e+00> : vector<16x128xf32>
      %128 = tpu.matmul %125, %127, %cst_85 {dimension_numbers = #tpu.dot_dimension_numbers<[1], [0], [0], [1], [0, 0, 1, 1], [], []>} : vector<16x128xbf16>, vector<128x128xbf16>, vector<16x128xf32> -> vector<16x128xf32>
      %c0_86 = arith.constant 0 : index
      %c0_87 = arith.constant 0 : index
      %c0_88 = arith.constant 0 : index
      %129 = vector.load %arg6[%c0_86, %c0_87, %c0_88] : memref<1x1x128xf32, #tpu.memory_space<vmem>>, vector<1x1x128xf32>
      %130 = vector.shape_cast %129 : vector<1x1x128xf32> to vector<1x128xf32>
      %131 = vector.broadcast %130 : vector<1x128xf32> to vector<16x128xf32>
      %132 = arith.addf %128, %131 : vector<16x128xf32>
      %133 = arith.addf %9, %132 : vector<16x128xf32>
      %c0_89 = arith.constant 0 : index
      %c0_90 = arith.constant 0 : index
      %c0_91 = arith.constant 0 : index
      %134 = vector.load %arg7[%c0_89, %c0_90, %c0_91] : memref<1x1x128xf32, #tpu.memory_space<vmem>>, vector<1x1x128xf32>
      %135 = vector.shape_cast %134 : vector<1x1x128xf32> to vector<1x128xf32>
      %c0_92 = arith.constant 0 : index
      %c0_93 = arith.constant 0 : index
      %c0_94 = arith.constant 0 : index
      %136 = vector.load %arg8[%c0_92, %c0_93, %c0_94] : memref<1x1x128xf32, #tpu.memory_space<vmem>>, vector<1x1x128xf32>
      %137 = vector.shape_cast %136 : vector<1x1x128xf32> to vector<1x128xf32>
      %cst_95 = arith.constant dense<0.000000e+00> : vector<16xf32>
      %138 = vector.multi_reduction <add>, %133, %cst_95 [1] : vector<16x128xf32> to vector<16xf32>
      %139 = vector.shape_cast %138 : vector<16xf32> to vector<16x1xf32>
      %cst_96 = arith.constant 1.280000e+02 : f32
      %140 = vector.broadcast %cst_96 : f32 to vector<16x1xf32>
      %141 = arith.divf %139, %140 : vector<16x1xf32>
      %142 = vector.broadcast %141 : vector<16x1xf32> to vector<16x128xf32>
      %143 = arith.subf %133, %142 : vector<16x128xf32>
      %144 = arith.mulf %143, %143 : vector<16x128xf32>
      %cst_97 = arith.constant dense<0.000000e+00> : vector<16xf32>
      %145 = vector.multi_reduction <add>, %144, %cst_97 [1] : vector<16x128xf32> to vector<16xf32>
      %146 = vector.shape_cast %145 : vector<16xf32> to vector<16x1xf32>
      %cst_98 = arith.constant 1.280000e+02 : f32
      %147 = vector.broadcast %cst_98 : f32 to vector<16x1xf32>
      %148 = arith.divf %146, %147 : vector<16x1xf32>
      %cst_99 = arith.constant 9.99999974E-6 : f32
      %149 = vector.broadcast %cst_99 : f32 to vector<16x1xf32>
      %150 = arith.addf %148, %149 : vector<16x1xf32>
      %151 = math.rsqrt %150 : vector<16x1xf32>
      %152 = vector.broadcast %151 : vector<16x1xf32> to vector<16x128xf32>
      %153 = arith.mulf %143, %152 : vector<16x128xf32>
      %154 = vector.broadcast %135 : vector<1x128xf32> to vector<16x128xf32>
      %155 = arith.mulf %153, %154 : vector<16x128xf32>
      %156 = vector.broadcast %137 : vector<1x128xf32> to vector<16x128xf32>
      %157 = arith.addf %155, %156 : vector<16x128xf32>
      %158 = arith.truncf %157 : vector<16x128xf32> to vector<16x128xbf16>
      %c0_100 = arith.constant 0 : index
      %c0_101 = arith.constant 0 : index
      %c0_102 = arith.constant 0 : index
      %159 = vector.load %arg9[%c0_100, %c0_101, %c0_102] : memref<1x128x512xbf16, #tpu.memory_space<vmem>>, vector<1x128x512xbf16>
      %160 = vector.shape_cast %159 : vector<1x128x512xbf16> to vector<128x512xbf16>
      %cst_103 = arith.constant dense<0.000000e+00> : vector<16x512xf32>
      %161 = tpu.matmul %158, %160, %cst_103 {dimension_numbers = #tpu.dot_dimension_numbers<[1], [0], [0], [1], [0, 0, 1, 1], [], []>} : vector<16x128xbf16>, vector<128x512xbf16>, vector<16x512xf32> -> vector<16x512xf32>
      %c0_104 = arith.constant 0 : index
      %c0_105 = arith.constant 0 : index
      %c0_106 = arith.constant 0 : index
      %162 = vector.load %arg10[%c0_104, %c0_105, %c0_106] : memref<1x1x512xf32, #tpu.memory_space<vmem>>, vector<1x1x512xf32>
      %163 = vector.shape_cast %162 : vector<1x1x512xf32> to vector<1x512xf32>
      %164 = vector.broadcast %163 : vector<1x512xf32> to vector<16x512xf32>
      %165 = arith.addf %161, %164 : vector<16x512xf32>
      %cst_107 = arith.constant 0.000000e+00 : f32
      %166 = vector.broadcast %cst_107 : f32 to vector<16x512xf32>
      %167 = arith.maximumf %165, %166 : vector<16x512xf32>
      %168 = arith.truncf %167 : vector<16x512xf32> to vector<16x512xbf16>
      %c0_108 = arith.constant 0 : index
      %c0_109 = arith.constant 0 : index
      %c0_110 = arith.constant 0 : index
      %169 = vector.load %arg11[%c0_108, %c0_109, %c0_110] : memref<1x512x128xbf16, #tpu.memory_space<vmem>>, vector<1x512x128xbf16>
      %170 = vector.shape_cast %169 : vector<1x512x128xbf16> to vector<512x128xbf16>
      %cst_111 = arith.constant dense<0.000000e+00> : vector<16x128xf32>
      %171 = tpu.matmul %168, %170, %cst_111 {dimension_numbers = #tpu.dot_dimension_numbers<[1], [0], [0], [1], [0, 0, 1, 1], [], []>} : vector<16x512xbf16>, vector<512x128xbf16>, vector<16x128xf32> -> vector<16x128xf32>
      %c0_112 = arith.constant 0 : index
      %c0_113 = arith.constant 0 : index
      %c0_114 = arith.constant 0 : index
      %172 = vector.load %arg12[%c0_112, %c0_113, %c0_114] : memref<1x1x128xf32, #tpu.memory_space<vmem>>, vector<1x1x128xf32>
      %173 = vector.shape_cast %172 : vector<1x1x128xf32> to vector<1x128xf32>
      %174 = vector.broadcast %173 : vector<1x128xf32> to vector<16x128xf32>
      %175 = arith.addf %171, %174 : vector<16x128xf32>
      %176 = arith.addf %157, %175 : vector<16x128xf32>
      %c0_115 = arith.constant 0 : index
      %c0_116 = arith.constant 0 : index
      %c0_117 = arith.constant 0 : index
      %177 = vector.load %arg13[%c0_115, %c0_116, %c0_117] : memref<1x1x128xf32, #tpu.memory_space<vmem>>, vector<1x1x128xf32>
      %178 = vector.shape_cast %177 : vector<1x1x128xf32> to vector<1x128xf32>
      %c0_118 = arith.constant 0 : index
      %c0_119 = arith.constant 0 : index
      %c0_120 = arith.constant 0 : index
      %179 = vector.load %arg14[%c0_118, %c0_119, %c0_120] : memref<1x1x128xf32, #tpu.memory_space<vmem>>, vector<1x1x128xf32>
      %180 = vector.shape_cast %179 : vector<1x1x128xf32> to vector<1x128xf32>
      %cst_121 = arith.constant dense<0.000000e+00> : vector<16xf32>
      %181 = vector.multi_reduction <add>, %176, %cst_121 [1] : vector<16x128xf32> to vector<16xf32>
      %182 = vector.shape_cast %181 : vector<16xf32> to vector<16x1xf32>
      %cst_122 = arith.constant 1.280000e+02 : f32
      %183 = vector.broadcast %cst_122 : f32 to vector<16x1xf32>
      %184 = arith.divf %182, %183 : vector<16x1xf32>
      %185 = vector.broadcast %184 : vector<16x1xf32> to vector<16x128xf32>
      %186 = arith.subf %176, %185 : vector<16x128xf32>
      %187 = arith.mulf %186, %186 : vector<16x128xf32>
      %cst_123 = arith.constant dense<0.000000e+00> : vector<16xf32>
      %188 = vector.multi_reduction <add>, %187, %cst_123 [1] : vector<16x128xf32> to vector<16xf32>
      %189 = vector.shape_cast %188 : vector<16xf32> to vector<16x1xf32>
      %cst_124 = arith.constant 1.280000e+02 : f32
      %190 = vector.broadcast %cst_124 : f32 to vector<16x1xf32>
      %191 = arith.divf %189, %190 : vector<16x1xf32>
      %cst_125 = arith.constant 9.99999974E-6 : f32
      %192 = vector.broadcast %cst_125 : f32 to vector<16x1xf32>
      %193 = arith.addf %191, %192 : vector<16x1xf32>
      %194 = math.rsqrt %193 : vector<16x1xf32>
      %195 = vector.broadcast %194 : vector<16x1xf32> to vector<16x128xf32>
      %196 = arith.mulf %186, %195 : vector<16x128xf32>
      %197 = vector.broadcast %178 : vector<1x128xf32> to vector<16x128xf32>
      %198 = arith.mulf %196, %197 : vector<16x128xf32>
      %199 = vector.broadcast %180 : vector<1x128xf32> to vector<16x128xf32>
      %200 = arith.addf %198, %199 : vector<16x128xf32>
      %c0_126 = arith.constant 0 : index
      %c0_127 = arith.constant 0 : index
      %201 = vector.load %arg20[%c0_126, %c0_127] : memref<16x128xf32, #tpu.memory_space<vmem>>, vector<16x128xf32>
      tpu.vector_store %arg20[%c0_126, %c0_127], %200 {strides = array<i32>} : memref<16x128xf32, #tpu.memory_space<vmem>>, vector<16x128xf32>,
    } else {
    }
    %c6_i32_2 = arith.constant 6 : i32
    %6 = arith.cmpi eq, %arg0, %c6_i32_2 : i32
    %7 = arith.extui %6 : i1 to i32
    %c0_i32_3 = arith.constant 0 : i32
    %8 = arith.cmpi ne, %7, %c0_i32_3 : i32
    scf.if %8 {
      %c0 = arith.constant 0 : index
      %c0_4 = arith.constant 0 : index
      %9 = vector.load %arg20[%c0, %c0_4] : memref<16x128xf32, #tpu.memory_space<vmem>>, vector<16x128xf32>
      %10 = arith.truncf %9 : vector<16x128xf32> to vector<16x128xbf16>
      %c0_5 = arith.constant 0 : index
      %c0_6 = arith.constant 0 : index
      %11 = vector.load %arg15[%c0_5, %c0_6] : memref<128x256xbf16, #tpu.memory_space<vmem>>, vector<128x256xbf16>
      %cst = arith.constant dense<0.000000e+00> : vector<16x256xf32>
      %12 = tpu.matmul %10, %11, %cst {dimension_numbers = #tpu.dot_dimension_numbers<[1], [0], [0], [1], [0, 0, 1, 1], [], []>} : vector<16x128xbf16>, vector<128x256xbf16>, vector<16x256xf32> -> vector<16x256xf32>
      %c0_7 = arith.constant 0 : index
      %c0_8 = arith.constant 0 : index
      %13 = vector.load %arg16[%c0_7, %c0_8] : memref<1x256xf32, #tpu.memory_space<vmem>>, vector<1x256xf32>
      %14 = vector.broadcast %13 : vector<1x256xf32> to vector<16x256xf32>
      %15 = arith.addf %12, %14 : vector<16x256xf32>
      %cst_9 = arith.constant 0.000000e+00 : f32
      %16 = vector.broadcast %cst_9 : f32 to vector<16x256xf32>
      %17 = arith.maximumf %15, %16 : vector<16x256xf32>
      %18 = arith.truncf %17 : vector<16x256xf32> to vector<16x256xbf16>
      %c0_10 = arith.constant 0 : index
      %c0_11 = arith.constant 0 : index
      %19 = vector.load %arg17[%c0_10, %c0_11] : memref<256x512xbf16, #tpu.memory_space<vmem>>, vector<256x512xbf16>
      %cst_12 = arith.constant dense<0.000000e+00> : vector<16x512xf32>
      %20 = tpu.matmul %18, %19, %cst_12 {dimension_numbers = #tpu.dot_dimension_numbers<[1], [0], [0], [1], [0, 0, 1, 1], [], []>} : vector<16x256xbf16>, vector<256x512xbf16>, vector<16x512xf32> -> vector<16x512xf32>
      %c0_13 = arith.constant 0 : index
      %c0_14 = arith.constant 0 : index
      %21 = vector.load %arg18[%c0_13, %c0_14] : memref<1x512xf32, #tpu.memory_space<vmem>>, vector<1x512xf32>
      %22 = vector.broadcast %21 : vector<1x512xf32> to vector<16x512xf32>
      %23 = arith.addf %20, %22 : vector<16x512xf32>
      %c0_15 = arith.constant 0 : index
      %c0_16 = arith.constant 0 : index
      %24 = vector.load %arg19[%c0_15, %c0_16] : memref<16x512xf32, #tpu.memory_space<vmem>>, vector<16x512xf32>
      tpu.vector_store %arg19[%c0_15, %c0_16], %23 {strides = array<i32>} : memref<16x512xf32, #tpu.memory_space<vmem>>, vector<16x512xf32>,
    } else {
    }
    return
  }
  func.func @transform_0(%arg0: i32) -> (i32, i32) {
    %c0_i32 = arith.constant 0 : i32
    %c0_i32_0 = arith.constant 0 : i32
    %c0_i32_1 = arith.constant 0 : i32
    return %c0_i32, %c0_i32_0 : i32, i32
  }
  func.func @transform_1(%arg0: i32) -> (i32, i32) {
    %c0_i32 = arith.constant 0 : i32
    %c0_i32_0 = arith.constant 0 : i32
    %c0_i32_1 = arith.constant 0 : i32
    return %c0_i32, %c0_i32_0 : i32, i32
  }
  func.func @transform_2(%arg0: i32) -> (i32, i32, i32) {
    %c5_i32 = arith.constant 5 : i32
    %0 = arith.minsi %arg0, %c5_i32 : i32
    %c0_i32 = arith.constant 0 : i32
    %c0_i32_0 = arith.constant 0 : i32
    %c0_i32_1 = arith.constant 0 : i32
    return %0, %c0_i32, %c0_i32_0 : i32, i32, i32
  }
  func.func @transform_3(%arg0: i32) -> (i32, i32, i32) {
    %c5_i32 = arith.constant 5 : i32
    %0 = arith.minsi %arg0, %c5_i32 : i32
    %c0_i32 = arith.constant 0 : i32
    %c0_i32_0 = arith.constant 0 : i32
    %c0_i32_1 = arith.constant 0 : i32
    return %0, %c0_i32, %c0_i32_0 : i32, i32, i32
  }
  func.func @transform_4(%arg0: i32) -> (i32, i32, i32) {
    %c5_i32 = arith.constant 5 : i32
    %0 = arith.minsi %arg0, %c5_i32 : i32
    %c0_i32 = arith.constant 0 : i32
    %c0_i32_0 = arith.constant 0 : i32
    %c0_i32_1 = arith.constant 0 : i32
    return %0, %c0_i32, %c0_i32_0 : i32, i32, i32
  }
  func.func @transform_5(%arg0: i32) -> (i32, i32, i32) {
    %c5_i32 = arith.constant 5 : i32
    %0 = arith.minsi %arg0, %c5_i32 : i32
    %c0_i32 = arith.constant 0 : i32
    %c0_i32_0 = arith.constant 0 : i32
    %c0_i32_1 = arith.constant 0 : i32
    return %0, %c0_i32, %c0_i32_0 : i32, i32, i32
  }
  func.func @transform_6(%arg0: i32) -> (i32, i32, i32) {
    %c5_i32 = arith.constant 5 : i32
    %0 = arith.minsi %arg0, %c5_i32 : i32
    %c0_i32 = arith.constant 0 : i32
    %c0_i32_0 = arith.constant 0 : i32
    %c0_i32_1 = arith.constant 0 : i32
    return %0, %c0_i32, %c0_i32_0 : i32, i32, i32
  }
  func.func @transform_7(%arg0: i32) -> (i32, i32, i32) {
    %c5_i32 = arith.constant 5 : i32
    %0 = arith.minsi %arg0, %c5_i32 : i32
    %c0_i32 = arith.constant 0 : i32
    %c0_i32_0 = arith.constant 0 : i32
    %c0_i32_1 = arith.constant 0 : i32
    return %0, %c0_i32, %c0_i32_0 : i32, i32, i32
  }
  func.func @transform_8(%arg0: i32) -> (i32, i32, i32) {
    %c5_i32 = arith.constant 5 : i32
    %0 = arith.minsi %arg0, %c5_i32 : i32
    %c0_i32 = arith.constant 0 : i32
    %c0_i32_0 = arith.constant 0 : i32
    %c0_i32_1 = arith.constant 0 : i32
    return %0, %c0_i32, %c0_i32_0 : i32, i32, i32
  }
  func.func @transform_9(%arg0: i32) -> (i32, i32, i32) {
    %c5_i32 = arith.constant 5 : i32
    %0 = arith.minsi %arg0, %c5_i32 : i32
    %c0_i32 = arith.constant 0 : i32
    %c0_i32_0 = arith.constant 0 : i32
    %c0_i32_1 = arith.constant 0 : i32
    return %0, %c0_i32, %c0_i32_0 : i32, i32, i32
  }
  func.func @transform_10(%arg0: i32) -> (i32, i32, i32) {
    %c5_i32 = arith.constant 5 : i32
    %0 = arith.minsi %arg0, %c5_i32 : i32
    %c0_i32 = arith.constant 0 : i32
    %c0_i32_0 = arith.constant 0 : i32
    %c0_i32_1 = arith.constant 0 : i32
    return %0, %c0_i32, %c0_i32_0 : i32, i32, i32
  }
  func.func @transform_11(%arg0: i32) -> (i32, i32, i32) {
    %c5_i32 = arith.constant 5 : i32
    %0 = arith.minsi %arg0, %c5_i32 : i32
    %c0_i32 = arith.constant 0 : i32
    %c0_i32_0 = arith.constant 0 : i32
    %c0_i32_1 = arith.constant 0 : i32
    return %0, %c0_i32, %c0_i32_0 : i32, i32, i32
  }
  func.func @transform_12(%arg0: i32) -> (i32, i32, i32) {
    %c5_i32 = arith.constant 5 : i32
    %0 = arith.minsi %arg0, %c5_i32 : i32
    %c0_i32 = arith.constant 0 : i32
    %c0_i32_0 = arith.constant 0 : i32
    %c0_i32_1 = arith.constant 0 : i32
    return %0, %c0_i32, %c0_i32_0 : i32, i32, i32
  }
  func.func @transform_13(%arg0: i32) -> (i32, i32, i32) {
    %c5_i32 = arith.constant 5 : i32
    %0 = arith.minsi %arg0, %c5_i32 : i32
    %c0_i32 = arith.constant 0 : i32
    %c0_i32_0 = arith.constant 0 : i32
    %c0_i32_1 = arith.constant 0 : i32
    return %0, %c0_i32, %c0_i32_0 : i32, i32, i32
  }
  func.func @transform_14(%arg0: i32) -> (i32, i32) {
    %c0_i32 = arith.constant 0 : i32
    %c0_i32_0 = arith.constant 0 : i32
    %c0_i32_1 = arith.constant 0 : i32
    return %c0_i32, %c0_i32_0 : i32, i32
  }
  func.func @transform_15(%arg0: i32) -> (i32, i32) {
    %c0_i32 = arith.constant 0 : i32
    %c0_i32_0 = arith.constant 0 : i32
    %c0_i32_1 = arith.constant 0 : i32
    return %c0_i32, %c0_i32_0 : i32, i32
  }
  func.func @transform_16(%arg0: i32) -> (i32, i32) {
    %c0_i32 = arith.constant 0 : i32
    %c0_i32_0 = arith.constant 0 : i32
    %c0_i32_1 = arith.constant 0 : i32
    return %c0_i32, %c0_i32_0 : i32, i32
  }
  func.func @transform_17(%arg0: i32) -> (i32, i32) {
    %c0_i32 = arith.constant 0 : i32
    %c0_i32_0 = arith.constant 0 : i32
    %c0_i32_1 = arith.constant 0 : i32
    return %c0_i32, %c0_i32_0 : i32, i32
  }
  func.func @transform_18(%arg0: i32) -> (i32, i32) {
    %c0_i32 = arith.constant 0 : i32
    %c0_i32_0 = arith.constant 0 : i32
    %c0_i32_1 = arith.constant 0 : i32
    return %c0_i32, %c0_i32_0 : i32, i32
  }
}

</mosaic_0001>

<bundles_post_ra>
// kernel: brain_tokenizer_forward.2
= control target key start
LH: loop header
LB: loop body
LE: loop exit
PB: predicated region body
PF: predicated region fallthrough
CT: control target
= control target key end

     0   :  { %13 = vsyncpa [#allocation9], 0  ;;  %s3365_s0 = inlined_call_operand.vmem [shape: f32[2,128,4], index: 0, kind: input, shape index: {}]   ;;  %s3366_s1 = inlined_call_operand.vmem [shape: bf16[7,4,128], index: 1, kind: input, shape index: {}]   ;;  %s3367_s2 = inlined_call_operand.vmem [shape: f32[1,128], index: 2, kind: input, shape index: {}]   ;;  %s3368_s3 = inlined_call_operand.hbm [shape: bf16[5,128,128], index: 3, kind: input, shape index: {}]   ;;  %s3369_s4 = inlined_call_operand.vmem [shape: f32[1,128], index: 4, kind: input, shape index: {}]   ;;  %s3370_s5 = inlined_call_operand.hbm [shape: bf16[3,128,128], index: 5, kind: input, shape index: {}]   ;;  %s3371_s6 = inlined_call_operand.vmem [shape: f32[1,128], index: 6, kind: input, shape index: {}]   ;;  %s3372_s7 = inlined_call_operand.vmem [shape: f32[8,128], index: 7, kind: input, shape index: {}]   ;;  %s3373_s8 = inlined_call_operand.vmem [shape: f32[2,8,128], index: 8, kind: output, shape index: {}]  }
   0x1   :  { %14 = vsyncpa [#allocation11], 0  ;;  %s3062_s27 = smov 0  }
   0x2 LB: > { %s3068_s28 = sadd.s32 4294967295, %s3009_s27   ;;  %p2314_p0 = scmp.ge.s32.totalorder %s3009_s27, 1  ;;  %s3009_s27 = sphi %s3062_s27, %s20_s27  }
   0x3   : > { %p224_p1 = scmp.lt.s32.totalorder %s3009_s27, 3  ;;  %s3011_s29 = smov [#allocation8]  }
   0x4   : > { %s242_s30 = sshll.u32 %s3011_s29, 4  ;;  %p3374_p3 = scmp.eq.s32.totalorder %s3068_s28, 0  ;;  %s243_s30 = int_to_ptr.vmem [resolvable:$true] %s242_s30 }
   0x5   : > { %p3072_p2 = pnand %p2314_p0, %p224_p1  ;;  %s3012_s10 = smov [#allocation10]  }
   0x6   : > { %s258_s11 = sshll.u32 %s3012_s10, 4  ;;  %s2939_s15 = scalar_lea.hbm %s3368_s3, 5120  ;;  %s3085_s11 = int_to_ptr.vmem [resolvable:$true] %s258_s11 }
   0x7   : > { %s3376_s9 = scalar_select %p3072_p2, 1, 0 }
   0x8   : > { %p2849_p4 = pneg %p3072_p2  ;;  %p2940_p6 = scmp.ne.s32.totalorder %s3368_s3, %s2939_s15 }
   0x9   : > { %p2946_p10 = scmp.lt.u32.totalorder %s2939_s15, %s3368_s3 }
   0xa   : > { %p3081_p5 = pnand %p3374_p3, %p2849_p4 }
   0xc   : > { %p2941_p7 = pneg %p3081_p5 }
   0xe   : > { %p2942_p8 = pnand %p2941_p7, %p2940_p6 }
  0x10   : > { %p2943_p9 = pneg %p2942_p8 }
  0x12   : > { %p2948_p11 = pnand %p2946_p10, %p2943_p9 }
  0x14   : > { %2951 = shalt.err (!%p2948_p11)
}
  0x15   : > { %s2952_s20 = scalar_lea.vmem %s243_s30, 5120  ;;  %p2960_p1 = scmp.lt.s32.totalorder %s243_s30, %s243_s30 }
  0x16   : > { %p2953_p12 = scmp.ne.s32.totalorder %s243_s30, %s2952_s20  ;;  %p2961_p4 = scmp.lt.s32.totalorder %s2952_s20, %s2952_s20 }
  0x18   : > { %p2955_p13 = pnand %p2953_p12, %p2941_p7  ;;  %p2962_p3 = por %p2961_p4, %p2960_p1 }
  0x1a   : > { %p2956_p0 = pneg %p2955_p13 }
  0x1c   : > { %p2963_p2 = pnand %p2962_p3, %p2956_p0 }
  0x1e   : > { %2966 = shalt.err (!%p2963_p2)
}
  0x1f   : > { %s3013_s21 = smov 64   ;;  %s3014_s22 = smov 4  }
  0x20   : > { %2852 = dma.hbm_to_vmem [thread:$0]  (!%p3081_p5), %s3368_s3, 5120, %s243_s30, [#allocation9], %s3013_s21, %s3013_s21, %s3014_s22  }
  0x21   : > { %s2967_s29 = scalar_lea.hbm %s3370_s5, 3072 }
  0x22   : > { %p2968_p6 = scmp.ne.s32.totalorder %s3370_s5, %s2967_s29  ;;  %p2974_p8 = scmp.lt.u32.totalorder %s2967_s29, %s3370_s5 }
  0x24   : > { %p2970_p2 = pnand %p2968_p6, %p2941_p7 }
  0x26   : > { %p2971_p3 = pneg %p2970_p2 }
  0x28   : > { %p2976_p9 = pnand %p2974_p8, %p2971_p3 }
  0x2a   : > { %2979 = shalt.err (!%p2976_p9)
}
  0x2b   : > { %s2980_s30 = scalar_lea.vmem %s3085_s11, 3072  ;;  %p2988_p13 = scmp.lt.s32.totalorder %s3085_s11, %s3085_s11 }
  0x2c   : > { %p2981_p10 = scmp.ne.s32.totalorder %s3085_s11, %s2980_s30  ;;  %p2989_p0 = scmp.lt.s32.totalorder %s2980_s30, %s2980_s30 }
  0x2e   : > { %p2983_p11 = pnand %p2981_p10, %p2941_p7  ;;  %p2990_p1 = por %p2989_p0, %p2988_p13 }
  0x30   : > { %p2984_p12 = pneg %p2983_p11 }
  0x32   : > { %p2991_p4 = pnand %p2990_p1, %p2984_p12 }
  0x34   : > { %2994 = shalt.err (!%p2991_p4)
}
  0x35   : > { %2855 = dma.hbm_to_vmem [thread:$0]  (!%p3081_p5), %s3370_s5, 3072, %s3085_s11, [#allocation11], %s3013_s21, %s3013_s21, %s3014_s22  }
  0x36   : > { %p3378_p6 = scmp.ne.s32.totalorder %s3376_s9, 0 }
  0x37   : > { %p3379_p2 = scmp.eq.s32.totalorder (!%p3378_p6), %s3068_s28, 0 }
  0x38   : > { %288 = sbr.rel (%p3378_p6) target bundleno = 1071 (0x42f), region = 52 }
  0x3f   : > { %3000 = dma.done.wait (%p3379_p2), [#allocation9], 5120   ;;  %p3380_p7 = pmov %p3379_p2 }
  0x40   : > { %p3381_p3 = pmov %p3379_p2 }
  0x41   : > { %3002 = vsyncadd (%p3380_p7), [#allocation9], 4294962176 }
  0x42   : > { %3004 = dma.done.wait (%p3381_p3), [#allocation11], 3072   ;;  %p3382_p8 = pmov %p3379_p2 }
  0x43   : > { %p325_p9 = scmp.lt.s32.totalorder %s3068_s28, 1  ;;  %vm335_vm0 = vcmask 31744   ;;  %v3015_v0 = vmov 0.0   ;;  %vm471_vm1 = vcmask 1041408   ;;  %v2324_v1 = vld [vmem:[%s3366_s1 + $0x2] sm:$0x3] }
  0x44   : > { %3006 = vsyncadd (%p3382_p8), [#allocation11], 4294964224  ;;  %363 = vst [vmem:[#allocation3 + $0x48] sm:$0xff] %v3015_v0  ;;  %2834 = vmatprep.subr.msk.bf16.mxu0 %vm471_vm1, %v2324_v1  ;;  %v473_v4 = vsel %vm471_vm1, %v2324_v1, 0  ;;  %v436_v7 = vld [vmem:[%s3366_s1] sm:$0x3] }
  0x45   : > { %354 = vst [vmem:[#allocation3] sm:$0xff] %v3015_v0  ;;  %364 = vst [vmem:[#allocation4] sm:$0xff] %v3015_v0  ;;  %s3384_s28 = smov (!%p325_p9, %s3068_s28), 1  ;;  %2541 = vmatpush3.bf16.msra.mxu0 %v473_v4  ;;  %v553_v27 = vsel %vm471_vm1, %v436_v7, 0  ;;  %v2333_v30 = vld [vmem:[%s3366_s1 + $0x4] sm:$0x3] }
  0x46   : > { %369 = vst [vmem:[#allocation4 + $0x28] sm:$0xff] %v3015_v0  ;;  %370 = vst [vmem:[#allocation5] sm:$0xff] %v3015_v0  ;;  %s2427_s9 = sshll.u32 %s3384_s28, 7  ;;  %2835 = vmatprep.subr.msk.bf16.mxu0 %vm471_vm1, %v436_v7  ;;  %v2338_v39 = vld [vmem:[%s3366_s1 + $0x6] sm:$0x3]  ;;  %v655_v44 = vsel %vm471_vm1, %v2333_v30, 0 }
  0x47   : > { %376 = vst [vmem:[#allocation6] sm:$0xff] %v3015_v0  ;;  %379 = vst [vmem:[#allocation6 + $0x18] sm:$0xff] %v3015_v0  ;;  %s3198_s18 = scalar_lea.vmem %s3365_s0, %s2427_s9  ;;  %v2343_v42 = vld [vmem:[%s3366_s1 + $0x8] sm:$0x3]  ;;  %v765_v46 = vsel %vm471_vm1, %v2338_v39, 0  ;;  %vm3016_vm2 = vmmov 0  }
  0x48   : > { %380 = vst [vmem:[#allocation7] sm:$0xff] %v3015_v0  ;;  %336 = vst.msk [vmem:[#allocation2] sm:$0xff] %vm335_vm0, %v3015_v0  ;;  %v384_v2 = vld [vmem:[%s3198_s18] sm:$0xff]  ;;  %v385_v3 = vld [vmem:[%s3198_s18 + $0x8] sm:$0xff]  ;;  %v875_v47 = vsel %vm471_vm1, %v2343_v42, 0  ;;  %s2323_s19 = sshll.u32 %s3384_s28, 3 }
  0x49   : > { %337 = vst.msk [vmem:[#allocation2 + $0x8] sm:$0xff] %vm335_vm0, %v3015_v0  ;;  %338 = vst.msk [vmem:[#allocation2 + $0x10] sm:$0xff] %vm335_vm0, %v3015_v0  ;;  %v386_v5 = vld [vmem:[%s3198_s18 + $0x10] sm:$0xff]  ;;  %v387_v6 = vld [vmem:[%s3198_s18 + $0x18] sm:$0xff]  ;;  %s333_s24 = scalar_lea.vmem %s3373_s8, %s2323_s19 }
  0x4a   : > { %339 = vst.msk [vmem:[#allocation2 + $0x18] sm:$0xff] %vm335_vm0, %v3015_v0  ;;  %340 = vst.msk [vmem:[#allocation2 + $0x20] sm:$0xff] %vm335_vm0, %v3015_v0  ;;  %v388_v8 = vld [vmem:[%s3198_s18 + $0x20] sm:$0xff]  ;;  %v389_v9 = vld [vmem:[%s3198_s18 + $0x28] sm:$0xff] }
  0x4b   : > { %341 = vst.msk [vmem:[#allocation2 + $0x28] sm:$0xff] %vm335_vm0, %v3015_v0  ;;  %342 = vst.msk [vmem:[#allocation2 + $0x30] sm:$0xff] %vm335_vm0, %v3015_v0  ;;  %v390_v10 = vld [vmem:[%s3198_s18 + $0x30] sm:$0xff]  ;;  %v391_v11 = vld [vmem:[%s3198_s18 + $0x38] sm:$0xff] }
  0x4c   : > { %343 = vst.msk [vmem:[#allocation2 + $0x38] sm:$0xff] %vm335_vm0, %v3015_v0  ;;  %344 = vst.msk [vmem:[#allocation2 + $0x40] sm:$0xff] %vm335_vm0, %v3015_v0  ;;  %v392_v12 = vld [vmem:[%s3198_s18 + $0x40] sm:$0xff]  ;;  %v393_v13 = vld [vmem:[%s3198_s18 + $0x48] sm:$0xff] }
  0x4d   : > { %345 = vst.msk [vmem:[#allocation2 + $0x48] sm:$0xff] %vm335_vm0, %v3015_v0  ;;  %346 = vst.msk [vmem:[#allocation2 + $0x50] sm:$0xff] %vm335_vm0, %v3015_v0  ;;  %v394_v14 = vld [vmem:[%s3198_s18 + $0x50] sm:$0xff]  ;;  %v395_v15 = vld [vmem:[%s3198_s18 + $0x58] sm:$0xff] }
  0x4e   : > { %347 = vst.msk [vmem:[#allocation2 + $0x58] sm:$0xff] %vm335_vm0, %v3015_v0  ;;  %348 = vst.msk [vmem:[#allocation2 + $0x60] sm:$0xff] %vm335_vm0, %v3015_v0  ;;  %v396_v16 = vld [vmem:[%s3198_s18 + $0x60] sm:$0xff]  ;;  %v397_v17 = vld [vmem:[%s3198_s18 + $0x68] sm:$0xff] }
  0x4f   : > { %349 = vst.msk [vmem:[#allocation2 + $0x68] sm:$0xff] %vm335_vm0, %v3015_v0  ;;  %350 = vst.msk [vmem:[#allocation2 + $0x70] sm:$0xff] %vm335_vm0, %v3015_v0  ;;  %v398_v18 = vld [vmem:[%s3198_s18 + $0x70] sm:$0xff]  ;;  %v399_v19 = vld [vmem:[%s3198_s18 + $0x78] sm:$0xff] }
  0x50   : > { %351 = vst.msk [vmem:[#allocation2 + $0x78] sm:$0xff] %vm335_vm0, %v3015_v0  ;;  %352 = vst.msk [vmem:[#allocation2 + $0x80] sm:$0xff] %vm335_vm0, %v3015_v0 }
  0x51   : > { %353 = vst.msk [vmem:[#allocation2 + $0x88] sm:$0xff] %vm335_vm0, %v3015_v0  ;;  %400 = vst.msk [vmem:[#allocation2 + $0x8] sm:$0xff] %vm335_vm0, %v384_v2 }
  0x52   : > { %401 = vst.msk [vmem:[#allocation2 + $0x10] sm:$0xff] %vm335_vm0, %v385_v3  ;;  %402 = vst.msk [vmem:[#allocation2 + $0x18] sm:$0xff] %vm335_vm0, %v386_v5 }
  0x53   : > { %403 = vst.msk [vmem:[#allocation2 + $0x20] sm:$0xff] %vm335_vm0, %v387_v6  ;;  %404 = vst.msk [vmem:[#allocation2 + $0x28] sm:$0xff] %vm335_vm0, %v388_v8 }
  0x54   : > { %405 = vst.msk [vmem:[#allocation2 + $0x30] sm:$0xff] %vm335_vm0, %v389_v9  ;;  %406 = vst.msk [vmem:[#allocation2 + $0x38] sm:$0xff] %vm335_vm0, %v390_v10  ;;  %v2348_v9 = vld [vmem:[%s3366_s1 + $0xa] sm:$0x3] }
  0x55   : > { %407 = vst.msk [vmem:[#allocation2 + $0x40] sm:$0xff] %vm335_vm0, %v391_v11  ;;  %408 = vst.msk [vmem:[#allocation2 + $0x48] sm:$0xff] %vm335_vm0, %v392_v12 }
  0x56   : > { %409 = vst.msk [vmem:[#allocation2 + $0x50] sm:$0xff] %vm335_vm0, %v393_v13  ;;  %410 = vst.msk [vmem:[#allocation2 + $0x58] sm:$0xff] %vm335_vm0, %v394_v14 }
  0x57   : > { %411 = vst.msk [vmem:[#allocation2 + $0x60] sm:$0xff] %vm335_vm0, %v395_v15  ;;  %412 = vst.msk [vmem:[#allocation2 + $0x68] sm:$0xff] %vm335_vm0, %v396_v16 }
  0x58   : > { %413 = vst.msk [vmem:[#allocation2 + $0x70] sm:$0xff] %vm335_vm0, %v397_v17  ;;  %414 = vst.msk [vmem:[#allocation2 + $0x78] sm:$0xff] %vm335_vm0, %v398_v18 }
  0x59   : > { %415 = vst.msk [vmem:[#allocation2 + $0x80] sm:$0xff] %vm335_vm0, %v399_v19  ;;  %v438_v20 = vld [vmem:[#allocation2 + $0x6] ss:$2 sm:$0xff]  ;;  %v417_v33 = vld [vmem:[#allocation2 + $0x5] ss:$2 sm:$0xff] }
  0x5a   : > { %v440_v21 = vld [vmem:[#allocation2 + $0x16] ss:$2 sm:$0xff]  ;;  %v419_v34 = vld [vmem:[#allocation2 + $0x15] ss:$2 sm:$0xff] }
  0x5b   : > { %v453_v22 = vpack.c.bf16 %v440_v21, %v438_v20  ;;  %v442_v23 = vld [vmem:[#allocation2 + $0x26] ss:$2 sm:$0xff]  ;;  %v432_v36 = vpack.c.bf16 %v419_v34, %v417_v33  ;;  %v421_v37 = vld [vmem:[#allocation2 + $0x25] ss:$2 sm:$0xff] }
  0x5c   : > { %v444_v24 = vld [vmem:[#allocation2 + $0x36] ss:$2 sm:$0xff]  ;;  %v423_v38 = vld [vmem:[#allocation2 + $0x35] ss:$2 sm:$0xff] }
  0x5d   : > { %v446_v25 = vld [vmem:[#allocation2 + $0x46] ss:$2 sm:$0xff]  ;;  %2542 = vmatprep.mubr.msk.bf16.mxu0 %vm335_vm0, %v453_v22  ;;  %v454_v26 = vpack.c.bf16 %v444_v24, %v442_v23  ;;  %v425_v40 = vld [vmem:[#allocation2 + $0x45] ss:$2 sm:$0xff]  ;;  %v433_v43 = vpack.c.bf16 %v423_v38, %v421_v37  ;;  %v985_v22 = vsel %vm471_vm1, %v2348_v9, 0 }
  0x5e   : > { %v448_v28 = vld [vmem:[#allocation2 + $0x56] ss:$2 sm:$0xff]  ;;  %v427_v41 = vld [vmem:[#allocation2 + $0x55] ss:$2 sm:$0xff]  ;;  %v2353_v23 = vld [vmem:[%s3366_s1 + $0xc] sm:$0x3] }
  0x5f   : > { %v455_v29 = vpack.c.bf16 %v448_v28, %v446_v25  ;;  %2543 = vmatmul.mubr.msk.bf16.vlgmr.msra.gmra.mrb[0].mxu0 %vm335_vm0, %v454_v26  ;;  %v450_v31 = vld [vmem:[#allocation2 + $0x66] ss:$2 sm:$0xff]  ;;  %v434_v45 = vpack.c.bf16 %v427_v41, %v425_v40  ;;  %v429_v48 = vld [vmem:[#allocation2 + $0x65] ss:$2 sm:$0xff] }
  0x60   : > { %2551 = vmatpush3.bf16.msra.mxu0 %v553_v27  ;;  %v452_v32 = vld [vmem:[#allocation2 + $0x76] ss:$2 sm:$0xff]  ;;  %v431_v49 = vld [vmem:[#allocation2 + $0x75] ss:$2 sm:$0xff] }
  0x61   : > { %2546 = vmatprep.mubr.msk.bf16.mxu0 %vm335_vm0, %v455_v29  ;;  %2836 = vmatprep.subr.msk.bf16.mxu0 %vm471_vm1, %v2333_v30  ;;  %v456_v35 = vpack.c.bf16 %v452_v32, %v450_v31  ;;  %v621_v50 = vld [vmem:[#allocation2 + $0x7] ss:$2 sm:$0xff]  ;;  %v623_v51 = vld [vmem:[#allocation2 + $0x17] ss:$2 sm:$0xff]  ;;  %v435_v52 = vpack.c.bf16 %v431_v49, %v429_v48  ;;  %v731_v62 = vld [vmem:[#allocation2 + $0x8] ss:$2 sm:$0xff] }
  0x62   : > { %v636_v53 = vpack.c.bf16 %v623_v51, %v621_v50  ;;  %v625_v54 = vld [vmem:[#allocation2 + $0x27] ss:$2 sm:$0xff]  ;;  %v627_v55 = vld [vmem:[#allocation2 + $0x37] ss:$2 sm:$0xff]  ;;  %v733_v63 = vld [vmem:[#allocation2 + $0x18] ss:$2 sm:$0xff] }
  0x63   : > { %v629_v56 = vld [vmem:[#allocation2 + $0x47] ss:$2 sm:$0xff]  ;;  %v631_v57 = vld [vmem:[#allocation2 + $0x57] ss:$2 sm:$0xff]  ;;  %v637_v58 = vpack.c.bf16 %v627_v55, %v625_v54  ;;  %v746_v2 = vpack.c.bf16 %v733_v63, %v731_v62  ;;  %v735_v3 = vld [vmem:[#allocation2 + $0x28] ss:$2 sm:$0xff] }
  0x64   : > { %v638_v59 = vpack.c.bf16 %v631_v57, %v629_v56  ;;  %v633_v60 = vld [vmem:[#allocation2 + $0x67] ss:$2 sm:$0xff]  ;;  %v635_v61 = vld [vmem:[#allocation2 + $0x77] ss:$2 sm:$0xff]  ;;  %v737_v4 = vld [vmem:[#allocation2 + $0x38] ss:$2 sm:$0xff] }
  0x65   : > { %v639_v1 = vpack.c.bf16 %v635_v61, %v633_v60  ;;  %v739_v5 = vld [vmem:[#allocation2 + $0x48] ss:$2 sm:$0xff]  ;;  %v741_v6 = vld [vmem:[#allocation2 + $0x58] ss:$2 sm:$0xff]  ;;  %v747_v7 = vpack.c.bf16 %v737_v4, %v735_v3  ;;  %v841_v12 = vld [vmem:[#allocation2 + $0x9] ss:$2 sm:$0xff] }
  0x66   : > { %v748_v8 = vpack.c.bf16 %v741_v6, %v739_v5  ;;  %v743_v10 = vld [vmem:[#allocation2 + $0x68] ss:$2 sm:$0xff]  ;;  %v745_v11 = vld [vmem:[#allocation2 + $0x78] ss:$2 sm:$0xff]  ;;  %v843_v13 = vld [vmem:[#allocation2 + $0x19] ss:$2 sm:$0xff] }
  0x67   : > { %2547 = vmatmul.mubr.msk.bf16.gmra.mrb[4].mxu0 %vm335_vm0, %v456_v35  ;;  %v749_v14 = vpack.c.bf16 %v745_v11, %v743_v10  ;;  %v856_v15 = vpack.c.bf16 %v843_v13, %v841_v12  ;;  %v845_v16 = vld [vmem:[#allocation2 + $0x29] ss:$2 sm:$0xff]  ;;  %v847_v17 = vld [vmem:[#allocation2 + $0x39] ss:$2 sm:$0xff]  ;;  %v951_v26 = vld [vmem:[#allocation2 + $0xa] ss:$2 sm:$0xff] }
  0x68   : > { %2552 = vmatprep.mubr.msk.bf16.mxu0 %vm335_vm0, %v432_v36  ;;  %v849_v18 = vld [vmem:[#allocation2 + $0x49] ss:$2 sm:$0xff]  ;;  %v851_v19 = vld [vmem:[#allocation2 + $0x59] ss:$2 sm:$0xff]  ;;  %v857_v20 = vpack.c.bf16 %v847_v17, %v845_v16  ;;  %v953_v27 = vld [vmem:[#allocation2 + $0x1a] ss:$2 sm:$0xff] }
  0x69   : > { %v858_v21 = vpack.c.bf16 %v851_v19, %v849_v18  ;;  %v853_v24 = vld [vmem:[#allocation2 + $0x69] ss:$2 sm:$0xff]  ;;  %v855_v25 = vld [vmem:[#allocation2 + $0x79] ss:$2 sm:$0xff]  ;;  %v966_v29 = vpack.c.bf16 %v953_v27, %v951_v26  ;;  %v955_v30 = vld [vmem:[#allocation2 + $0x2a] ss:$2 sm:$0xff] }
  0x6a   : > { %v859_v28 = vpack.c.bf16 %v855_v25, %v853_v24  ;;  %v957_v31 = vld [vmem:[#allocation2 + $0x3a] ss:$2 sm:$0xff]  ;;  %v959_v32 = vld [vmem:[#allocation2 + $0x4a] ss:$2 sm:$0xff]  ;;  %v1095_v36 = vsel %vm471_vm1, %v2353_v23, 0 }
  0x6b   : > { %v961_v33 = vld [vmem:[#allocation2 + $0x5a] ss:$2 sm:$0xff]  ;;  %v967_v34 = vpack.c.bf16 %v957_v31, %v955_v30  ;;  %v963_v37 = vld [vmem:[#allocation2 + $0x6a] ss:$2 sm:$0xff]  ;;  %v1063_v40 = vld [vmem:[#allocation2 + $0x1b] ss:$2 sm:$0xff] }
  0x6c   : > { %v968_v35 = vpack.c.bf16 %v961_v33, %v959_v32  ;;  %v965_v38 = vld [vmem:[#allocation2 + $0x7a] ss:$2 sm:$0xff]  ;;  %v1073_v49 = vld [vmem:[#allocation2 + $0x6b] ss:$2 sm:$0xff]  ;;  %v1075_v50 = vld [vmem:[#allocation2 + $0x7b] ss:$2 sm:$0xff] }
  0x6d   : > { %v969_v41 = vpack.c.bf16 %v965_v38, %v963_v37  ;;  %v1079_v51 = vpack.c.bf16 %v1075_v50, %v1073_v49  ;;  %v2876_v54 = vld [vmem:[#allocation8 + $0x50] sm:$0xff]   ;;  %v2877_v55 = vld [vmem:[#allocation8 + $0x58] sm:$0xff]   ;;  %v2878_v56 = vld [vmem:[#allocation8 + $0x60] sm:$0xff]  }
  0x6e   : > { %v2879_v57 = vld [vmem:[#allocation8 + $0x68] sm:$0xff]   ;;  %v3296_v60 = vld [vmem:[#allocation8] sm:$0xff]  }
  0x6f   : > { %2553 = vmatmul.mubr.msk.bf16.vlgmr.msra.gmra.mrb[0].mxu0 %vm335_vm0, %v433_v43  ;;  %v1065_v43 = vld [vmem:[#allocation2 + $0x2b] ss:$2 sm:$0xff]  ;;  %v2358_v61 = vld [vmem:[%s3367_s2] ss:$0 sm:$0xff] }
  0x70   : > { %2561 = vmatpush3.bf16.msra.mxu0 %v655_v44  ;;  %2556 = vmatprep.mubr.msk.bf16.mxu0 %vm335_vm0, %v434_v45  ;;  %v1067_v44 = vld [vmem:[#allocation2 + $0x3b] ss:$2 sm:$0xff]  ;;  %v1069_v45 = vld [vmem:[#allocation2 + $0x4b] ss:$2 sm:$0xff] }
  0x71   : > { %2837 = vmatprep.subr.msk.bf16.mxu0 %vm471_vm1, %v2338_v39  ;;  %v1061_v39 = vld [vmem:[#allocation2 + $0xb] ss:$2 sm:$0xff] }
  0x77   : > { %2557 = vmatmul.mubr.msk.bf16.gmra.mrb[4].mxu0 %vm335_vm0, %v435_v52  ;;  %v2874_v52 = vld [vmem:[#allocation8 + $0x40] sm:$0xff]  }
  0x78   : > { %2562 = vmatprep.mubr.msk.bf16.mxu0 %vm335_vm0, %v636_v53  ;;  %2610 = vmatprep.subr.bf16.mxu1 %v2874_v52  ;;  %v2875_v53 = vld [vmem:[#allocation8 + $0x48] sm:$0xff]  }
  0x79   : > { %2611 = vmatpush3.bf16.msra.mxu1 %v2874_v52  ;;  %v2883_v52 = vld [vmem:[#allocation8 + $0x8] sm:$0xff]  }
  0x7a   : > { %2612 = vmatprep.subr.bf16.mxu1 %v2875_v53 }
  0x7d   : > { %2613 = vmatpush3.bf16.msra.mxu1 %v2875_v53 }
  0x7e   : > { %2614 = vmatprep.subr.bf16.mxu1 %v2876_v54 }
  0x7f   : > { %2563 = vmatmul.mubr.msk.bf16.vlgmr.msra.gmra.mrb[0].mxu0 %vm335_vm0, %v637_v58  ;;  %v2880_v58 = vld [vmem:[#allocation8 + $0x70] sm:$0xff]  }
  0x80   : > { %2571 = vmatpush3.bf16.msra.mxu0 %v765_v46  ;;  %2566 = vmatprep.mubr.msk.bf16.mxu0 %vm335_vm0, %v638_v59  ;;  %v1071_v46 = vld [vmem:[#allocation2 + $0x5b] ss:$2 sm:$0xff] }
  0x81   : > { %2838 = vmatprep.subr.msk.bf16.mxu0 %vm471_vm1, %v2343_v42  ;;  %v1076_v42 = vpack.c.bf16 %v1063_v40, %v1061_v39  ;;  %v1078_v48 = vpack.c.bf16 %v1071_v46, %v1069_v45  ;;  %2615 = vmatpush3.bf16.msra.mxu1 %v2876_v54  ;;  %v2881_v59 = vld [vmem:[#allocation8 + $0x78] sm:$0xff]   ;;  %v2914_v54 = vld [vmem:[#allocation10 + $0x40] sm:$0xff]  }
  0x82   : > { %2616 = vmatprep.subr.bf16.mxu1 %v2877_v55 }
  0x85   : > { %2617 = vmatpush3.bf16.msra.mxu1 %v2877_v55  ;;  %v2884_v55 = vld [vmem:[#allocation8 + $0x10] sm:$0xff]  }
  0x86   : > { %2618 = vmatprep.subr.bf16.mxu1 %v2878_v56 }
  0x87   : > { %2567 = vmatmul.mubr.msk.bf16.gmra.mrb[4].mxu0 %vm335_vm0, %v639_v1 }
  0x88   : > { %2572 = vmatprep.mubr.msk.bf16.mxu0 %vm335_vm0, %v746_v2 }
  0x89   : > { %2619 = vmatpush3.bf16.msra.mxu1 %v2878_v56  ;;  %v2885_v56 = vld [vmem:[#allocation8 + $0x18] sm:$0xff]  }
  0x8a   : > { %2620 = vmatprep.subr.bf16.mxu1 %v2879_v57 }
  0x8d   : > { %2621 = vmatpush3.bf16.msra.mxu1 %v2879_v57  ;;  %v2886_v57 = vld [vmem:[#allocation8 + $0x20] sm:$0xff]  }
  0x8e   : > { %2622 = vmatprep.subr.bf16.mxu1 %v2880_v58 }
  0x8f   : > { %2573 = vmatmul.mubr.msk.bf16.vlgmr.msra.gmra.mrb[0].mxu0 %vm335_vm0, %v747_v7 }
  0x90   : > { %2581 = vmatpush3.bf16.msra.mxu0 %v875_v47  ;;  %2576 = vmatprep.mubr.msk.bf16.mxu0 %vm335_vm0, %v748_v8  ;;  %v1077_v47 = vpack.c.bf16 %v1067_v44, %v1065_v43 }
  0x91   : > { %2839 = vmatprep.subr.msk.bf16.mxu0 %vm471_vm1, %v2348_v9  ;;  %2623 = vmatpush3.bf16.msra.mxu1 %v2880_v58  ;;  %v2887_v58 = vld [vmem:[#allocation8 + $0x28] sm:$0xff]  }
  0x92   : > { %2624 = vmatprep.subr.bf16.mxu1 %v2881_v59 }
  0x95   : > { %2625 = vmatpush3.bf16.msra.mxu1 %v2881_v59  ;;  %v2888_v59 = vld [vmem:[#allocation8 + $0x30] sm:$0xff]  }
  0x96   : > { %2630 = vmatprep.subr.bf16.mxu1 %v3296_v60 }
  0x97   : > { %2577 = vmatmul.mubr.msk.bf16.gmra.mrb[4].mxu0 %vm335_vm0, %v749_v14 }
  0x98   : > { %2582 = vmatprep.mubr.msk.bf16.mxu0 %vm335_vm0, %v856_v15 }
  0x9f   : > { %2583 = vmatmul.mubr.msk.bf16.vlgmr.msra.gmra.mrb[0].mxu0 %vm335_vm0, %v857_v20 }
  0xa0   : > { %2591 = vmatpush3.bf16.msra.mxu0 %v985_v22  ;;  %2586 = vmatprep.mubr.msk.bf16.mxu0 %vm335_vm0, %v858_v21 }
  0xa1   : > { %2840 = vmatprep.subr.msk.bf16.mxu0 %vm471_vm1, %v2353_v23 }
  0xa7   : > { %2587 = vmatmul.mubr.msk.bf16.gmra.mrb[4].mxu0 %vm335_vm0, %v859_v28 }
  0xa8   : > { %2592 = vmatprep.mubr.msk.bf16.mxu0 %vm335_vm0, %v966_v29 }
  0xaf   : > { %2593 = vmatmul.mubr.msk.bf16.vlgmr.msra.gmra.mrb[0].mxu0 %vm335_vm0, %v967_v34 }
  0xb0   : > { %2601 = vmatpush3.bf16.msra.mxu0 %v1095_v36  ;;  %2596 = vmatprep.mubr.msk.bf16.mxu0 %vm335_vm0, %v968_v35 }
  0xb1   : > { %2710 = vmatprep.subr.bf16.mxu0 %v3015_v0 }
  0xb7   : > { %2597 = vmatmul.mubr.msk.bf16.gmra.mrb[4].mxu0 %vm335_vm0, %v969_v41 }
  0xb8   : > { %2602 = vmatprep.mubr.msk.bf16.mxu0 %vm335_vm0, %v1076_v42 }
  0xbf   : > { %2603 = vmatmul.mubr.msk.bf16.vlgmr.msra.gmra.mrb[0].mxu0 %vm335_vm0, %v1077_v47 }
  0xc0   : > { %2606 = vmatprep.mubr.msk.bf16.mxu0 %vm335_vm0, %v1078_v48  ;;  %2711 = vmatpush3.bf16.msra.mxu0 %v2914_v54 }
  0xc1   : > { %2712 = vmatprep.subr.bf16.mxu0 %v3015_v0 }
  0xc7   : > { %2607 = vmatmul.mubr.msk.bf16.gmra.mrb[4].mxu0 %vm335_vm0, %v1079_v51 }
 0x192   : > { %v2604_v62 = vpop.f32.mrb[0].mxu0 }
 0x193   : > { %v1179_v63 = vadd.f32 %v2604_v62, %v2358_v61  ;;  %v1131_v1 = vpop.f32.mrb[1].mxu0 }
 0x194   : > { %v1177_v2 = vadd.f32 %v2358_v61, %v1131_v1  ;;  %v2605_v3 = vpop.f32.mrb[2].mxu0  ;;  %v2891_v1 = vld [vmem:[#allocation8 + $0x88] sm:$0xff]  }
 0x195   : > { %v1187_v4 = vmax.f32 %v1179_v63, 0.0  ;;  %v1180_v5 = vadd.f32 %v2605_v3, %v2358_v61  ;;  %v1134_v6 = vpop.f32.mrb[3].mxu0  ;;  %v2892_v3 = vld [vmem:[#allocation8 + $0x90] sm:$0xff]  }
 0x196   : > { %v1185_v7 = vmax.f32 %v1177_v2, 0.0  ;;  %v1178_v8 = vadd.f32 %v2358_v61, %v1134_v6  ;;  %v2895_v6 = vld [vmem:[#allocation8 + $0xa8] sm:$0xff]  }
 0x197   : > { %1195 = vst [vmem:[#allocation3 + $0x18] sm:$0xff] %v1187_v4  ;;  %v1188_v9 = vmax.f32 %v1180_v5, 0.0  ;;  %v2893_v4 = vld [vmem:[#allocation8 + $0x98] sm:$0xff]   ;;  %v2894_v5 = vld [vmem:[#allocation8 + $0xa0] sm:$0xff]  }
 0x198   : > { %1193 = vst [vmem:[#allocation3 + $0x8] sm:$0xff] %v1185_v7  ;;  %v1186_v10 = vmax.f32 %v1178_v8, 0.0  ;;  %v2896_v7 = vld [vmem:[#allocation8 + $0xb0] sm:$0xff]   ;;  %v2897_v8 = vld [vmem:[#allocation8 + $0xb8] sm:$0xff]  }
 0x199   : > { %1196 = vst [vmem:[#allocation3 + $0x20] sm:$0xff] %v1188_v9  ;;  %v2898_v9 = vld [vmem:[#allocation8 + $0xc0] sm:$0xff]  }
 0x19a   : > { %1194 = vst [vmem:[#allocation3 + $0x10] sm:$0xff] %v1186_v10  ;;  %v2608_v11 = vpop.f32.mrb[4].mxu0 }
 0x19b   : > { %v1183_v12 = vadd.f32 %v2608_v11, %v2358_v61  ;;  %v1147_v13 = vpop.f32.mrb[5].mxu0 }
 0x19c   : > { %v1181_v14 = vadd.f32 %v2358_v61, %v1147_v13  ;;  %v2609_v15 = vpop.f32.mrb[6].mxu0 }
 0x19d   : > { %v1191_v16 = vmax.f32 %v1183_v12, 0.0  ;;  %v1184_v17 = vadd.f32 %v2609_v15, %v2358_v61  ;;  %v1150_v18 = vpop.f32.mrb[7].mxu0  ;;  %v2899_v12 = vld [vmem:[#allocation8 + $0xc8] sm:$0xff]   ;;  %v2901_v15 = vld [vmem:[#allocation8 + $0xd8] sm:$0xff]  }
 0x19e   : > { %v1189_v19 = vmax.f32 %v1181_v14, 0.0  ;;  %v1182_v20 = vadd.f32 %v2358_v61, %v1150_v18  ;;  %v2890_v61 = vld [vmem:[#allocation8 + $0x80] sm:$0xff]   ;;  %v2900_v14 = vld [vmem:[#allocation8 + $0xd0] sm:$0xff]  }
 0x19f   : > { %1199 = vst [vmem:[#allocation3 + $0x38] sm:$0xff] %v1191_v16  ;;  %v1192_v21 = vmax.f32 %v1184_v17, 0.0  ;;  %v2902_v16 = vld [vmem:[#allocation8 + $0xe0] sm:$0xff]   ;;  %v2903_v17 = vld [vmem:[#allocation8 + $0xe8] sm:$0xff]   ;;  %v2904_v18 = vld [vmem:[#allocation8 + $0xf0] sm:$0xff]  }
 0x1a0   : > { %v1212_v22 = vld [vmem:[#allocation3 + $0x18] ss:$2 sm:$0xff]  ;;  %1197 = vst [vmem:[#allocation3 + $0x28] sm:$0xff] %v1189_v19  ;;  %v1190_v23 = vmax.f32 %v1182_v20, 0.0  ;;  %v1220_v29 = vld [vmem:[#allocation3 + $0x19] ss:$2 sm:$0xff] }
 0x1a1   : > { %v1202_v24 = vld [vmem:[#allocation3 + $0x7] ss:$2 sm:$0xff]  ;;  %v1204_v25 = vld [vmem:[#allocation3 + $0x17] ss:$2 sm:$0xff]  ;;  %v1210_v26 = vld [vmem:[#allocation3 + $0x8] ss:$2 sm:$0xff] }
 0x1a2   : > { %1200 = vst [vmem:[#allocation3 + $0x40] sm:$0xff] %v1192_v21  ;;  %v1225_v27 = vmax.f32 %v1202_v24, %v1210_v26  ;;  %v1226_v28 = vmax.f32 %v1204_v25, %v1212_v22  ;;  %1198 = vst [vmem:[#allocation3 + $0x30] sm:$0xff] %v1190_v23  ;;  %v1218_v30 = vld [vmem:[#allocation3 + $0x9] ss:$2 sm:$0xff]  ;;  %v2907_v26 = vld [vmem:[#allocation8 + $0x108] sm:$0xff]  }
 0x1a3   : > { %v2905_v19 = vld [vmem:[#allocation8 + $0xf8] sm:$0xff]   ;;  %v2906_v20 = vld [vmem:[#allocation8 + $0x100] sm:$0xff]  }
 0x1a4   : > { %v3302_v31 = vmax.f32 %v1225_v27, %v1218_v30  ;;  %v1230_v32 = vmax.f32 %v1226_v28, %v1220_v29  ;;  %v2908_v28 = vld [vmem:[#allocation8 + $0x110] sm:$0xff]   ;;  %v2909_v29 = vld [vmem:[#allocation8 + $0x118] sm:$0xff]   ;;  %v2910_v30 = vld [vmem:[#allocation8 + $0x120] sm:$0xff]  }
 0x1a6   : > { %1233 = vst [vmem:[#allocation4 + $0x8] sm:$0xff] %v3302_v31  ;;  %1234 = vst [vmem:[#allocation4 + $0x10] sm:$0xff] %v1230_v32  ;;  %v1480_v2 = vpack.c.bf16 %v1230_v32, %v3302_v31  ;;  %v2911_v31 = vld [vmem:[#allocation8 + $0x128] sm:$0xff]   ;;  %v2912_v32 = vld [vmem:[#allocation8 + $0x130] sm:$0xff]  }
 0x1a9   : > { %v1216_v33 = vld [vmem:[#allocation3 + $0x38] ss:$2 sm:$0xff]  ;;  %v1206_v34 = vld [vmem:[#allocation3 + $0x27] ss:$2 sm:$0xff]  ;;  %v1208_v35 = vld [vmem:[#allocation3 + $0x37] ss:$2 sm:$0xff] }
 0x1aa   : > { %v1214_v36 = vld [vmem:[#allocation3 + $0x28] ss:$2 sm:$0xff]  ;;  %v1228_v38 = vmax.f32 %v1208_v35, %v1216_v33  ;;  %v1224_v39 = vld [vmem:[#allocation3 + $0x39] ss:$2 sm:$0xff]  ;;  %v1222_v40 = vld [vmem:[#allocation3 + $0x29] ss:$2 sm:$0xff] }
 0x1ab   : > { %v1227_v37 = vmax.f32 %v1206_v34, %v1214_v36  ;;  %v2913_v33 = vld [vmem:[#allocation8 + $0x138] sm:$0xff]   ;;  %v2915_v36 = vld [vmem:[#allocation10 + $0x80] sm:$0xff]  }
 0x1ac   : > { %v3307_v42 = vmax.f32 %v1228_v38, %v1224_v39  ;;  %v3319_v38 = vld [vmem:[#allocation3 + $0x48] sm:$0xff]  ;;  %v2916_v39 = vld [vmem:[#allocation10 + $0x48] sm:$0xff]  }
 0x1ad   : > { %v3305_v41 = vmax.f32 %v1227_v37, %v1222_v40  ;;  %v1259_v43 = vld [vmem:[#allocation4 + $0x7] sm:$0xff]  ;;  %v1260_v44 = vld [vmem:[#allocation4 + $0xf] sm:$0xff]  ;;  %2713 = vmatpush3.bf16.msra.mxu0 %v2916_v39  ;;  %2726 = vmatprep.mubr.msk.bf16.mxu0 %vm3016_vm2, %v3319_v38 }
 0x1ae   : > { %1236 = vst [vmem:[#allocation4 + $0x20] sm:$0xff] %v3307_v42  ;;  %v1263_v45 = vpack.c.bf16 %v1260_v44, %v1259_v43  ;;  %v1237_v47 = vld [vmem:[#allocation4 + $0x6] sm:$0xff]  ;;  %v1238_v48 = vld [vmem:[#allocation4 + $0xe] sm:$0xff]  ;;  %2714 = vmatprep.subr.bf16.mxu0 %v3319_v38 }
 0x1af   : > { %1235 = vst [vmem:[#allocation4 + $0x18] sm:$0xff] %v3305_v41  ;;  %v1481_v46 = vpack.c.bf16 %v3307_v42, %v3305_v41  ;;  %v1241_v53 = vpack.c.bf16 %v1238_v48, %v1237_v47  ;;  %v1600_v11 = vld [vmem:[#allocation4 + $0x9] sm:$0xff]  ;;  %v2920_v41 = vld [vmem:[#allocation10 + $0x58] sm:$0xff]   ;;  %v2922_v43 = vld [vmem:[#allocation10 + $0x60] sm:$0xff]  }
 0x1b0   : > { %2626 = vmatprep.mubr.bf16.mxu1 %v1263_v45  ;;  %v1724_v25 = vld [vmem:[#allocation4 + $0xa] sm:$0xff]  ;;  %v2923_v48 = vld [vmem:[#allocation10 + $0xa0] sm:$0xff]  }
 0x1b1   : > { %v2918_v40 = vld [vmem:[#allocation10 + $0x50] sm:$0xff]   ;;  %v2917_v42 = vld [vmem:[#allocation10 + $0x88] sm:$0xff]  }
 0x1b2   : > { %2715 = vmatpush3.bf16.msra.mxu0 %v2918_v40  ;;  %v2919_v44 = vld [vmem:[#allocation10 + $0x90] sm:$0xff]   ;;  %v2924_v45 = vld [vmem:[#allocation10 + $0x68] sm:$0xff]  }
 0x1b3   : > { %2716 = vmatprep.subr.bf16.mxu0 %v3319_v38  ;;  %v2926_v47 = vld [vmem:[#allocation10 + $0x70] sm:$0xff]  }
 0x1b5   : > { %v1603_v22 = vld [vmem:[#allocation4 + $0x21] sm:$0xff] }
 0x1b6   : > { %v1261_v49 = vld [vmem:[#allocation4 + $0x17] sm:$0xff]  ;;  %v1262_v50 = vld [vmem:[#allocation4 + $0x1f] sm:$0xff]  ;;  %2717 = vmatpush3.bf16.msra.mxu0 %v2920_v41 }
 0x1b7   : > { %v1264_v51 = vpack.c.bf16 %v1262_v50, %v1261_v49  ;;  %v1239_v62 = vld [vmem:[#allocation4 + $0x16] sm:$0xff]  ;;  %v1240_v0 = vld [vmem:[#allocation4 + $0x1e] sm:$0xff]  ;;  %2718 = vmatprep.subr.bf16.mxu0 %v3319_v38  ;;  %v2925_v50 = vld [vmem:[#allocation10 + $0xa8] sm:$0xff]  }
 0x1b8   : > { %v1242_v63 = vpack.c.bf16 %v1240_v0, %v1239_v62  ;;  %v1601_v10 = vld [vmem:[#allocation4 + $0x11] sm:$0xff]  ;;  %v1602_v21 = vld [vmem:[#allocation4 + $0x19] sm:$0xff]  ;;  %v1727_v35 = vld [vmem:[#allocation4 + $0x22] sm:$0xff] }
 0x1b9   : > { %2627 = vmatmul.mubr.bf16.vlgmr.msra.gmra.mrb[0].mxu1 %v1264_v51  ;;  %v1604_v13 = vpack.c.bf16 %v1601_v10, %v1600_v11  ;;  %v1725_v23 = vld [vmem:[#allocation4 + $0x12] sm:$0xff]  ;;  %v1605_v24 = vpack.c.bf16 %v1603_v22, %v1602_v21  ;;  %v1726_v34 = vld [vmem:[#allocation4 + $0x1a] sm:$0xff]  ;;  %v2935_v21 = vld [vmem:[#allocation10 + $0x28] sm:$0xff]  }
 0x1ba   : > { %2631 = vmatpush3.bf16.msra.mxu1 %v3296_v60  ;;  %2646 = vmatprep.mubr.bf16.mxu1 %v1241_v53  ;;  %v2889_v60 = vld [vmem:[#allocation8 + $0x38] sm:$0xff]   ;;  %v1728_v27 = vpack.c.bf16 %v1725_v23, %v1724_v25  ;;  %v1729_v37 = vpack.c.bf16 %v1727_v35, %v1726_v34  ;;  %v2927_v51 = vld [vmem:[#allocation10 + $0xb0] sm:$0xff]   ;;  %v2399_v53 = vld [vmem:[%s3369_s4] ss:$0 sm:$0xff] }
 0x1bb   : > { %2632 = vmatprep.subr.bf16.mxu1 %v2883_v52  ;;  %2719 = vmatpush3.bf16.msra.mxu0 %v2922_v43  ;;  %v2928_v49 = vld [vmem:[#allocation10 + $0x78] sm:$0xff]   ;;  %v2936_v22 = vld [vmem:[#allocation10 + $0x30] sm:$0xff]  }
 0x1bc   : > { %2720 = vmatprep.subr.bf16.mxu0 %v3319_v38  ;;  %v2937_v23 = vld [vmem:[#allocation10 + $0x38] sm:$0xff]  }
 0x1be   : > { %2633 = vmatpush3.bf16.msra.mxu1 %v2883_v52  ;;  %v2929_v52 = vld [vmem:[#allocation10 + $0xb8] sm:$0xff]  }
 0x1bf   : > { %2634 = vmatprep.subr.bf16.mxu1 %v2884_v55  ;;  %2721 = vmatpush3.bf16.msra.mxu0 %v2924_v45 }
 0x1c0   : > { %2722 = vmatprep.subr.bf16.mxu0 %v3319_v38 }
 0x1c2   : > { %2635 = vmatpush3.bf16.msra.mxu1 %v2884_v55 }
 0x1c3   : > { %2636 = vmatprep.subr.bf16.mxu1 %v2885_v56  ;;  %2723 = vmatpush3.bf16.msra.mxu0 %v2926_v47 }
 0x1c4   : > { %2724 = vmatprep.subr.bf16.mxu0 %v3319_v38 }
 0x1c6   : > { %2637 = vmatpush3.bf16.msra.mxu1 %v2885_v56 }
 0x1c7   : > { %2638 = vmatprep.subr.bf16.mxu1 %v2886_v57  ;;  %2725 = vmatpush3.bf16.msra.mxu0 %v2928_v49 }
 0x1c8   : > { %2730 = vmatprep.subr.bf16.mxu0 %v3319_v38 }
 0x1ca   : > { %2639 = vmatpush3.bf16.msra.mxu1 %v2886_v57 }
 0x1cb   : > { %2640 = vmatprep.subr.bf16.mxu1 %v2887_v58 }
 0x1ce   : > { %2641 = vmatpush3.bf16.msra.mxu1 %v2887_v58 }
 0x1cf   : > { %2642 = vmatprep.subr.bf16.mxu1 %v2888_v59 }
 0x1d2   : > { %2643 = vmatpush3.bf16.msra.mxu1 %v2888_v59 }
 0x1d3   : > { %2644 = vmatprep.subr.bf16.mxu1 %v2889_v60 }
 0x1d6   : > { %2645 = vmatpush3.bf16.msra.mxu1 %v2889_v60 }
 0x1d7   : > { %2650 = vmatprep.subr.bf16.mxu1 %v2890_v61 }
 0x1d9   : > { %2647 = vmatmul.mubr.bf16.vlgmr.msra.gmra.mrb[0].mxu1 %v1242_v63 }
 0x1da   : > { %2651 = vmatpush3.bf16.msra.mxu1 %v2890_v61  ;;  %2666 = vmatprep.mubr.bf16.mxu1 %v1480_v2 }
 0x1db   : > { %2652 = vmatprep.subr.bf16.mxu1 %v2891_v1 }
 0x1de   : > { %2653 = vmatpush3.bf16.msra.mxu1 %v2891_v1 }
 0x1df   : > { %2654 = vmatprep.subr.bf16.mxu1 %v2892_v3 }
 0x1e2   : > { %2655 = vmatpush3.bf16.msra.mxu1 %v2892_v3 }
 0x1e3   : > { %2656 = vmatprep.subr.bf16.mxu1 %v2893_v4 }
 0x1e6   : > { %2657 = vmatpush3.bf16.msra.mxu1 %v2893_v4 }
 0x1e7   : > { %2658 = vmatprep.subr.bf16.mxu1 %v2894_v5 }
 0x1ea   : > { %2659 = vmatpush3.bf16.msra.mxu1 %v2894_v5 }
 0x1eb   : > { %2660 = vmatprep.subr.bf16.mxu1 %v2895_v6 }
 0x1ee   : > { %2661 = vmatpush3.bf16.msra.mxu1 %v2895_v6 }
 0x1ef   : > { %2662 = vmatprep.subr.bf16.mxu1 %v2896_v7 }
 0x1f2   : > { %2663 = vmatpush3.bf16.msra.mxu1 %v2896_v7 }
 0x1f3   : > { %2664 = vmatprep.subr.bf16.mxu1 %v2897_v8 }
 0x1f6   : > { %2665 = vmatpush3.bf16.msra.mxu1 %v2897_v8 }
 0x1f7   : > { %2670 = vmatprep.subr.bf16.mxu1 %v2898_v9 }
 0x1f9   : > { %2667 = vmatmul.mubr.bf16.vlgmr.msra.gmra.mrb[0].mxu1 %v1481_v46  ;;  %v2921_v46 = vld [vmem:[#allocation10 + $0x98] sm:$0xff]  }
 0x1fa   : > { %2671 = vmatpush3.bf16.msra.mxu1 %v2898_v9  ;;  %2686 = vmatprep.mubr.bf16.mxu1 %v1604_v13 }
 0x1fb   : > { %2672 = vmatprep.subr.bf16.mxu1 %v2899_v12 }
 0x1fe   : > { %2673 = vmatpush3.bf16.msra.mxu1 %v2899_v12  ;;  %v2930_v12 = vld [vmem:[#allocation10] sm:$0xff]  }
 0x1ff   : > { %2674 = vmatprep.subr.bf16.mxu1 %v2900_v14 }
 0x202   : > { %2675 = vmatpush3.bf16.msra.mxu1 %v2900_v14  ;;  %v2931_v14 = vld [vmem:[#allocation10 + $0x8] sm:$0xff]  }
 0x203   : > { %2676 = vmatprep.subr.bf16.mxu1 %v2901_v15 }
 0x206   : > { %2677 = vmatpush3.bf16.msra.mxu1 %v2901_v15 }
 0x207   : > { %2678 = vmatprep.subr.bf16.mxu1 %v2902_v16 }
 0x20a   : > { %2679 = vmatpush3.bf16.msra.mxu1 %v2902_v16 }
 0x20b   : > { %2680 = vmatprep.subr.bf16.mxu1 %v2903_v17 }
 0x20e   : > { %2681 = vmatpush3.bf16.msra.mxu1 %v2903_v17  ;;  %v2932_v17 = vld [vmem:[#allocation10 + $0x10] sm:$0xff]  }
 0x20f   : > { %2682 = vmatprep.subr.bf16.mxu1 %v2904_v18 }
 0x212   : > { %2683 = vmatpush3.bf16.msra.mxu1 %v2904_v18 }
 0x213   : > { %2684 = vmatprep.subr.bf16.mxu1 %v2905_v19 }
 0x216   : > { %2685 = vmatpush3.bf16.msra.mxu1 %v2905_v19  ;;  %v2933_v19 = vld [vmem:[#allocation10 + $0x18] sm:$0xff]  }
 0x217   : > { %2690 = vmatprep.subr.bf16.mxu1 %v2906_v20 }
 0x219   : > { %2687 = vmatmul.mubr.bf16.vlgmr.msra.gmra.mrb[0].mxu1 %v1605_v24 }
 0x21a   : > { %2691 = vmatpush3.bf16.msra.mxu1 %v2906_v20  ;;  %2706 = vmatprep.mubr.bf16.mxu1 %v1728_v27  ;;  %v2934_v20 = vld [vmem:[#allocation10 + $0x20] sm:$0xff]  }
 0x21b   : > { %2692 = vmatprep.subr.bf16.mxu1 %v2907_v26 }
 0x21e   : > { %2693 = vmatpush3.bf16.msra.mxu1 %v2907_v26 }
 0x21f   : > { %2694 = vmatprep.subr.bf16.mxu1 %v2908_v28 }
 0x222   : > { %2695 = vmatpush3.bf16.msra.mxu1 %v2908_v28 }
 0x223   : > { %2696 = vmatprep.subr.bf16.mxu1 %v2909_v29 }
 0x226   : > { %2697 = vmatpush3.bf16.msra.mxu1 %v2909_v29 }
 0x227   : > { %2698 = vmatprep.subr.bf16.mxu1 %v2910_v30 }
 0x22a   : > { %2699 = vmatpush3.bf16.msra.mxu1 %v2910_v30 }
 0x22b   : > { %2700 = vmatprep.subr.bf16.mxu1 %v2911_v31 }
 0x22e   : > { %2701 = vmatpush3.bf16.msra.mxu1 %v2911_v31 }
 0x22f   : > { %2702 = vmatprep.subr.bf16.mxu1 %v2912_v32 }
 0x232   : > { %2703 = vmatpush3.bf16.msra.mxu1 %v2912_v32 }
 0x233   : > { %2704 = vmatprep.subr.bf16.mxu1 %v2913_v33 }
 0x236   : > { %2705 = vmatpush3.bf16.msra.mxu1 %v2913_v33 }
 0x237   : > { %2750 = vmatprep.subr.bf16.mxu1 %v3319_v38 }
 0x239   : > { %2707 = vmatmul.mubr.bf16.vlgmr.msra.gmra.mrb[0].mxu1 %v1729_v37 }
 0x23a   : > { %2751 = vmatpush3.bf16.msra.mxu1 %v2915_v36  ;;  %2766 = vmatprep.mubr.msk.bf16.mxu1 %vm3016_vm2, %v3319_v38 }
 0x23b   : > { %2752 = vmatprep.subr.bf16.mxu1 %v3319_v38 }
 0x23e   : > { %2753 = vmatpush3.bf16.msra.mxu1 %v2917_v42 }
 0x23f   : > { %2754 = vmatprep.subr.bf16.mxu1 %v3319_v38 }
 0x242   : > { %2755 = vmatpush3.bf16.msra.mxu1 %v2919_v44 }
 0x243   : > { %2756 = vmatprep.subr.bf16.mxu1 %v3319_v38 }
 0x246   : > { %2757 = vmatpush3.bf16.msra.mxu1 %v2921_v46 }
 0x247   : > { %2758 = vmatprep.subr.bf16.mxu1 %v3319_v38 }
 0x24a   : > { %2759 = vmatpush3.bf16.msra.mxu1 %v2923_v48 }
 0x24b   : > { %2760 = vmatprep.subr.bf16.mxu1 %v3319_v38 }
 0x24e   : > { %2761 = vmatpush3.bf16.msra.mxu1 %v2925_v50 }
 0x24f   : > { %2762 = vmatprep.subr.bf16.mxu1 %v3319_v38 }
 0x252   : > { %2763 = vmatpush3.bf16.msra.mxu1 %v2927_v51 }
 0x253   : > { %2764 = vmatprep.subr.bf16.mxu1 %v3319_v38 }
 0x256   : > { %2765 = vmatpush3.bf16.msra.mxu1 %v2929_v52  ;;  %v2234_v52 = vld [vmem:[%s3372_s7] sm:$0xff] }
 0x30c   : > { %v2708_v54 = vpop.f32.mrb[0].mxu1 }
 0x30d   : > { %v1857_v55 = vadd.f32 %v2708_v54, %v2399_v53  ;;  %v1829_v56 = vpop.f32.mrb[1].mxu1 }
 0x30e   : > { %v1855_v57 = vadd.f32 %v2399_v53, %v1829_v56  ;;  %v2709_v58 = vpop.f32.mrb[2].mxu1 }
 0x30f   : > { %v1861_v59 = vmax.f32 %v1857_v55, 0.0  ;;  %v1858_v60 = vadd.f32 %v2709_v58, %v2399_v53  ;;  %v1832_v61 = vpop.f32.mrb[3].mxu1 }
 0x310   : > { %v1859_v62 = vmax.f32 %v1855_v57, 0.0  ;;  %v1856_v0 = vadd.f32 %v2399_v53, %v1832_v61 }
 0x311   : > { %1865 = vst [vmem:[#allocation5 + $0x18] sm:$0xff] %v1861_v59  ;;  %v1862_v63 = vmax.f32 %v1858_v60, 0.0 }
 0x312   : > { %1863 = vst [vmem:[#allocation5 + $0x8] sm:$0xff] %v1859_v62  ;;  %v1860_v1 = vmax.f32 %v1856_v0, 0.0 }
 0x313   : > { %1866 = vst [vmem:[#allocation5 + $0x20] sm:$0xff] %v1862_v63 }
 0x314   : > { %1864 = vst [vmem:[#allocation5 + $0x10] sm:$0xff] %v1860_v1 }
 0x31a   : > { %v1874_v2 = vld [vmem:[#allocation5 + $0x18] ss:$2 sm:$0xff]  ;;  %v1878_v8 = vld [vmem:[#allocation5 + $0x19] ss:$2 sm:$0xff] }
 0x31b   : > { %v1868_v3 = vld [vmem:[#allocation5 + $0x7] ss:$2 sm:$0xff]  ;;  %v1870_v4 = vld [vmem:[#allocation5 + $0x17] ss:$2 sm:$0xff]  ;;  %v1872_v5 = vld [vmem:[#allocation5 + $0x8] ss:$2 sm:$0xff] }
 0x31c   : > { %v1879_v6 = vmax.f32 %v1868_v3, %v1872_v5  ;;  %v1880_v7 = vmax.f32 %v1870_v4, %v1874_v2  ;;  %v1876_v9 = vld [vmem:[#allocation5 + $0x9] ss:$2 sm:$0xff] }
 0x31e   : > { %v1881_v10 = vmax.f32 %v1879_v6, %v1876_v9  ;;  %v1882_v11 = vmax.f32 %v1880_v7, %v1878_v8 }
 0x320   : > { %1883 = vst [vmem:[#allocation6 + $0x8] sm:$0xff] %v1881_v10  ;;  %1884 = vst [vmem:[#allocation6 + $0x10] sm:$0xff] %v1882_v11  ;;  %v1906_v13 = vpack.c.bf16 %v1882_v11, %v1881_v10 }
 0x322   : > { %2727 = vmatmul.mubr.bf16.vlgmr.msra.gmra.mrb[8].mxu0 %v1906_v13 }
 0x323   : > { %2731 = vmatpush3.bf16.msra.mxu0 %v2930_v12  ;;  %2746 = vmatprep.mubr.msk.bf16.mxu0 %vm3016_vm2, %v3319_v38 }
 0x324   : > { %2732 = vmatprep.subr.bf16.mxu0 %v3319_v38 }
 0x327   : > { %v2102_v15 = vld [vmem:[#allocation6 + $0x9] sm:$0xff]  ;;  %v2103_v16 = vld [vmem:[#allocation6 + $0x11] sm:$0xff]  ;;  %2733 = vmatpush3.bf16.msra.mxu0 %v2931_v14 }
 0x328   : > { %v2104_v18 = vpack.c.bf16 %v2103_v16, %v2102_v15  ;;  %2734 = vmatprep.subr.bf16.mxu0 %v3319_v38  ;;  %v1885_v24 = vld [vmem:[#allocation6 + $0x7] sm:$0xff]  ;;  %v1886_v25 = vld [vmem:[#allocation6 + $0xf] sm:$0xff] }
 0x329   : > { %v1887_v26 = vpack.c.bf16 %v1886_v25, %v1885_v24 }
 0x32a   : > { %2767 = vmatmul.mubr.bf16.vlgmr.msra.gmra.mrb[4].mxu1 %v2104_v18 }
 0x32b   : > { %2735 = vmatpush3.bf16.msra.mxu0 %v2932_v17 }
 0x32c   : > { %2736 = vmatprep.subr.bf16.mxu0 %v3319_v38 }
 0x32f   : > { %2737 = vmatpush3.bf16.msra.mxu0 %v2933_v19 }
 0x330   : > { %2738 = vmatprep.subr.bf16.mxu0 %v3319_v38 }
 0x333   : > { %2739 = vmatpush3.bf16.msra.mxu0 %v2934_v20 }
 0x334   : > { %2740 = vmatprep.subr.bf16.mxu0 %v3319_v38 }
 0x337   : > { %2741 = vmatpush3.bf16.msra.mxu0 %v2935_v21 }
 0x338   : > { %2742 = vmatprep.subr.bf16.mxu0 %v3319_v38 }
 0x33b   : > { %2743 = vmatpush3.bf16.msra.mxu0 %v2936_v22 }
 0x33c   : > { %2744 = vmatprep.subr.bf16.mxu0 %v3319_v38  ;;  %v2424_v38 = vld [vmem:[%s3371_s6] ss:$0 sm:$0xff] }
 0x33f   : > { %2745 = vmatpush3.bf16.msra.mxu0 %v2937_v23 }
 0x342   : > { %2747 = vmatmul.mubr.bf16.vlgmr.msra.gmra.mrb[12].mxu0 %v1887_v26 }
 0x3f5   : > { %v2006_v27 = vpop.f32.mrb[8].mxu0 }
 0x3f6   : > { %v2728_v28 = vpop.f32.mrb[9].mxu0 }
 0x3f7   : > { %v2009_v29 = vpop.f32.mrb[10].mxu0 }
 0x3f8   : > { %v2729_v30 = vpop.f32.mrb[11].mxu0 }
 0x3fd   : > { %v2204_v31 = vpop.f32.mrb[4].mxu1 }
 0x3fe   : > { %v2768_v32 = vpop.f32.mrb[5].mxu1 }
 0x3ff   : > { %v2207_v33 = vpop.f32.mrb[6].mxu1 }
 0x400   : > { %v2769_v34 = vpop.f32.mrb[7].mxu1 }
 0x415   : > { %v2095_v35 = vpop.f32.mrb[12].mxu0 }
 0x416   : > { %v2096_v36 = vadd.f32 %v2095_v35, %v2006_v27  ;;  %v2748_v37 = vpop.f32.mrb[13].mxu0 }
 0x417   : > { %v2098_v39 = vpop.f32.mrb[14].mxu0 }
 0x418   : > { %v2211_v40 = vadd.f32 %v2204_v31, %v2096_v36  ;;  %v2099_v41 = vadd.f32 %v2098_v39, %v2009_v29  ;;  %v2749_v42 = vpop.f32.mrb[15].mxu0 }
 0x41a   : > { %v2220_v43 = vadd.f32 %v2424_v38, %v2211_v40  ;;  %v2212_v44 = vadd.f32 %v2207_v33, %v2099_v41 }
 0x41c   : > { %v2222_v45 = vmax.f32 %v2220_v43, 0.0  ;;  %v2221_v46 = vadd.f32 %v2424_v38, %v2212_v44 }
 0x41e   : > { %2224 = vst [vmem:[#allocation7 + $0x8] sm:$0xff] %v2222_v45  ;;  %v2223_v47 = vmax.f32 %v2221_v46, 0.0 }
 0x420   : > { %2225 = vst [vmem:[#allocation7 + $0x10] sm:$0xff] %v2223_v47 }
 0x427   : > { %v2227_v48 = vld [vmem:[#allocation7 + $0x7] ss:$2 sm:$0xff]  ;;  %v2229_v49 = vld [vmem:[#allocation7 + $0x8] ss:$2 sm:$0xff] }
 0x428   : > { %v2232_v50 = vmax.f32 %v2227_v48, %v2229_v49  ;;  %v2231_v51 = vld [vmem:[#allocation7 + $0x9] ss:$2 sm:$0xff] }
 0x42a   : > { %v2233_v53 = vmax.f32 %v2232_v50, %v2231_v51 }
 0x42c   : > { %v2235_v54 = vadd.f32 %v2234_v52, %v2233_v53 }
 0x42e   : > { %2236 = vst [vmem:[%s333_s24] sm:$0xff] %v2235_v54 }
 0x42f PF: > { %s20_s27 = sadd.s32 1, %s3009_s27  }
 0x430   : > { %p17_p5 = scmp.ge.s32.totalorder %s20_s27, 4  }
 0x432   :  { %19 = sbr.rel (!%p17_p5) target bundleno = 2 (0x2), region = 180 }
 0x439   :  { %2256 = vsyncpa [#allocation9], 1 }
 0x43a   :  { %2258 = vsyncpa [#allocation9 + $0x1], 1 }
 0x43b   :  { %2259 = vsyncpa [#allocation11], 1 }

// kernel: brain_tokenizer_forward.3
= control target key start
LH: loop header
LB: loop body
LE: loop exit
PB: predicated region body
PF: predicated region fallthrough
CT: control target
= control target key end

     0   :  { %s5789_s0 = inlined_call_operand.vmem [shape: f32[16,128], index: 0, kind: input, shape index: {}]   ;;  %s5790_s1 = inlined_call_operand.vmem [shape: f32[128,128], index: 1, kind: input, shape index: {}]   ;;  %s5791_s2 = inlined_call_operand.vmem [shape: bf16[6,128,384], index: 2, kind: input, shape index: {}]   ;;  %s5792_s3 = inlined_call_operand.vmem [shape: f32[6,1,384], index: 3, kind: input, shape index: {}]   ;;  %s5793_s4 = inlined_call_operand.hbm [shape: bf16[6,128,128], index: 4, kind: input, shape index: {}]   ;;  %s5794_s5 = inlined_call_operand.vmem [shape: f32[6,1,128], index: 5, kind: input, shape index: {}]   ;;  %s5795_s6 = inlined_call_operand.vmem [shape: f32[6,1,128], index: 6, kind: input, shape index: {}]   ;;  %s5796_s7 = inlined_call_operand.vmem [shape: f32[6,1,128], index: 7, kind: input, shape index: {}]   ;;  %s5797_s8 = inlined_call_operand.hbm [shape: bf16[6,128,512], index: 8, kind: input, shape index: {}]   ;;  %s5798_s9 = inlined_call_operand.vmem [shape: f32[6,1,512], index: 9, kind: input, shape index: {}]   ;;  %s5799_s10 = inlined_call_operand.hbm [shape: bf16[6,512,128], index: 10, kind: input, shape index: {}]   ;;  %s5800_s11 = inlined_call_operand.vmem [shape: f32[6,1,128], index: 11, kind: input, shape index: {}]   ;;  %s5801_s12 = inlined_call_operand.vmem [shape: f32[6,1,128], index: 12, kind: input, shape index: {}]   ;;  %s5802_s13 = inlined_call_operand.vmem [shape: f32[6,1,128], index: 13, kind: input, shape index: {}]   ;;  %s5803_s14 = inlined_call_operand.hbm [shape: bf16[128,256], index: 14, kind: input, shape index: {}]   ;;  %s5804_s15 = inlined_call_operand.hbm [shape: f32[1,256], index: 15, kind: input, shape index: {}]   ;;  %s5805_s16 = inlined_call_operand.hbm [shape: bf16[256,512], index: 16, kind: input, shape index: {}]   ;;  %s5806_s17 = inlined_call_operand.hbm [shape: f32[1,512], index: 17, kind: input, shape index: {}]   ;;  %s5807_s18 = inlined_call_operand.hbm [shape: f32[16,512], index: 18, kind: output, shape index: {}]  }
   0x1   :  { %5832 = sst [smem:[#allocation29_spill]] %s5789_s0 }
   0x2   :  { %5833 = sst [smem:[#allocation30_spill]] %s5790_s1 }
   0x3   :  { %5834 = sst [smem:[#allocation31_spill]] %s5791_s2 }
   0x4   :  { %5835 = sst [smem:[#allocation32_spill]] %s5792_s3 }
   0x5   :  { %5836 = sst [smem:[#allocation33_spill]] %s5793_s4 }
   0x6   :  { %5837 = sst [smem:[#allocation34_spill]] %s5794_s5 }
   0x7   :  { %5838 = sst [smem:[#allocation35_spill]] %s5795_s6 }
   0x8   :  { %5839 = sst [smem:[#allocation36_spill]] %s5796_s7 }
   0x9   :  { %5840 = sst [smem:[#allocation37_spill]] %s5797_s8 }
   0xa   :  { %5841 = sst [smem:[#allocation38_spill]] %s5798_s9 }
   0xb   :  { %5842 = sst [smem:[#allocation39_spill]] %s5800_s11 }
   0xc   :  { %5843 = sst [smem:[#allocation40_spill]] %s5801_s12 }
   0xd   :  { %5844 = sst [smem:[#allocation41_spill]] %s5802_s13 }
   0xe   :  { %5845 = sst [smem:[#allocation42_spill]] %s5803_s14 }
   0xf   :  { %5846 = sst [smem:[#allocation43_spill]] %s5805_s16 }
  0x10   :  { %5847 = sst [smem:[#allocation44_spill]] %s5807_s18 }
  0x11   :  { %23 = vsyncpa [#allocation8], 0 }
  0x12   :  { %25 = vsyncpa [#allocation8 + $0x1], 0 }
  0x13   :  { %26 = vsyncpa [#allocation11], 0 }
  0x14   :  { %28 = vsyncpa [#allocation11 + $0x1], 0 }
  0x15   :  { %29 = vsyncpa [#allocation14], 0 }
  0x16   :  { %30 = vsyncpa [#allocation17], 0 }
  0x17   :  { %31 = vsyncpa [#allocation9], 0  ;;  %s4932_s27 = smov 0   ;;  %s4934_s28 = smov 0  }
  0x18   :  { %s4936_s29 = smov 0   ;;  %s4938_s30 = smov 0  }
  0x19 LB: > { %5848 = sst [smem:[#allocation25_spill]] %s4804_s29  ;;  %s4951_s0 = sadd.s32 4294967295, %s4808_s30   ;;  %s4808_s30 = sphi %s4938_s30, %s5902_s30   ;;  %s4804_s29 = sphi %s4936_s29, %s5904_s29   ;;  %s4800_s28 = sphi %s4934_s28, %s5906_s28   ;;  %s4796_s27 = sphi %s4932_s27, %s5905_s27  }
  0x1a   : > { %5849 = sst [smem:[#allocation26_spill]] %s4951_s0  ;;  %p163_p0 = scmp.ne.s32.totalorder %s4800_s28, %s4796_s27 }
  0x1b   : > { %p5811_p1 = scmp.eq.s32.totalorder %s4951_s0, 0  ;;  %p3640_p2 = scmp.ge.s32.totalorder %s4808_s30, 1 }
  0x1c   : > { %p549_p3 = scmp.lt.s32.totalorder %s4808_s30, 8  ;;  %s4810_s20 = smov [#allocation13]  }
  0x1d   : > { %p4960_p5 = por %p5811_p1, %p163_p0  ;;  %s567_s21 = sshll.u32 %s4810_s20, 4  ;;  %s568_s21 = int_to_ptr.vmem [resolvable:$true] %s567_s21 }
  0x1e   : > { %p4964_p6 = pnand %p3640_p2, %p549_p3  ;;  %s4811_s2 = smov [#allocation16]  }
  0x1f   : > { %s5850_s19 = scalar_select %p4960_p5, 1, 0 }
  0x20   : > { %s5851_s1 = scalar_select %p4964_p6, 1, 0 }
  0x21   : > { %p4126_p7 = pneg %p4964_p6  ;;  %s591_s23 = sshll.u32 %s4811_s2, 4  ;;  %s4976_s23 = int_to_ptr.vmem [resolvable:$true] %s591_s23 }
  0x22   : > { %s5853_s14 = sld [smem:[#allocation42_spill]] }
  0x23   : > { %p4972_p8 = pnand %p4126_p7, %p5811_p1 }
  0x25   : > { %s5852_s22 = scalar_select %p4972_p8, 1, 0 }
  0x26   : > { %p4986_p10 = pneg %p4972_p8 }
  0x28   : > { %s4530_s26 = scalar_lea.hbm %s5853_s14, 2048 }
  0x29   : > { %p4531_p9 = scmp.ne.s32.totalorder %s5853_s14, %s4530_s26  ;;  %p4537_p13 = scmp.lt.u32.totalorder %s4530_s26, %s5853_s14 }
  0x2a   : > { %s5854_s20 = scalar_select %p4986_p10, 1, 0 }
  0x2b   : > { %p4533_p11 = pnand %p4986_p10, %p4531_p9 }
  0x2d   : > { %p4534_p12 = pneg %p4533_p11 }
  0x2f   : > { %p4539_p0 = pnand %p4537_p13, %p4534_p12 }
  0x31   : > { %4542 = shalt.err (!%p4539_p0)
}
  0x32   : > { %s4543_s24 = scalar_lea.vmem %s568_s21, 2048  ;;  %p4551_p4 = scmp.lt.s32.totalorder %s568_s21, %s568_s21 }
  0x33   : > { %p4544_p2 = scmp.ne.s32.totalorder %s568_s21, %s4543_s24  ;;  %p4552_p1 = scmp.lt.s32.totalorder %s4543_s24, %s4543_s24 }
  0x35   : > { %p4546_p3 = pnand %p4544_p2, %p4986_p10  ;;  %p4553_p5 = por %p4552_p1, %p4551_p4 }
  0x37   : > { %p4547_p7 = pneg %p4546_p3 }
  0x39   : > { %p4554_p6 = pnand %p4553_p5, %p4547_p7 }
  0x3b   : > { %4557 = shalt.err (!%p4554_p6)
}
  0x3c   : > { %s4812_s18 = smov 128   ;;  %s4813_s25 = smov 8  }
  0x3d   : > { %4129 = dma.hbm_to_vmem [thread:$0]  (!%p4972_p8), %s5853_s14, 2048, %s568_s21, [#allocation14], %s4812_s18, %s4812_s18, %s4813_s25  }
  0x3e   : > { %s5855_s16 = sld [smem:[#allocation43_spill]] }
  0x44   : > { %s4558_s12 = scalar_lea.hbm %s5855_s16, 8192 }
  0x45   : > { %p4559_p9 = scmp.ne.s32.totalorder %s5855_s16, %s4558_s12  ;;  %p4565_p5 = scmp.lt.u32.totalorder %s4558_s12, %s5855_s16 }
  0x47   : > { %p4561_p1 = pnand %p4559_p9, %p4986_p10 }
  0x49   : > { %p4562_p4 = pneg %p4561_p1 }
  0x4b   : > { %p4567_p6 = pnand %p4565_p5, %p4562_p4 }
  0x4d   : > { %4570 = shalt.err (!%p4567_p6)
}
  0x4e   : > { %s4571_s21 = scalar_lea.vmem %s4976_s23, 8192  ;;  %p4579_p0 = scmp.lt.s32.totalorder %s4976_s23, %s4976_s23 }
  0x4f   : > { %p4572_p11 = scmp.ne.s32.totalorder %s4976_s23, %s4571_s21  ;;  %p4580_p2 = scmp.lt.s32.totalorder %s4571_s21, %s4571_s21 }
  0x51   : > { %p4574_p12 = pnand %p4572_p11, %p4986_p10  ;;  %p4581_p3 = por %p4580_p2, %p4579_p0 }
  0x53   : > { %p4575_p13 = pneg %p4574_p12 }
  0x55   : > { %p4582_p7 = pnand %p4581_p3, %p4575_p13 }
  0x57   : > { %4585 = shalt.err (!%p4582_p7)
}
  0x58   : > { %s5814_s9 = smov 256   ;;  %s5815_s3 = smov 16  }
  0x59   : > { %4135 = dma.hbm_to_vmem [thread:$0]  (!%p4972_p8), %s5855_s16, 8192, %s4976_s23, [#allocation17], %s5814_s9, %s5814_s9, %s5815_s3  }
  0x5a   : > { %s5029_s18 = sadd.s32 1, %s4808_s30   ;;  %p143_p9 = scmp.lt.s32.totalorder %s4808_s30, 5 }
  0x5b   : > { %5856 = sst [smem:[#allocation27_spill]] %s5029_s18  ;;  %p145_p1 = scmp.lt.s32.totalorder %s5029_s18, 5 }
  0x5c   : > { %s150_s25 = sadd.s32 1, %s4804_s29  ;;  %p157_p4 = scmp.ne.s32.totalorder %s4804_s29, %s4800_s28 }
  0x5d   : > { %s5035_s13 = scalar_select %p143_p9, %s4808_s30, 5 }
  0x5e   : > { %s146_s26 = scalar_select %p145_p1, %s5029_s18, 5 }
  0x5f   : > { %p158_p5 = scmp.eq.s32.totalorder %s4808_s30, 0  ;;  %p4153_p6 = scmp.lt.s32.totalorder %s4808_s30, 7 }
  0x60   : > { %s147_s27 = ssub.s32 %s5035_s13, %s146_s26  ;;  %s5044_s23 = sand.u32 1, %s4804_s29  }
  0x61   : > { %p148_p11 = scmp.eq.s32.totalorder %s147_s27, 0  ;;  %p159_p12 = por %p158_p5, %p157_p4 }
  0x62   : > { %s692_s2 = sand.u32 1, %s4808_s30   ;;  %s5816_s11 = sshll.u32 %s5044_s23, 8 }
  0x63   : > { %s5048_s24 = scalar_select %p148_p11, %s4804_s29, %s150_s25  }
  0x64   : > { %p5050_p13 = pnand %p4153_p6, %p159_p12  ;;  %s5817_s12 = sshll.u32 %s5035_s13, 12 }
  0x65   : > { %5857 = sst [smem:[#allocation28_spill]] %s5048_s24  ;;  %s5859_s8 = sld [smem:[#allocation37_spill]] }
  0x66   : > { %s5858_s21 = scalar_select %p5050_p13, 1, 0 }
  0x67   : > { %s696_s30 = scalar_lea.vmem [#allocation10], %s5816_s11  ;;  %s5067_s3 = scalar_lea.sflag [#allocation11], %s692_s2 }
  0x68   : > { %s705_s25 = sshll.u32 %s696_s30, 4  ;;  %p5073_p2 = pneg %p5050_p13  ;;  %s5065_s25 = int_to_ptr.vmem [resolvable:$true] %s705_s25 }
  0x6a   : > { %s5860_s16 = scalar_select %p5073_p2, 1, 0 }
  0x6b   : > { %s5061_s27 = scalar_lea.hbm %s5859_s8, %s5817_s12  ;;  %s4591_s11 = scalar_lea.hbm %s5859_s8, 24576 }
  0x6c   : > { %s4586_s14 = scalar_lea.hbm %s5061_s27, 4096  ;;  %p4592_p9 = scmp.lt.u32.totalorder %s5061_s27, %s5859_s8 }
  0x6d   : > { %p4587_p0 = scmp.ne.s32.totalorder %s5061_s27, %s4586_s14  ;;  %p4593_p1 = scmp.lt.u32.totalorder %s4591_s11, %s4586_s14 }
  0x6e   : > { %p4595_p5 = scmp.lt.u32.totalorder %s4586_s14, %s5061_s27 }
  0x6f   : > { %p4589_p3 = pnand %p5073_p2, %p4587_p0  ;;  %p4594_p4 = por %p4593_p1, %p4592_p9 }
  0x71   : > { %p4590_p7 = pneg %p4589_p3  ;;  %p4596_p6 = por %p4595_p5, %p4594_p4 }
  0x73   : > { %p4597_p11 = pnand %p4596_p6, %p4590_p7 }
  0x75   : > { %4600 = shalt.err (!%p4597_p11)
}
  0x76   : > { %s4601_s2 = scalar_lea.vmem %s5065_s25, 4096  ;;  %s4816_s9 = smov [#allocation10]  }
  0x77   : > { %p4602_p12 = scmp.ne.s32.totalorder %s5065_s25, %s4601_s2  ;;  %s4606_s26 = sshll.u32 %s4816_s9, 4  ;;  %s4607_s26 = int_to_ptr.vmem [resolvable:$false] %s4606_s26 }
  0x78   : > { %s4608_s12 = scalar_lea.vmem %s4607_s26, 8192  ;;  %p4609_p8 = scmp.lt.s32.totalorder %s5065_s25, %s4607_s26 }
  0x79   : > { %p4604_p0 = pnand %p4602_p12, %p5073_p2  ;;  %p4610_p10 = scmp.lt.s32.totalorder %s4608_s12, %s4601_s2 }
  0x7b   : > { %p4605_p3 = pneg %p4604_p0  ;;  %p4611_p9 = por %p4610_p10, %p4609_p8 }
  0x7d   : > { %p4612_p1 = pnand %p4611_p9, %p4605_p3 }
  0x7f   : > { %4615 = shalt.err (!%p4612_p1)
}
  0x80   : > { %s5861_s14 = smov 16   ;;  %s5862_s11 = smov 256  }
  0x81   : > { %4145 = dma.hbm_to_vmem [thread:$0]  (!%p5050_p13), %s5061_s27, 4096, %s5065_s25, %s5067_s3, %s5862_s11, %s5862_s11, %s5861_s14  }
  0x82   : > { %s5863_s30 = sshll.u32 %s5035_s13, 12  ;;  %s5864_s26 = sshll.u32 %s5044_s23, 8 }
  0x83   : > { %s5105_s2 = scalar_lea.hbm %s5799_s10, %s5863_s30  ;;  %s730_s12 = scalar_lea.vmem [#allocation12], %s5864_s26 }
  0x84   : > { %s739_s24 = sshll.u32 %s730_s12, 4  ;;  %s4817_s29 = smov [#allocation15]   ;;  %s5109_s24 = int_to_ptr.vmem [resolvable:$true] %s739_s24 }
  0x85   : > { %s581_s18 = sshll.u32 %s4817_s29, 4  ;;  %s4818_s7 = smov [#allocation18]   ;;  %s582_s18 = int_to_ptr.vmem [resolvable:$true] %s581_s18 }
  0x86   : > { %s605_s6 = sshll.u32 %s4818_s7, 4  ;;  %s4616_s27 = scalar_lea.hbm %s5804_s15, 32  ;;  %s606_s6 = int_to_ptr.vmem [resolvable:$true] %s605_s6 }
  0x87   : > { %p4617_p8 = scmp.ne.s32.totalorder %s5804_s15, %s4616_s27  ;;  %p5865_p10 = scmp.ne.s32.totalorder %s5854_s20, 0 }
  0x88   : > { %p4623_p5 = scmp.lt.u32.totalorder %s4616_s27, %s5804_s15 }
  0x89   : > { %p4619_p7 = pnand %p4617_p8, %p5865_p10 }
  0x8b   : > { %p4620_p4 = pneg %p4619_p7 }
  0x8d   : > { %p4625_p6 = pnand %p4623_p5, %p4620_p4 }
  0x8f   : > { %4628 = shalt.err (!%p4625_p6)
}
  0x90   : > { %s4629_s29 = scalar_lea.vmem %s582_s18, 32  ;;  %p4637_p3 = scmp.lt.s32.totalorder %s582_s18, %s582_s18 }
  0x91   : > { %p4630_p11 = scmp.ne.s32.totalorder %s582_s18, %s4629_s29  ;;  %p4638_p9 = scmp.lt.s32.totalorder %s4629_s29, %s4629_s29 }
  0x93   : > { %p4632_p12 = pnand %p4630_p11, %p5865_p10  ;;  %p4639_p1 = por %p4638_p9, %p4637_p3 }
  0x95   : > { %p4633_p0 = pneg %p4632_p12 }
  0x97   : > { %p4640_p13 = pnand %p4639_p1, %p4633_p0 }
  0x99   : > { %4643 = shalt.err (!%p4640_p13)
}
  0x9a   : > { %p5866_p8 = scmp.ne.s32.totalorder %s5852_s22, 0  ;;  %s4644_s9 = scalar_lea.hbm %s5806_s17, 64 }
  0x9b   : > { %p4645_p7 = scmp.ne.s32.totalorder %s5806_s17, %s4644_s9  ;;  %p4651_p13 = scmp.lt.u32.totalorder %s4644_s9, %s5806_s17 }
  0x9c   : > { %4132 = dma.hbm_to_vmem [thread:$0]  (!%p5866_p8), %s5804_s15, 32, %s582_s18, [#allocation14]  }
  0x9d   : > { %p4647_p4 = pnand %p4645_p7, %p5865_p10 }
  0x9f   : > { %p4648_p5 = pneg %p4647_p4 }
  0xa1   : > { %p4653_p6 = pnand %p4651_p13, %p4648_p5 }
  0xa3   : > { %4656 = shalt.err (!%p4653_p6)
}
  0xa4   : > { %s4657_s14 = scalar_lea.vmem %s606_s6, 64  ;;  %p4665_p3 = scmp.lt.s32.totalorder %s606_s6, %s606_s6 }
  0xa5   : > { %p4658_p11 = scmp.ne.s32.totalorder %s606_s6, %s4657_s14  ;;  %p4666_p9 = scmp.lt.s32.totalorder %s4657_s14, %s4657_s14 }
  0xa7   : > { %p4660_p12 = pnand %p4658_p11, %p5865_p10  ;;  %p4667_p1 = por %p4666_p9, %p4665_p3 }
  0xa9   : > { %p4661_p0 = pneg %p4660_p12 }
  0xab   : > { %p4668_p2 = pnand %p4667_p1, %p4661_p0 }
  0xad   : > { %4671 = shalt.err (!%p4668_p2)
}
  0xae   : > { %4138 = dma.hbm_to_vmem [thread:$0]  (!%p5866_p8), %s5806_s17, 64, %s606_s6, [#allocation17]  }
  0xaf   : > { %s3646_s11 = sshll.u32 %s5044_s23, 6  ;;  %s3889_s29 = sshll.u32 %s5035_s13, 10 }
  0xb0   : > { %s5867_s4 = sld [smem:[#allocation33_spill]]  ;;  %s643_s22 = scalar_lea.vmem [#allocation7], %s3646_s11 }
  0xb1   : > { %s652_s0 = sshll.u32 %s643_s22, 4  ;;  %s640_s30 = scalar_lea.sflag [#allocation8], %s5044_s23  ;;  %s5154_s0 = int_to_ptr.vmem [resolvable:$true] %s652_s0 }
  0xb2   : > { %p5868_p10 = scmp.ne.s32.totalorder %s5860_s16, 0 }
  0xb6   : > { %s5152_s7 = scalar_lea.hbm %s5867_s4, %s3889_s29  ;;  %s4677_s26 = scalar_lea.hbm %s5867_s4, 6144 }
  0xb7   : > { %s4672_s9 = scalar_lea.hbm %s5152_s7, 1024  ;;  %p4678_p4 = scmp.lt.u32.totalorder %s5152_s7, %s5867_s4 }
  0xb8   : > { %p4673_p2 = scmp.ne.s32.totalorder %s5152_s7, %s4672_s9  ;;  %p4679_p5 = scmp.lt.u32.totalorder %s4677_s26, %s4672_s9 }
  0xb9   : > { %p4681_p6 = scmp.lt.u32.totalorder %s4672_s9, %s5152_s7 }
  0xba   : > { %p4675_p8 = pnand %p4673_p2, %p5868_p10  ;;  %p4680_p13 = por %p4679_p5, %p4678_p4 }
  0xbc   : > { %p4676_p7 = pneg %p4675_p8  ;;  %p4682_p11 = por %p4681_p6, %p4680_p13 }
  0xbe   : > { %p4683_p12 = pnand %p4682_p11, %p4676_p7 }
  0xc0   : > { %4686 = shalt.err (!%p4683_p12)
}
  0xc1   : > { %s4687_s25 = scalar_lea.vmem %s5154_s0, 1024  ;;  %s4819_s14 = smov [#allocation7]  }
  0xc2   : > { %p4688_p0 = scmp.ne.s32.totalorder %s5154_s0, %s4687_s25  ;;  %s4692_s18 = sshll.u32 %s4819_s14, 4  ;;  %s4693_s18 = int_to_ptr.vmem [resolvable:$false] %s4692_s18 }
  0xc3   : > { %s4694_s8 = scalar_lea.vmem %s4693_s18, 2048  ;;  %p4695_p1 = scmp.lt.s32.totalorder %s5154_s0, %s4693_s18 }
  0xc4   : > { %p4690_p3 = pnand %p4688_p0, %p5868_p10  ;;  %p4696_p2 = scmp.lt.s32.totalorder %s4694_s8, %s4687_s25 }
  0xc6   : > { %p4691_p9 = pneg %p4690_p3  ;;  %p4697_p8 = por %p4696_p2, %p4695_p1 }
  0xc8   : > { %p4698_p4 = pnand %p4697_p8, %p4691_p9 }
  0xca   : > { %4701 = shalt.err (!%p4698_p4)
}
  0xcb   : > { %s4820_s11 = smov 64   ;;  %s4821_s29 = smov 4  }
  0xcc   : > { %p5869_p7 = scmp.ne.s32.totalorder %s5858_s21, 0  ;;  %s4702_s20 = scalar_lea.hbm %s5105_s2, 4096 }
  0xcd   : > { %p4703_p5 = scmp.ne.s32.totalorder %s5105_s2, %s4702_s20  ;;  %s4707_s9 = scalar_lea.hbm %s5799_s10, 24576 }
  0xce   : > { %4142 = dma.hbm_to_vmem [thread:$0]  (!%p5869_p7), %s5152_s7, 1024, %s5154_s0, %s640_s30, %s4820_s11, %s4820_s11, %s4821_s29  }
  0xcf   : > { %p4705_p13 = pnand %p4703_p5, %p5868_p10  ;;  %p4708_p11 = scmp.lt.u32.totalorder %s5105_s2, %s5799_s10 }
  0xd0   : > { %p4709_p12 = scmp.lt.u32.totalorder %s4707_s9, %s4702_s20  ;;  %p4711_p3 = scmp.lt.u32.totalorder %s4702_s20, %s5105_s2 }
  0xd1   : > { %p4706_p6 = pneg %p4705_p13 }
  0xd2   : > { %p4710_p0 = por %p4709_p12, %p4708_p11 }
  0xd4   : > { %p4712_p9 = por %p4711_p3, %p4710_p0 }
  0xd6   : > { %p4713_p1 = pnand %p4712_p9, %p4706_p6 }
  0xd8   : > { %4716 = shalt.err (!%p4713_p1)
}
  0xd9   : > { %s4717_s23 = scalar_lea.vmem %s5109_s24, 4096  ;;  %s4822_s7 = smov [#allocation12]  }
  0xda   : > { %p4718_p2 = scmp.ne.s32.totalorder %s5109_s24, %s4717_s23  ;;  %s4722_s0 = sshll.u32 %s4822_s7, 4  ;;  %s4723_s0 = int_to_ptr.vmem [resolvable:$false] %s4722_s0 }
  0xdb   : > { %s4724_s30 = scalar_lea.vmem %s4723_s0, 8192  ;;  %p4725_p5 = scmp.lt.s32.totalorder %s5109_s24, %s4723_s0 }
  0xdc   : > { %p4720_p8 = pnand %p4718_p2, %p5868_p10  ;;  %p4726_p13 = scmp.lt.s32.totalorder %s4724_s30, %s4717_s23 }
  0xde   : > { %p4721_p4 = pneg %p4720_p8  ;;  %p4727_p11 = por %p4726_p13, %p4725_p5 }
  0xe0   : > { %p4728_p12 = pnand %p4727_p11, %p4721_p4 }
  0xe2   : > { %4731 = shalt.err (!%p4728_p12)
}
  0xe3   : > { %4148 = dma.hbm_to_vmem [thread:$0]  (!%p5869_p7), %s5105_s2, 4096, %s5109_s24, %s5067_s3, %s4820_s11, %s4820_s11, %s4821_s29  }
  0xe4   : > { %p5870_p10 = scmp.ne.s32.totalorder %s5851_s1, 0 }
  0xe5   : > { %s783_s16 = sand.u32 (!%p5870_p10), 1, %s4800_s28   ;;  %p5871_p6 = scmp.ne.s32.totalorder (!%p5870_p10), %s5850_s19, 0 }
  0xe6   : > { %781 = sbr.rel (%p5870_p10) target bundleno = 3435 (0xd6b), region = 92  ;;  %s3656_s26 = sshll.u32 (!%p5870_p10), %s783_s16, 6 }
  0xe7   : > { %s784_s12 = scalar_lea.sflag (!%p5870_p10), [#allocation8], %s783_s16  ;;  %s5211_s27 = scalar_lea.vmem (!%p5870_p10), [#allocation7], %s3656_s26 }
  0xed   : > { %4775 = dma.done.wait (%p5871_p6), %s784_s12, 1024  }
  0xee   : > { %4777 = vsyncadd (%p5871_p6), %s784_s12, 4294966272  ;;  %s5872_s21 = sld [smem:[#allocation26_spill]]  ;;  %s3657_s14 = sshll.u32 %s783_s16, 8 }
  0xef   : > { %s5218_s24 = scalar_lea.vmem [#allocation10], %s3657_s14 }
  0xf4   : > { %s792_s25 = sand.u32 1, %s5872_s21  }
  0xf5   : > { %s793_s3 = scalar_lea.sflag [#allocation11], %s792_s25 }
  0xf6   : > { %4779 = dma.done.wait (%p5871_p6), %s793_s3, 8192  }
  0xf7   : > { %4781 = vsyncadd (%p5871_p6), %s793_s3, 4294959104  ;;  %s5224_s1 = scalar_lea.vmem [#allocation12], %s3657_s14  ;;  %p5873_p7 = scmp.eq.s32.totalorder %s5872_s21, 0 }
  0xf9   : > { %4783 = dma.done.wait (%p5873_p7), [#allocation14], 2080   ;;  %p5874_p0 = pmov %p5873_p7 }
  0xfb   : > { %4785 = vsyncadd (%p5874_p0), [#allocation14], 4294965216  ;;  %p5875_p3 = pmov %p5874_p0 }
  0xfc   : > { %p5876_p9 = pmov %p5874_p0 }
  0xfd   : > { %4787 = dma.done.wait (%p5875_p3), [#allocation17], 8256  }
  0xfe   : > { %4789 = vsyncadd (%p5876_p9), [#allocation17], 4294959040  ;;  %p928_p1 = scmp.lt.s32.totalorder %s5872_s21, 5  ;;  %s5879_s7 = sld [smem:[#allocation31_spill]] }
  0xff   : > { %s5881_s3 = sld [smem:[#allocation32_spill]]  ;;  %s5882_s29 = sld [smem:[#allocation38_spill]] }
 0x100   : > { %s929_s2 = scalar_select %p928_p1, %s5872_s21, 5 }
 0x101   : > { %s5883_s13 = sld [smem:[#allocation39_spill]]  ;;  %s5884_s6 = sld [smem:[#allocation40_spill]] }
 0x102   : > { %s5908_s2 = smov (!%p928_p1, %s929_s2), 5  ;;  %s5885_s12 = sld [smem:[#allocation41_spill]] }
 0x103   : > { %s4098_s19 = smul.u32 192, %s5908_s2  ;;  %s3682_s18 = sshll.u32 %s5908_s2, 2 }
 0x104   : > { %s4099_s20 = smul.u32 3, %s5908_s2  ;;  %p5886_p2 = scmp.ne.s32.totalorder %s5872_s21, 0 }
 0x105   : > { %s5251_s0 = scalar_lea.vmem %s5879_s7, %s4098_s19  ;;  %s5266_s5 = scalar_lea.vmem %s5882_s29, %s3682_s18 }
 0x106   : > { %s5260_s4 = scalar_lea.vmem %s5881_s3, %s4099_s20  ;;  %1005 = sbr.rel (%p5886_p2) target bundleno = 272 (0x110), region = 124 }
 0x107   : > { %s984_s19 = scalar_lea.vmem %s5883_s13, %s5908_s2  ;;  %s991_s30 = scalar_lea.vmem %s5884_s6, %s5908_s2 }
 0x108   : > { %s998_s25 = scalar_lea.vmem %s5885_s12, %s5908_s2  ;;  %s5887_s3 = sld [smem:[#allocation29_spill]] (!%p5886_p2) }
 0x10e   : > { %v1006_v0 = vld [vmem:[%s5887_s3] sm:$0xff]  ;;  %v1007_v1 = vld [vmem:[%s5887_s3 + $0x8] sm:$0xff] }
 0x10f   : > { %1008 = vst [vmem:[#allocation2] sm:$0xff] %v1006_v0  ;;  %1009 = vst [vmem:[#allocation2 + $0x8] sm:$0xff] %v1007_v1 }
 0x110 PF: > { %s5888_s8 = sld [smem:[#allocation26_spill]] }
 0x116   : > { %p3693_p8 = scmp.ge.s32.totalorder %s5888_s8, 6 }
 0x117   : > { %v4216_v2 = vld [vmem:[%s5251_s0 + $0x4] ss:$12 sps:$4 sm:$0xff] (!%p3693_p8)   ;;  %v4218_v3 = vld [vmem:[%s5251_s0] ss:$12 sps:$4 sm:$0xff] (!%p3693_p8)   ;;  %v4823_v4 = vmov (!%p3693_p8), 0   ;;  %v4824_v23 = vmov (!%p3693_p8), 0.0   ;;  %v1051_v29 = vlaneseq (!%p3693_p8) }
 0x118   : > { %1013 = sbr.rel (%p3693_p8) target bundleno = 2920 (0xb68), region = 128  ;;  %1226 = vmatprep.mubr.bf16.mxu0 (!%p3693_p8), %v4823_v4  ;;  %1194 = vmatprep.subr.bf16.mxu0 (!%p3693_p8), %v4216_v2  ;;  %v4219_v5 = vld [vmem:[%s5251_s0 + $0x1c] ss:$12 sps:$4 sm:$0xff] (!%p3693_p8)   ;;  %v4221_v6 = vld [vmem:[%s5251_s0 + $0x18] ss:$12 sps:$4 sm:$0xff] (!%p3693_p8)   ;;  %vm1279_vm0 = vcmask (!%p3693_p8), 130048  }
 0x119   : > { %1195 = vmatpush1.bf16.msra.mxu0 (!%p3693_p8), %v4218_v3  ;;  %v4222_v7 = vld [vmem:[%s5251_s0 + $0x34] ss:$12 sps:$4 sm:$0xff] (!%p3693_p8)   ;;  %v4224_v8 = vld [vmem:[%s5251_s0 + $0x30] ss:$12 sps:$4 sm:$0xff] (!%p3693_p8)   ;;  %v4225_v9 = vld [vmem:[%s5251_s0 + $0x4c] ss:$12 sps:$4 sm:$0xff] (!%p3693_p8)   ;;  %3986 = vmatprep.subr.bf16.mxu1 (!%p3693_p8), %v4824_v23 }
 0x11a   : > { %1196 = vmatprep.subr.bf16.mxu0 (!%p3693_p8), %v4219_v5  ;;  %v4227_v10 = vld [vmem:[%s5251_s0 + $0x48] ss:$12 sps:$4 sm:$0xff] (!%p3693_p8)   ;;  %v4228_v11 = vld [vmem:[%s5251_s0 + $0x64] ss:$12 sps:$4 sm:$0xff] (!%p3693_p8)   ;;  %v4230_v12 = vld [vmem:[%s5251_s0 + $0x60] ss:$12 sps:$4 sm:$0xff] (!%p3693_p8)  }
 0x11b   : > { %v4231_v13 = vld [vmem:[%s5251_s0 + $0x7c] ss:$12 sps:$4 sm:$0xff] (!%p3693_p8)   ;;  %v4233_v14 = vld [vmem:[%s5251_s0 + $0x78] ss:$12 sps:$4 sm:$0xff] (!%p3693_p8)   ;;  %v4234_v15 = vld [vmem:[%s5251_s0 + $0x94] ss:$12 sps:$4 sm:$0xff] (!%p3693_p8)  }
 0x11c   : > { %v4236_v16 = vld [vmem:[%s5251_s0 + $0x90] ss:$12 sps:$4 sm:$0xff] (!%p3693_p8)   ;;  %v4237_v17 = vld [vmem:[%s5251_s0 + $0xac] ss:$12 sps:$4 sm:$0xff] (!%p3693_p8)   ;;  %v4239_v18 = vld [vmem:[%s5251_s0 + $0xa8] ss:$12 sps:$4 sm:$0xff] (!%p3693_p8)  }
 0x11d   : > { %1197 = vmatpush1.bf16.msra.mxu0 (!%p3693_p8), %v4221_v6  ;;  %v1014_v19 = vld [vmem:[#allocation2] sm:$0xff] (!%p3693_p8)  ;;  %v1015_v20 = vld [vmem:[#allocation2 + $0x8] sm:$0xff] (!%p3693_p8)  ;;  %v4243_v26 = vld [vmem:[%s5251_s0 + $0x50] ss:$12 sps:$4 sm:$0xff] (!%p3693_p8)   ;;  %v5319_v30 = vshrl.u32 (!%p3693_p8), %v1051_v29, 7  ;;  %vm4825_vm1 = vmmov (!%p3693_p8), 0  }
 0x11e   : > { %1198 = vmatprep.subr.bf16.mxu0 (!%p3693_p8), %v4222_v7  ;;  %v1016_v21 = vpack.c.bf16 (!%p3693_p8), %v1015_v20, %v1014_v19  ;;  %v4240_v22 = vld [vmem:[%s5251_s0 + $0x8] ss:$12 sps:$4 sm:$0xff] (!%p3693_p8)   ;;  %v4241_v24 = vld [vmem:[%s5251_s0 + $0x20] ss:$12 sps:$4 sm:$0xff] (!%p3693_p8)   ;;  %v4242_v25 = vld [vmem:[%s5251_s0 + $0x38] ss:$12 sps:$4 sm:$0xff] (!%p3693_p8)   ;;  %4002 = vmatprep.mubr.msk.bf16.mxu1 (!%p3693_p8), %vm4825_vm1, %v4824_v23 }
 0x11f   : > { %3987 = vmatpush3.bf16.msra.mxu1 %v4240_v22  ;;  %v4244_v27 = vld [vmem:[%s5251_s0 + $0x68] ss:$12 sps:$4 sm:$0xff]   ;;  %v4245_v28 = vld [vmem:[%s5251_s0 + $0x80] ss:$12 sps:$4 sm:$0xff]   ;;  %v1053_v31 = vsub.s32 0, %v5319_v30  ;;  %v1057_v34 = vsub.s32 1, %v5319_v30 }
 0x120   : > { %3988 = vmatprep.subr.bf16.mxu1 %v4824_v23  ;;  %v4246_v32 = vld [vmem:[%s5251_s0 + $0x98] ss:$12 sps:$4 sm:$0xff]   ;;  %v5324_v33 = vld [vmem:[%s5260_s4] sm:$0x7]  ;;  %v4247_v36 = vld [vmem:[%s5251_s0 + $0xb0] ss:$12 sps:$4 sm:$0xff]  }
 0x121   : > { %1199 = vmatpush1.bf16.msra.mxu0 %v4224_v8  ;;  %v1054_v35 = vrot.slane %v5324_v33, %v1053_v31  ;;  %v1058_v38 = vrot.slane %v5324_v33, %v1057_v34  ;;  %s4826_s4 = smov 80   ;;  %s4827_s21 = smov 112   ;;  %v1061_v22 = vsub.s32 2, %v5319_v30  ;;  %vm1816_vm2 = vcmask 261248  }
 0x122   : > { %1200 = vmatprep.subr.bf16.mxu0 %v4225_v9  ;;  %s4828_s6 = smov 64   ;;  %s4829_s0 = smov 96   ;;  %vm1827_vm3 = vcmask 392448   ;;  %vm1838_vm4 = vcmask 523648   ;;  %vm1849_vm5 = vcmask 654848   ;;  %vm1860_vm6 = vcmask 786048  }
 0x123   : > { %3989 = vmatpush3.bf16.msra.mxu1 %v4241_v24  ;;  %s4830_s12 = smov 32   ;;  %s4831_s11 = smov 48   ;;  %vm1871_vm7 = vcmask 917248   ;;  %vm1882_vm8 = vcmask 1048448  }
 0x124   : > { %3990 = vmatprep.subr.bf16.mxu1 %v4824_v23  ;;  %s4832_s22 = smov 16   ;;  %s5889_s23 = sld [smem:[#allocation30_spill]] }
 0x125   : > { %1201 = vmatpush1.bf16.msra.mxu0 %v4227_v10  ;;  %s5894_s16 = sld [smem:[#allocation36_spill]] }
 0x126   : > { %1202 = vmatprep.subr.bf16.mxu0 %v4228_v11 }
 0x127   : > { %3991 = vmatpush3.bf16.msra.mxu1 %v4242_v25  ;;  %v1062_v25 = vrot.slane %v5324_v33, %v1061_v22 }
 0x128   : > { %3992 = vmatprep.subr.bf16.mxu1 %v4824_v23 }
 0x129   : > { %1203 = vmatpush1.bf16.msra.mxu0 %v4230_v12 }
 0x12a   : > { %1204 = vmatprep.subr.bf16.mxu0 %v4231_v13 }
 0x12b   : > { %3993 = vmatpush3.bf16.msra.mxu1 %v4243_v26  ;;  %s5895_s26 = scalar_lea.vmem %s5894_s16, %s5908_s2 }
 0x12c   : > { %3994 = vmatprep.subr.bf16.mxu1 %v4824_v23 }
 0x12d   : > { %1205 = vmatpush1.bf16.msra.mxu0 %v4233_v14 }
 0x12e   : > { %1206 = vmatprep.subr.bf16.mxu0 %v4234_v15 }
 0x12f   : > { %3995 = vmatpush3.bf16.msra.mxu1 %v4244_v27 }
 0x130   : > { %3996 = vmatprep.subr.bf16.mxu1 %v4824_v23 }
 0x131   : > { %1207 = vmatpush1.bf16.msra.mxu0 %v4236_v16 }
 0x132   : > { %1208 = vmatprep.subr.bf16.mxu0 %v4237_v17 }
 0x133   : > { %3997 = vmatpush3.bf16.msra.mxu1 %v4245_v28 }
 0x134   : > { %3998 = vmatprep.subr.bf16.mxu1 %v4824_v23 }
 0x135   : > { %1209 = vmatpush1.bf16.msra.mxu0 %v4239_v18 }
 0x137   : > { %3999 = vmatpush3.bf16.msra.mxu1 %v4246_v32 }
 0x138   : > { %1227 = vmatmul.mubr.bf16.vlgmr.msra.gmra.mrb[0].mxu0 %v1016_v21  ;;  %4000 = vmatprep.subr.bf16.mxu1 %v4824_v23 }
 0x13b   : > { %4001 = vmatpush3.bf16.msra.mxu1 %v4247_v36 }
 0x13e   : > { %4003 = vmatmul.mubr.bf16.vlgmr.msra.gmra.mrb[0].mxu1 %v1016_v21 }
 0x20b   : > { %v1228_v37 = vpop.f32.mrb[0].mxu0 }
 0x20c   : > { %v1230_v39 = vpop.f32.mrb[1].mxu0  ;;  %v1229_v41 = vadd.f32 %v1228_v37, %v1054_v35 }
 0x20d   : > { %v1232_v40 = vpop.f32.mrb[2].mxu0  ;;  %v1231_v44 = vadd.f32 %v1230_v39, %v1058_v38 }
 0x20e   : > { %v1233_v42 = vadd.f32 %v1232_v40, %v1054_v35  ;;  %v1234_v43 = vpop.f32.mrb[3].mxu0 }
 0x20f   : > { %v1235_v45 = vadd.f32 %v1234_v43, %v1058_v38 }
 0x210   : > { %v1278_v46 = vpack.c.bf16 %v1233_v42, %v1229_v41 }
 0x211   : > { %v1281_v47 = vpack.c.bf16 %v1235_v45, %v1231_v44  ;;  %v1271_v26 = vpop.f32.mrb[0].mxu1  ;;  %v1390_v45 = vld [vmem:[%s5889_s23 + $0x10] sm:$0xff] }
 0x212   : > { %1280 = vst.msk [vmem:[#allocation3] sm:$0xff] %vm1279_vm0, %v1278_v46  ;;  %v1272_v27 = vadd.f32 %v1271_v26, %v1062_v25  ;;  %v4004_v28 = vpop.f32.mrb[1].mxu1 }
 0x213   : > { %1282 = vst.msk [vmem:[#allocation4] sm:$0xff] %vm1279_vm0, %v1281_v47  ;;  %1316 = vrot.lane.b32.xlu1 %v1281_v47, %s4826_s4  ;;  %1291 = vrot.lane.b32.xlu0 %v1281_v47, %s4827_s21  ;;  %v1274_v29 = vpop.f32.mrb[2].mxu1 }
 0x214   : > { %v1275_v32 = vadd.f32 %v1274_v29, %v1062_v25  ;;  %v4005_v35 = vpop.f32.mrb[3].mxu1  ;;  %v1403_v25 = vld [vmem:[%s5889_s23 + $0x78] sm:$0xff] }
 0x216   : > { %v5396_v36 = vpack.c.bf16 %v1275_v32, %v1272_v27  ;;  %v1401_v32 = vld [vmem:[%s5889_s23 + $0x68] sm:$0xff] }
 0x217   : > { %1328 = vrot.lane.b32.xlu1 %v1281_v47, %s4828_s6  ;;  %1304 = vrot.lane.b32.xlu0 %v1281_v47, %s4829_s0 }
 0x218   : > { %1284 = vst.msk [vmem:[#allocation5] sm:$0xff] %vm1279_vm0, %v5396_v36 }
 0x219   : > { %v1372_v48 = vld [vmem:[#allocation3] sm:$0xff] }
 0x21a   : > { %4022 = vmatprep.mubr.msk.bf16.mxu0 %vm1279_vm0, %v1372_v48  ;;  %v1380_v49 = vld [vmem:[#allocation4] sm:$0xff] }
 0x21b   : > { %1352 = vrot.lane.b32.xlu1 %v1281_v47, %s4830_s12  ;;  %1340 = vrot.lane.b32.xlu0 %v1281_v47, %s4831_s11  ;;  %v1429_v50 = vsel %vm1279_vm0, %v1380_v49, 0 }
 0x21c   : > { %4090 = vmatprep.subr.msk.bf16.mxu0 %vm1279_vm0, %v1380_v49  ;;  %v1389_v49 = vld [vmem:[%s5889_s23 + $0x8] sm:$0xff] }
 0x21d   : > { %4007 = vmatpush3.bf16.xpose.msra.mxu0 %v1429_v50  ;;  %v1388_v50 = vld [vmem:[%s5889_s23] sm:$0xff] }
 0x21f   : > { %1364 = vrot.lane.b32.xlu0 %v1281_v47, %s4832_s22  ;;  %1286 = vrot.lane.b32.xlu1 %v1278_v46, %s4827_s21  ;;  %v1701_v33 = vld [vmem:[#allocation5] sm:$0xff] }
 0x220   : > { %4038 = vmatprep.subr.bf16.mxu1 %v1701_v33 }
 0x221   : > { %4039 = vmatpush3.bf16.msra.mxu1 %v1701_v33 }
 0x223   : > { %1300 = vrot.lane.b32.xlu0 %v1278_v46, %s4829_s0  ;;  %1312 = vrot.lane.b32.xlu1 %v1278_v46, %s4826_s4 }
 0x227   : > { %1324 = vrot.lane.b32.xlu0 %v1278_v46, %s4828_s6  ;;  %1336 = vrot.lane.b32.xlu1 %v1278_v46, %s4831_s11 }
 0x22b   : > { %1348 = vrot.lane.b32.xlu0 %v1278_v46, %s4830_s12  ;;  %1360 = vrot.lane.b32.xlu1 %v1278_v46, %s4832_s22 }
 0x22f   : > { %1296 = vrot.lane.b32.xlu1 %v5396_v36, %s4827_s21  ;;  %1308 = vrot.lane.b32.xlu0 %v5396_v36, %s4829_s0 }
 0x233   : > { %1320 = vrot.lane.b32.xlu1 %v5396_v36, %s4826_s4  ;;  %1332 = vrot.lane.b32.xlu0 %v5396_v36, %s4828_s6 }
 0x285   : > { %v1317_v51 = vpop.permute.xlu1 %1316  ;;  %v1292_v52 = vpop.permute.xlu0 %1291 }
 0x286   : > { %1319 = vst.msk [vmem:[#allocation4 + $0x18] sm:$0xff] %vm1279_vm0, %v1317_v51  ;;  %1294 = vst.msk [vmem:[#allocation4 + $0x8] sm:$0xff] %vm1279_vm0, %v1292_v52 }
 0x289   : > { %v1329_v53 = vpop.permute.xlu1 %1328  ;;  %v1305_v54 = vpop.permute.xlu0 %1304 }
 0x28a   : > { %1331 = vst.msk [vmem:[#allocation4 + $0x20] sm:$0xff] %vm1279_vm0, %v1329_v53  ;;  %1307 = vst.msk [vmem:[#allocation4 + $0x10] sm:$0xff] %vm1279_vm0, %v1305_v54 }
 0x28d   : > { %v1353_v55 = vpop.permute.xlu1 %1352  ;;  %v1341_v56 = vpop.permute.xlu0 %1340  ;;  %v1381_v57 = vld [vmem:[#allocation4 + $0x8] sm:$0xff]  ;;  %v1383_v1 = vld [vmem:[#allocation4 + $0x18] sm:$0xff] }
 0x28e   : > { %1355 = vst.msk [vmem:[#allocation4 + $0x30] sm:$0xff] %vm1279_vm0, %v1353_v55  ;;  %1343 = vst.msk [vmem:[#allocation4 + $0x28] sm:$0xff] %vm1279_vm0, %v1341_v56  ;;  %4091 = vmatprep.subr.msk.bf16.mxu0 %vm1279_vm0, %v1381_v57  ;;  %v1432_v58 = vsel %vm1279_vm0, %v1381_v57, 0  ;;  %v1438_v7 = vsel %vm1279_vm0, %v1383_v1, 0  ;;  %v1391_v55 = vld [vmem:[%s5889_s23 + $0x18] sm:$0xff]  ;;  %v1394_v56 = vld [vmem:[%s5889_s23 + $0x30] sm:$0xff] }
 0x28f   : > { %4009 = vmatpush3.bf16.xpose.msra.mxu0 %v1432_v58 }
 0x291   : > { %v1365_v59 = vpop.permute.xlu0 %1364  ;;  %v1287_v60 = vpop.permute.xlu1 %1286  ;;  %v1382_v61 = vld [vmem:[#allocation4 + $0x10] sm:$0xff]  ;;  %v1384_v8 = vld [vmem:[#allocation4 + $0x20] sm:$0xff] }
 0x292   : > { %1367 = vst.msk [vmem:[#allocation4 + $0x38] sm:$0xff] %vm1279_vm0, %v1365_v59  ;;  %1289 = vst.msk [vmem:[#allocation3 + $0x8] sm:$0xff] %vm1279_vm0, %v1287_v60  ;;  %4092 = vmatprep.subr.msk.bf16.mxu0 %vm1279_vm0, %v1382_v61  ;;  %v1435_v0 = vsel %vm1279_vm0, %v1382_v61, 0  ;;  %v1441_v9 = vsel %vm1279_vm0, %v1384_v8, 0  ;;  %v1392_v61 = vld [vmem:[%s5889_s23 + $0x20] sm:$0xff] }
 0x295   : > { %v1301_v62 = vpop.permute.xlu0 %1300  ;;  %v1313_v63 = vpop.permute.xlu1 %1312  ;;  %v1385_v10 = vld [vmem:[#allocation4 + $0x28] sm:$0xff]  ;;  %v1386_v12 = vld [vmem:[#allocation4 + $0x30] sm:$0xff] }
 0x296   : > { %1303 = vst.msk [vmem:[#allocation3 + $0x10] sm:$0xff] %vm1279_vm0, %v1301_v62  ;;  %1315 = vst.msk [vmem:[#allocation3 + $0x18] sm:$0xff] %vm1279_vm0, %v1313_v63  ;;  %v1444_v11 = vsel %vm1279_vm0, %v1385_v10, 0  ;;  %v1447_v13 = vsel %vm1279_vm0, %v1386_v12, 0  ;;  %v1395_v62 = vld [vmem:[%s5889_s23 + $0x38] sm:$0xff] }
 0x297   : > { %4011 = vmatpush3.bf16.xpose.msra.mxu0 %v1435_v0 }
 0x298   : > { %4093 = vmatprep.subr.msk.bf16.mxu0 %vm1279_vm0, %v1383_v1 }
 0x299   : > { %v1325_v2 = vpop.permute.xlu0 %1324  ;;  %v1337_v3 = vpop.permute.xlu1 %1336  ;;  %v1387_v14 = vld [vmem:[#allocation4 + $0x38] sm:$0xff]  ;;  %v1373_v16 = vld [vmem:[#allocation3 + $0x8] sm:$0xff] }
 0x29a   : > { %1327 = vst.msk [vmem:[#allocation3 + $0x20] sm:$0xff] %vm1279_vm0, %v1325_v2  ;;  %1339 = vst.msk [vmem:[#allocation3 + $0x28] sm:$0xff] %vm1279_vm0, %v1337_v3  ;;  %v1450_v15 = vsel %vm1279_vm0, %v1387_v14, 0  ;;  %v1393_v3 = vld [vmem:[%s5889_s23 + $0x28] sm:$0xff] }
 0x29d   : > { %v1349_v5 = vpop.permute.xlu0 %1348  ;;  %v1361_v6 = vpop.permute.xlu1 %1360  ;;  %v1374_v17 = vld [vmem:[#allocation3 + $0x10] sm:$0xff]  ;;  %v1375_v18 = vld [vmem:[#allocation3 + $0x18] sm:$0xff] }
 0x29e   : > { %1351 = vst.msk [vmem:[#allocation3 + $0x30] sm:$0xff] %vm1279_vm0, %v1349_v5  ;;  %1363 = vst.msk [vmem:[#allocation3 + $0x38] sm:$0xff] %vm1279_vm0, %v1361_v6  ;;  %v1398_v5 = vld [vmem:[%s5889_s23 + $0x50] sm:$0xff] }
 0x29f   : > { %4013 = vmatpush3.bf16.xpose.msra.mxu0 %v1438_v7 }
 0x2a0   : > { %4094 = vmatprep.subr.msk.bf16.mxu0 %vm1279_vm0, %v1384_v8 }
 0x2a1   : > { %v1376_v19 = vld [vmem:[#allocation3 + $0x20] sm:$0xff]  ;;  %v1377_v20 = vld [vmem:[#allocation3 + $0x28] sm:$0xff]  ;;  %v1297_v37 = vpop.permute.xlu1 %1296  ;;  %v1309_v38 = vpop.permute.xlu0 %1308 }
 0x2a2   : > { %1299 = vst.msk [vmem:[#allocation5 + $0x8] sm:$0xff] %vm1279_vm0, %v1297_v37  ;;  %1311 = vst.msk [vmem:[#allocation5 + $0x10] sm:$0xff] %vm1279_vm0, %v1309_v38 }
 0x2a5   : > { %v1378_v21 = vld [vmem:[#allocation3 + $0x30] sm:$0xff]  ;;  %v1379_v24 = vld [vmem:[#allocation3 + $0x38] sm:$0xff]  ;;  %v1321_v39 = vpop.permute.xlu1 %1320  ;;  %v1333_v40 = vpop.permute.xlu0 %1332 }
 0x2a6   : > { %1323 = vst.msk [vmem:[#allocation5 + $0x18] sm:$0xff] %vm1279_vm0, %v1321_v39  ;;  %1335 = vst.msk [vmem:[#allocation5 + $0x20] sm:$0xff] %vm1279_vm0, %v1333_v40 }
 0x2a7   : > { %4015 = vmatpush3.bf16.xpose.msra.mxu0 %v1441_v9 }
 0x2a8   : > { %4095 = vmatprep.subr.msk.bf16.mxu0 %vm1279_vm0, %v1385_v10  ;;  %v1396_v10 = vld [vmem:[%s5889_s23 + $0x40] sm:$0xff] }
 0x2a9   : > { %v1702_v41 = vld [vmem:[#allocation5 + $0x8] sm:$0xff]  ;;  %v1703_v42 = vld [vmem:[#allocation5 + $0x10] sm:$0xff] }
 0x2aa   : > { %4040 = vmatprep.subr.bf16.mxu1 %v1702_v41 }
 0x2ab   : > { %4041 = vmatpush3.bf16.msra.mxu1 %v1702_v41 }
 0x2ac   : > { %4042 = vmatprep.subr.bf16.mxu1 %v1703_v42 }
 0x2ad   : > { %v1704_v43 = vld [vmem:[#allocation5 + $0x18] sm:$0xff]  ;;  %v1705_v44 = vld [vmem:[#allocation5 + $0x20] sm:$0xff] }
 0x2af   : > { %4017 = vmatpush3.bf16.xpose.msra.mxu0 %v1444_v11  ;;  %4043 = vmatpush3.bf16.msra.mxu1 %v1703_v42  ;;  %v1399_v11 = vld [vmem:[%s5889_s23 + $0x58] sm:$0xff] }
 0x2b0   : > { %4096 = vmatprep.subr.msk.bf16.mxu0 %vm1279_vm0, %v1386_v12  ;;  %4044 = vmatprep.subr.bf16.mxu1 %v1704_v43 }
 0x2b3   : > { %4045 = vmatpush3.bf16.msra.mxu1 %v1704_v43 }
 0x2b4   : > { %4046 = vmatprep.subr.bf16.mxu1 %v1705_v44 }
 0x2b7   : > { %4019 = vmatpush3.bf16.xpose.msra.mxu0 %v1447_v13  ;;  %4047 = vmatpush3.bf16.msra.mxu1 %v1705_v44 }
 0x2b8   : > { %4097 = vmatprep.subr.msk.bf16.mxu0 %vm1279_vm0, %v1387_v14 }
 0x2bf   : > { %4021 = vmatpush3.bf16.xpose.msra.mxu0 %v1450_v15 }
 0x2c6   : > { %4023 = vmatmul.mubr.msk.bf16.vlgmr.msra.gmra.mrb[4].mxu0 %vm1279_vm0, %v1373_v16  ;;  %v1397_v16 = vld [vmem:[%s5889_s23 + $0x48] sm:$0xff] }
 0x2c7   : > { %4026 = vmatprep.mubr.msk.bf16.mxu0 %vm1279_vm0, %v1374_v17  ;;  %v1402_v17 = vld [vmem:[%s5889_s23 + $0x70] sm:$0xff] }
 0x2ce   : > { %4027 = vmatmul.mubr.msk.bf16.gmra.mrb[8].mxu0 %vm1279_vm0, %v1375_v18 }
 0x2cf   : > { %4030 = vmatprep.mubr.msk.bf16.mxu0 %vm1279_vm0, %v1376_v19 }
 0x2d6   : > { %4031 = vmatmul.mubr.msk.bf16.gmra.mrb[12].mxu0 %vm1279_vm0, %v1377_v20 }
 0x2d7   : > { %4034 = vmatprep.mubr.msk.bf16.mxu0 %vm1279_vm0, %v1378_v21 }
 0x2de   : > { %4035 = vmatmul.mubr.msk.bf16.gmra.mrb[16].mxu0 %vm1279_vm0, %v1379_v24  ;;  %v1400_v24 = vld [vmem:[%s5889_s23 + $0x60] sm:$0xff] }
 0x2df   : > { %2290 = vmatprep.mubr.bf16.mxu0 %v4823_v4 }
 0x399   : > { %v4024_v46 = vpop.f32.mrb[4].mxu0 }
 0x39a   : > { %v5415_v47 = vadd.f32 %v4024_v46, %v1390_v45  ;;  %v1486_v48 = vpop.f32.mrb[5].mxu0 }
 0x39b   : > { %v4025_v51 = vpop.f32.mrb[6].mxu0  ;;  %v5426_v54 = vadd.f32 %v1486_v48, %v1388_v50 }
 0x39c   : > { %1553 = vmax.xlane.f32.xlu0 %v5415_v47  ;;  %v1489_v52 = vpop.f32.mrb[7].mxu0  ;;  %v5436_v58 = vadd.f32 %v4025_v51, %v1391_v55 }
 0x39d   : > { %v5424_v53 = vadd.f32 %v1489_v52, %v1389_v49 }
 0x39f   : > { %1551 = vmax.xlane.f32.xlu1 %v5424_v53 }
 0x3a0   : > { %1549 = vmax.xlane.f32.xlu0 %v5426_v54 }
 0x3a1   : > { %v4028_v57 = vpop.f32.mrb[8].mxu0 }
 0x3a2   : > { %v5438_v59 = vadd.f32 %v4028_v57, %v1394_v56  ;;  %v1502_v60 = vpop.f32.mrb[9].mxu0 }
 0x3a3   : > { %v4029_v63 = vpop.f32.mrb[10].mxu0  ;;  %v5448_v1 = vadd.f32 %v1502_v60, %v1392_v61 }
 0x3a4   : > { %v1505_v0 = vpop.f32.mrb[11].mxu0  ;;  %1561 = vmax.xlane.f32.xlu1 %v5438_v59  ;;  %1555 = vmax.xlane.f32.xlu0 %v5436_v58  ;;  %v5450_v2 = vadd.f32 %v4029_v63, %v1395_v62 }
 0x3a5   : > { %v5460_v7 = vadd.f32 %v1505_v0, %v1393_v3 }
 0x3a8   : > { %1557 = vmax.xlane.f32.xlu1 %v5448_v1  ;;  %1563 = vmax.xlane.f32.xlu0 %v5450_v2 }
 0x3a9   : > { %v4032_v6 = vpop.f32.mrb[12].mxu0 }
 0x3aa   : > { %v5462_v8 = vadd.f32 %v4032_v6, %v1398_v5  ;;  %v1518_v9 = vpop.f32.mrb[13].mxu0 }
 0x3ab   : > { %v4033_v12 = vpop.f32.mrb[14].mxu0  ;;  %v5472_v14 = vadd.f32 %v1518_v9, %v1396_v10 }
 0x3ac   : > { %v1521_v13 = vpop.f32.mrb[15].mxu0  ;;  %1569 = vmax.xlane.f32.xlu1 %v5462_v8  ;;  %1559 = vmax.xlane.f32.xlu0 %v5460_v7  ;;  %v5474_v15 = vadd.f32 %v4033_v12, %v1399_v11 }
 0x3ad   : > { %v5484_v19 = vadd.f32 %v1521_v13, %v1397_v16 }
 0x3b0   : > { %1565 = vmax.xlane.f32.xlu1 %v5472_v14  ;;  %1571 = vmax.xlane.f32.xlu0 %v5474_v15 }
 0x3b1   : > { %v4036_v18 = vpop.f32.mrb[16].mxu0 }
 0x3b2   : > { %v5486_v20 = vadd.f32 %v4036_v18, %v1402_v17  ;;  %v1534_v21 = vpop.f32.mrb[17].mxu0 }
 0x3b3   : > { %v4037_v26 = vpop.f32.mrb[18].mxu0  ;;  %v5496_v28 = vadd.f32 %v1534_v21, %v1400_v24 }
 0x3b4   : > { %v1537_v27 = vpop.f32.mrb[19].mxu0  ;;  %1577 = vmax.xlane.f32.xlu1 %v5486_v20  ;;  %1567 = vmax.xlane.f32.xlu0 %v5484_v19  ;;  %v5498_v29 = vadd.f32 %v4037_v26, %v1403_v25 }
 0x3b5   : > { %v5505_v35 = vadd.f32 %v1537_v27, %v1401_v32 }
 0x3b8   : > { %1573 = vmax.xlane.f32.xlu1 %v5496_v28  ;;  %1579 = vmax.xlane.f32.xlu0 %v5498_v29 }
 0x3bc   : > { %1575 = vmax.xlane.f32.xlu0 %v5505_v35 }
 0x3c9   : > { %1344 = vrot.lane.b32.xlu1 %v5396_v36, %s4831_s11 }
 0x3d2   : > { %1356 = vrot.lane.b32.xlu0 %v5396_v36, %s4830_s12 }
 0x429   : > { %v1554_v33 = vpop.xlane.xlu0 %1553 }
 0x42a   : > { %v1583_v37 = vsub.f32 %v5415_v47, %v1554_v33 }
 0x42c   : > { %v1601_v38 = vmul.f32 1.442695, %v1583_v37  ;;  %v1552_v39 = vpop.xlane.xlu1 %1551 }
 0x42d   : > { %v1550_v40 = vpop.xlane.xlu0 %1549  ;;  %v1582_v48 = vsub.f32 %v5424_v53, %v1552_v39 }
 0x42e   : > { %4336 = vpow2.f32 %v1601_v38  ;;  %v1581_v41 = vsub.f32 %v5426_v54, %v1550_v40 }
 0x42f   : > { %v1599_v55 = vmul.f32 1.442695, %v1582_v48 }
 0x430   : > { %v1597_v42 = vmul.f32 1.442695, %v1581_v41 }
 0x431   : > { %v1562_v43 = vpop.xlane.xlu1 %1561  ;;  %v1556_v44 = vpop.xlane.xlu0 %1555 }
 0x432   : > { %4338 = vpow2.f32 %v1597_v42  ;;  %v1587_v45 = vsub.f32 %v5438_v59, %v1562_v43  ;;  %v1584_v46 = vsub.f32 %v5436_v58, %v1556_v44 }
 0x434   : > { %v1609_v49 = vmul.f32 1.442695, %v1587_v45  ;;  %v1603_v50 = vmul.f32 1.442695, %v1584_v46 }
 0x435   : > { %v1558_v51 = vpop.xlane.xlu1 %1557  ;;  %v1564_v47 = vpop.xlane.xlu0 %1563 }
 0x436   : > { %4340 = vpow2.f32 %v1609_v49  ;;  %v1585_v52 = vsub.f32 %v5448_v1, %v1558_v51  ;;  %v1588_v54 = vsub.f32 %v5450_v2, %v1564_v47 }
 0x437   : > { %4342 = vpow2.f32 %v1603_v50 }
 0x438   : > { %v5519_v56 = vpop.eup %4336  ;;  %v1605_v57 = vmul.f32 1.442695, %v1585_v52  ;;  %v1611_v60 = vmul.f32 1.442695, %v1588_v54 }
 0x439   : > { %1633 = vadd.xlane.f32.xlu1 %v5519_v56  ;;  %v1570_v59 = vpop.xlane.xlu1 %1569  ;;  %v1560_v58 = vpop.xlane.xlu0 %1559 }
 0x43a   : > { %4344 = vpow2.f32 %v1605_v57  ;;  %v1591_v53 = vsub.f32 %v5462_v8, %v1570_v59  ;;  %v1586_v61 = vsub.f32 %v5460_v7, %v1560_v58 }
 0x43b   : > { %4346 = vpow2.f32 %v1599_v55 }
 0x43c   : > { %v5524_v62 = vpop.eup %4338  ;;  %v1617_v63 = vmul.f32 1.442695, %v1591_v53  ;;  %v1607_v3 = vmul.f32 1.442695, %v1586_v61 }
 0x43d   : > { %v1566_v0 = vpop.xlane.xlu1 %1565  ;;  %1629 = vadd.xlane.f32.xlu1 %v5524_v62  ;;  %v1572_v1 = vpop.xlane.xlu0 %1571 }
 0x43e   : > { %4348 = vpow2.f32 %v1617_v63  ;;  %v1589_v2 = vsub.f32 %v5472_v14, %v1566_v0  ;;  %v1592_v5 = vsub.f32 %v5474_v15, %v1572_v1 }
 0x43f   : > { %4350 = vpow2.f32 %v1611_v60 }
 0x440   : > { %v5529_v6 = vpop.eup %4340  ;;  %v1613_v8 = vmul.f32 1.442695, %v1589_v2  ;;  %v1619_v11 = vmul.f32 1.442695, %v1592_v5 }
 0x441   : > { %v5531_v9 = vpop.eup %4342  ;;  %v1578_v7 = vpop.xlane.xlu1 %1577  ;;  %1641 = vadd.xlane.f32.xlu1 %v5529_v6 }
 0x442   : > { %v1568_v10 = vpop.xlane.xlu0 %1567  ;;  %4352 = vpow2.f32 %v1613_v8  ;;  %1635 = vadd.xlane.f32.xlu0 %v5531_v9  ;;  %v1595_v17 = vsub.f32 %v5486_v20, %v1578_v7 }
 0x443   : > { %4354 = vpow2.f32 %v1607_v3  ;;  %v1590_v12 = vsub.f32 %v5484_v19, %v1568_v10 }
 0x444   : > { %v5536_v13 = vpop.eup %4344  ;;  %4356 = vpow2.f32 %v1619_v11  ;;  %v1625_v26 = vmul.f32 1.442695, %v1595_v17 }
 0x445   : > { %v5538_v14 = vpop.eup %4346  ;;  %v1574_v15 = vpop.xlane.xlu1 %1573  ;;  %1637 = vadd.xlane.f32.xlu1 %v5536_v13  ;;  %v1615_v18 = vmul.f32 1.442695, %v1590_v12 }
 0x446   : > { %v1580_v16 = vpop.xlane.xlu0 %1579  ;;  %1631 = vadd.xlane.f32.xlu0 %v5538_v14  ;;  %v1593_v27 = vsub.f32 %v5496_v28, %v1574_v15 }
 0x447   : > { %4358 = vpow2.f32 %v1615_v18  ;;  %v1596_v28 = vsub.f32 %v5498_v29, %v1580_v16 }
 0x448   : > { %v5543_v21 = vpop.eup %4348  ;;  %4360 = vpow2.f32 %v1625_v26  ;;  %v1621_v37 = vmul.f32 1.442695, %v1593_v27 }
 0x449   : > { %v5545_v24 = vpop.eup %4350  ;;  %v1345_v25 = vpop.permute.xlu1 %1344  ;;  %1649 = vadd.xlane.f32.xlu1 %v5543_v21  ;;  %v1627_v44 = vmul.f32 1.442695, %v1596_v28 }
 0x44a   : > { %v1576_v19 = vpop.xlane.xlu0 %1575  ;;  %1347 = vst.msk [vmem:[#allocation5 + $0x28] sm:$0xff] %vm1279_vm0, %v1345_v25  ;;  %1643 = vadd.xlane.f32.xlu0 %v5545_v24  ;;  %4362 = vpow2.f32 %v1621_v37 }
 0x44b   : > { %v1594_v38 = vsub.f32 %v5505_v35, %v1576_v19 }
 0x44c   : > { %v5551_v32 = vpop.eup %4352 }
 0x44d   : > { %v5553_v20 = vpop.eup %4354  ;;  %1645 = vadd.xlane.f32.xlu1 %v5551_v32  ;;  %v1623_v41 = vmul.f32 1.442695, %v1594_v38 }
 0x44e   : > { %v1357_v33 = vpop.permute.xlu0 %1356  ;;  %1639 = vadd.xlane.f32.xlu0 %v5553_v20  ;;  %v5559_v39 = vpop.eup %4356 }
 0x44f   : > { %1359 = vst.msk [vmem:[#allocation5 + $0x30] sm:$0xff] %vm1279_vm0, %v1357_v33  ;;  %4364 = vpow2.f32 %v1623_v41 }
 0x450   : > { %4366 = vpow2.f32 %v1627_v44 }
 0x451   : > { %v1706_v40 = vld [vmem:[#allocation5 + $0x28] sm:$0xff]  ;;  %v5563_v42 = vpop.eup %4358 }
 0x452   : > { %1651 = vadd.xlane.f32.xlu0 %v5559_v39  ;;  %4048 = vmatprep.subr.bf16.mxu1 %v1706_v40  ;;  %v5566_v35 = vpop.eup %4360 }
 0x453   : > { %4049 = vmatpush3.bf16.msra.mxu1 %v1706_v40 }
 0x454   : > { %v5569_v45 = vpop.eup %4362 }
 0x456   : > { %v1707_v43 = vld [vmem:[#allocation5 + $0x30] sm:$0xff]  ;;  %1647 = vadd.xlane.f32.xlu0 %v5563_v42 }
 0x457   : > { %4050 = vmatprep.subr.bf16.mxu1 %v1707_v43 }
 0x458   : > { %4051 = vmatpush3.bf16.msra.mxu1 %v1707_v43 }
 0x459   : > { %v5574_v29 = vpop.eup %4364 }
 0x45a   : > { %1657 = vadd.xlane.f32.xlu0 %v5566_v35  ;;  %v5577_v46 = vpop.eup %4366 }
 0x45e   : > { %1653 = vadd.xlane.f32.xlu0 %v5569_v45  ;;  %1368 = vrot.lane.b32.xlu1 %v5396_v36, %s4832_s22 }
 0x462   : > { %1655 = vadd.xlane.f32.xlu0 %v5574_v29 }
 0x466   : > { %1659 = vadd.xlane.f32.xlu0 %v5577_v46 }
 0x4c6   : > { %v1634_v48 = vpop.xlane.xlu1 %1633 }
 0x4ca   : > { %v1630_v49 = vpop.xlane.xlu1 %1629 }
 0x4cb   : > { %4368 = vrcp.f32 %v1630_v49 }
 0x4ce   : > { %v1642_v50 = vpop.xlane.xlu1 %1641 }
 0x4cf   : > { %v1636_v51 = vpop.xlane.xlu0 %1635 }
 0x4d2   : > { %v1638_v47 = vpop.xlane.xlu1 %1637 }
 0x4d3   : > { %v1632_v52 = vpop.xlane.xlu0 %1631 }
 0x4d4   : > { %4370 = vrcp.f32 %v1632_v52  ;;  %v4248_v52 = vld [vmem:[%s5211_s27] sm:$0xff]  }
 0x4d5   : > { %4372 = vrcp.f32 %v1636_v51  ;;  %v4369_v59 = vpop.eup %4368 }
 0x4d6   : > { %v1650_v55 = vpop.xlane.xlu1 %1649  ;;  %4374 = vrcp.f32 %v1634_v48  ;;  %v1677_v61 = vmul.f32 %v4369_v59, %v5524_v62 }
 0x4d7   : > { %v1644_v54 = vpop.xlane.xlu0 %1643  ;;  %4376 = vrcp.f32 %v1638_v47 }
 0x4da   : > { %v1646_v36 = vpop.xlane.xlu1 %1645 }
 0x4db   : > { %v1640_v57 = vpop.xlane.xlu0 %1639 }
 0x4dc   : > { %4378 = vrcp.f32 %v1640_v57  ;;  %v4250_v57 = vld [vmem:[%s5211_s27 + $0x10] sm:$0xff]  }
 0x4dd   : > { %4380 = vrcp.f32 %v1644_v54 }
 0x4de   : > { %v4371_v58 = vpop.eup %4370  ;;  %v1369_v53 = vpop.permute.xlu1 %1368  ;;  %4382 = vrcp.f32 %v1642_v50 }
 0x4df   : > { %1371 = vst.msk [vmem:[#allocation5 + $0x38] sm:$0xff] %vm1279_vm0, %v1369_v53  ;;  %v1652_v60 = vpop.xlane.xlu0 %1651  ;;  %v1678_v63 = vmul.f32 %v4371_v58, %v5538_v14  ;;  %v4373_v1 = vpop.eup %4372  ;;  %4384 = vrcp.f32 %v1646_v36  ;;  %v4251_v58 = vld [vmem:[%s5211_s27 + $0x18] sm:$0xff]  }
 0x4e0   : > { %v4375_v3 = vpop.eup %4374  ;;  %v1680_v8 = vmul.f32 %v4373_v1, %v5531_v9  ;;  %v4253_v1 = vld [vmem:[%s5211_s27 + $0x28] sm:$0xff]  }
 0x4e1   : > { %v1693_v0 = vpack.c.bf16 %v1678_v63, %v1677_v61  ;;  %v4377_v5 = vpop.eup %4376  ;;  %v1679_v62 = vmul.f32 %v4375_v3, %v5519_v56  ;;  %v4252_v61 = vld [vmem:[%s5211_s27 + $0x20] sm:$0xff]   ;;  %v4254_v3 = vld [vmem:[%s5211_s27 + $0x30] sm:$0xff]  }
 0x4e2   : > { %v1681_v14 = vmul.f32 %v4377_v5, %v5536_v13 }
 0x4e3   : > { %4054 = vmatprep.mubr.bf16.mxu1 %v1693_v0  ;;  %v1648_v2 = vpop.xlane.xlu0 %1647  ;;  %v1694_v15 = vpack.c.bf16 %v1680_v8, %v1679_v62 }
 0x4e4   : > { %4386 = vrcp.f32 %v1648_v2 }
 0x4e5   : > { %4388 = vrcp.f32 %v1652_v60 }
 0x4e6   : > { %v4379_v7 = vpop.eup %4378  ;;  %v1708_v10 = vld [vmem:[#allocation5 + $0x38] sm:$0xff]  ;;  %4390 = vrcp.f32 %v1650_v55 }
 0x4e7   : > { %v1658_v11 = vpop.xlane.xlu0 %1657  ;;  %4052 = vmatprep.subr.bf16.mxu1 %v1708_v10  ;;  %v1682_v12 = vmul.f32 %v4379_v7, %v5553_v20  ;;  %v4381_v16 = vpop.eup %4380 }
 0x4e8   : > { %4053 = vmatpush3.bf16.msra.mxu1 %v1708_v10  ;;  %v4383_v9 = vpop.eup %4382  ;;  %v1684_v19 = vmul.f32 %v4381_v16, %v5545_v24  ;;  %v4255_v10 = vld [vmem:[%s5211_s27 + $0x38] sm:$0xff]  }
 0x4e9   : > { %4070 = vmatprep.subr.bf16.mxu1 %v4824_v23  ;;  %v1695_v17 = vpack.c.bf16 %v1682_v12, %v1681_v14  ;;  %v4385_v25 = vpop.eup %4384  ;;  %v1683_v27 = vmul.f32 %v4383_v9, %v5529_v6 }
 0x4ea   : > { %v1685_v20 = vmul.f32 %v4385_v25, %v5551_v32 }
 0x4eb   : > { %v1654_v18 = vpop.xlane.xlu0 %1653  ;;  %4055 = vmatmul.mubr.bf16.vlgmr.msra.gmra.mrb[4].mxu1 %v1694_v15  ;;  %v1696_v33 = vpack.c.bf16 %v1684_v19, %v1683_v27 }
 0x4ec   : > { %4058 = vmatprep.mubr.bf16.mxu1 %v1695_v17  ;;  %4392 = vrcp.f32 %v1654_v18  ;;  %4071 = vmatpush3.bf16.msra.mxu1 %v4248_v52 }
 0x4ed   : > { %4072 = vmatprep.subr.bf16.mxu1 %v4824_v23 }
 0x4ee   : > { %v4387_v56 = vpop.eup %4386 }
 0x4ef   : > { %v1656_v26 = vpop.xlane.xlu0 %1655  ;;  %v1686_v13 = vmul.f32 %v4387_v56, %v5563_v42  ;;  %v4389_v37 = vpop.eup %4388 }
 0x4f0   : > { %4394 = vrcp.f32 %v1656_v26  ;;  %v4391_v28 = vpop.eup %4390  ;;  %v1688_v24 = vmul.f32 %v4389_v37, %v5559_v39 }
 0x4f1   : > { %4396 = vrcp.f32 %v1658_v11  ;;  %v1697_v38 = vpack.c.bf16 %v1686_v13, %v1685_v20  ;;  %v1687_v41 = vmul.f32 %v4391_v28, %v5543_v21 }
 0x4f3   : > { %v1660_v40 = vpop.xlane.xlu0 %1659  ;;  %4059 = vmatmul.mubr.bf16.gmra.mrb[8].mxu1 %v1696_v33  ;;  %v1698_v6 = vpack.c.bf16 %v1688_v24, %v1687_v41 }
 0x4f4   : > { %4398 = vrcp.f32 %v1660_v40  ;;  %4062 = vmatprep.mubr.bf16.mxu1 %v1697_v38 }
 0x4f6   : > { %v4393_v43 = vpop.eup %4392 }
 0x4f7   : > { %v1689_v32 = vmul.f32 %v4393_v43, %v5569_v45  ;;  %v4408_v43 = vld [vmem:[#allocation2] sm:$0xff] }
 0x4fa   : > { %v4395_v42 = vpop.eup %4394 }
 0x4fb   : > { %4063 = vmatmul.mubr.bf16.gmra.mrb[12].mxu1 %v1698_v6  ;;  %v1690_v44 = vmul.f32 %v4395_v42, %v5574_v29  ;;  %v4397_v48 = vpop.eup %4396 }
 0x4fc   : > { %v1691_v51 = vmul.f32 %v4397_v48, %v5566_v35  ;;  %v4259_v48 = vld [vmem:[%s5218_s24 + $0x8] ss:$16 sps:$4 sm:$0xff]  }
 0x4fd   : > { %v1699_v49 = vpack.c.bf16 %v1690_v44, %v1689_v32  ;;  %v4256_v32 = vld [vmem:[%s5218_s24] ss:$16 sps:$4 sm:$0xff]   ;;  %v4258_v44 = vld [vmem:[%s5218_s24 + $0x4] ss:$16 sps:$4 sm:$0xff]  }
 0x4fe   : > { %v4399_v50 = vpop.eup %4398  ;;  %2258 = vmatprep.subr.bf16.mxu0 %v4258_v44  ;;  %v4308_v44 = vld [vmem:[%s5224_s1 + $0x48] sm:$0xff]  }
 0x4ff   : > { %4066 = vmatprep.mubr.bf16.mxu1 %v1699_v49  ;;  %v1692_v39 = vmul.f32 %v4399_v50, %v5577_v46  ;;  %v4249_v46 = vld [vmem:[%s5211_s27 + $0x8] sm:$0xff]   ;;  %v4264_v50 = vld [vmem:[%s5218_s24 + $0x24] ss:$16 sps:$4 sm:$0xff]   ;;  %2259 = vmatpush1.bf16.msra.mxu0 %v4256_v32 }
 0x500   : > { %4073 = vmatpush3.bf16.msra.mxu1 %v4249_v46  ;;  %v4261_v49 = vld [vmem:[%s5218_s24 + $0xc] ss:$16 sps:$4 sm:$0xff]   ;;  %2260 = vmatprep.subr.bf16.mxu0 %v4264_v50 }
 0x501   : > { %v1700_v47 = vpack.c.bf16 %v1692_v39, %v1691_v51  ;;  %4074 = vmatprep.subr.bf16.mxu1 %v4824_v23  ;;  %v4267_v51 = vld [vmem:[%s5218_s24 + $0x2c] ss:$16 sps:$4 sm:$0xff]   ;;  %v4262_v39 = vld [vmem:[%s5218_s24 + $0x20] ss:$16 sps:$4 sm:$0xff]  }
 0x502   : > { %v4311_v50 = vld [vmem:[%s5224_s1 + $0x88] sm:$0xff]  }
 0x503   : > { %4067 = vmatmul.mubr.bf16.gmra.mrb[16].mxu1 %v1700_v47  ;;  %v4265_v47 = vld [vmem:[%s5218_s24 + $0x28] ss:$16 sps:$4 sm:$0xff]   ;;  %2261 = vmatpush1.bf16.msra.mxu0 %v4262_v39  ;;  %v4313_v39 = vld [vmem:[%s5224_s1 + $0xd0] sm:$0xff]  }
 0x504   : > { %4086 = vmatprep.mubr.msk.bf16.mxu1 %vm4825_vm1, %v4824_v23  ;;  %4075 = vmatpush3.bf16.msra.mxu1 %v4250_v57  ;;  %v4273_v57 = vld [vmem:[%s5218_s24 + $0x4c] ss:$16 sps:$4 sm:$0xff]  }
 0x505   : > { %4076 = vmatprep.subr.bf16.mxu1 %v4824_v23 }
 0x508   : > { %4077 = vmatpush3.bf16.msra.mxu1 %v4251_v58  ;;  %v4271_v58 = vld [vmem:[%s5218_s24 + $0x48] ss:$16 sps:$4 sm:$0xff]  }
 0x509   : > { %4078 = vmatprep.subr.bf16.mxu1 %v4824_v23 }
 0x50c   : > { %4079 = vmatpush3.bf16.msra.mxu1 %v4252_v61  ;;  %v4274_v61 = vld [vmem:[%s5218_s24 + $0x60] ss:$16 sps:$4 sm:$0xff]  }
 0x50d   : > { %4080 = vmatprep.subr.bf16.mxu1 %v4824_v23 }
 0x510   : > { %4081 = vmatpush3.bf16.msra.mxu1 %v4253_v1  ;;  %v4285_v1 = vld [vmem:[%s5218_s24 + $0x8c] ss:$16 sps:$4 sm:$0xff]  }
 0x511   : > { %4082 = vmatprep.subr.bf16.mxu1 %v4824_v23 }
 0x514   : > { %4083 = vmatpush3.bf16.msra.mxu1 %v4254_v3  ;;  %v4283_v3 = vld [vmem:[%s5218_s24 + $0x88] ss:$16 sps:$4 sm:$0xff]  }
 0x515   : > { %4084 = vmatprep.subr.bf16.mxu1 %v4824_v23 }
 0x518   : > { %4085 = vmatpush3.bf16.msra.mxu1 %v4255_v10  ;;  %v4289_v10 = vld [vmem:[%s5218_s24 + $0xa8] ss:$16 sps:$4 sm:$0xff]  }
 0x519   : > { %2301 = vmatprep.subr.bf16.mxu1 %v4261_v49  ;;  %v4310_v49 = vld [vmem:[%s5224_s1 + $0x8] sm:$0xff]  }
 0x5be   : > { %v4056_v21 = vpop.f32.mrb[4].mxu1 }
 0x5bf   : > { %1810 = vrot.lane.b32.xlu1 %v4056_v21, %s4832_s22  ;;  %v1743_v45 = vpop.f32.mrb[5].mxu1 }
 0x5c0   : > { %1806 = vst.msk [vmem:[#allocation6] sm:$0xff] %vm1279_vm0, %v1743_v45  ;;  %v4057_v29 = vpop.f32.mrb[6].mxu1 }
 0x5c1   : > { %1812 = vrot.lane.b32.xlu0 %v4057_v29, %s4832_s22  ;;  %v1746_v35 = vpop.f32.mrb[7].mxu1 }
 0x5c2   : > { %1807 = vst.msk [vmem:[#allocation6 + $0x8] sm:$0xff] %vm1279_vm0, %v1746_v35 }
 0x5c6   : > { %v4060_v55 = vpop.f32.mrb[8].mxu1 }
 0x5c7   : > { %1832 = vrot.lane.b32.xlu1 %v4060_v55, %s4831_s11  ;;  %v1759_v54 = vpop.f32.mrb[9].mxu1 }
 0x5c8   : > { %v4061_v36 = vpop.f32.mrb[10].mxu1 }
 0x5c9   : > { %v1762_v59 = vpop.f32.mrb[11].mxu1 }
 0x5cb   : > { %1821 = vrot.lane.b32.xlu1 %v1759_v54, %s4830_s12 }
 0x5ce   : > { %v4064_v53 = vpop.f32.mrb[12].mxu1 }
 0x5cf   : > { %1834 = vrot.lane.b32.xlu1 %v4061_v36, %s4831_s11  ;;  %v1775_v60 = vpop.f32.mrb[13].mxu1  ;;  %v4270_v36 = vld [vmem:[%s5218_s24 + $0x44] ss:$16 sps:$4 sm:$0xff]  }
 0x5d0   : > { %v4065_v63 = vpop.f32.mrb[14].mxu1  ;;  %2262 = vmatprep.subr.bf16.mxu0 %v4270_v36  ;;  %v4323_v36 = vld [vmem:[%s5224_s1 + $0xa0] sm:$0xff]  }
 0x5d1   : > { %1856 = vrot.lane.b32.xlu0 %v4065_v63, %s4826_s4  ;;  %v1778_v0 = vpop.f32.mrb[15].mxu1  ;;  %v4277_v63 = vld [vmem:[%s5218_s24 + $0x68] ss:$16 sps:$4 sm:$0xff]  }
 0x5d3   : > { %1823 = vrot.lane.b32.xlu1 %v1762_v59, %s4830_s12  ;;  %v4268_v59 = vld [vmem:[%s5218_s24 + $0x40] ss:$16 sps:$4 sm:$0xff]   ;;  %s5892_s12 = sld [smem:[#allocation35_spill]] }
 0x5d4   : > { %2263 = vmatpush1.bf16.msra.mxu0 %v4268_v59  ;;  %v4325_v59 = vld [vmem:[%s5224_s1 + $0xe8] sm:$0xff]  }
 0x5d5   : > { %1845 = vrot.lane.b32.xlu0 %v1778_v0, %s4828_s6  ;;  %v4282_v0 = vld [vmem:[%s5218_s24 + $0x84] ss:$16 sps:$4 sm:$0xff]  }
 0x5d6   : > { %v4068_v2 = vpop.f32.mrb[16].mxu1 }
 0x5d7   : > { %1854 = vrot.lane.b32.xlu1 %v4064_v53, %s4826_s4  ;;  %v1791_v5 = vpop.f32.mrb[17].mxu1  ;;  %v4276_v53 = vld [vmem:[%s5218_s24 + $0x64] ss:$16 sps:$4 sm:$0xff]  }
 0x5d8   : > { %v4069_v8 = vpop.f32.mrb[18].mxu1  ;;  %2264 = vmatprep.subr.bf16.mxu0 %v4276_v53  ;;  %v4327_v53 = vld [vmem:[%s5224_s1 + $0xa8] sm:$0xff]  }
 0x5d9   : > { %v1794_v7 = vpop.f32.mrb[19].mxu1  ;;  %2265 = vmatpush1.bf16.msra.mxu0 %v4274_v61  ;;  %s5893_s11 = scalar_lea.vmem %s5892_s12, %s5908_s2  ;;  %v4329_v61 = vld [vmem:[%s5224_s1 + $0xf0] sm:$0xff]  }
 0x5da   : > { %1867 = vrot.lane.b32.xlu0 %v1794_v7, %s4829_s0  ;;  %2266 = vmatprep.subr.bf16.mxu0 %v4282_v0  ;;  %v4286_v7 = vld [vmem:[%s5218_s24 + $0xa0] ss:$16 sps:$4 sm:$0xff]  }
 0x5db   : > { %1843 = vrot.lane.b32.xlu1 %v1775_v60, %s4828_s6  ;;  %v4279_v60 = vld [vmem:[%s5218_s24 + $0x6c] ss:$16 sps:$4 sm:$0xff]   ;;  %v4331_v0 = vld [vmem:[%s5224_s1 + $0xb0] sm:$0xff]  }
 0x5de   : > { %1878 = vrot.lane.b32.xlu0 %v4069_v8, %s4827_s21  ;;  %v4291_v8 = vld [vmem:[%s5218_s24 + $0xac] ss:$16 sps:$4 sm:$0xff]  }
 0x5df   : > { %1865 = vrot.lane.b32.xlu1 %v1791_v5, %s4829_s0  ;;  %v4288_v5 = vld [vmem:[%s5218_s24 + $0xa4] ss:$16 sps:$4 sm:$0xff]  }
 0x5e3   : > { %1876 = vrot.lane.b32.xlu1 %v4068_v2, %s4827_s21  ;;  %s5890_s21 = sld [smem:[#allocation34_spill]]  ;;  %v4280_v2 = vld [vmem:[%s5218_s24 + $0x80] ss:$16 sps:$4 sm:$0xff]  }
 0x5e4   : > { %2267 = vmatpush1.bf16.msra.mxu0 %v4280_v2  ;;  %v4333_v2 = vld [vmem:[%s5224_s1 + $0xf8] sm:$0xff]  }
 0x5e5   : > { %2268 = vmatprep.subr.bf16.mxu0 %v4288_v5  ;;  %v4335_v5 = vld [vmem:[%s5224_s1 + $0xb8] sm:$0xff]  }
 0x5e8   : > { %2269 = vmatpush1.bf16.msra.mxu0 %v4286_v7  ;;  %v2092_v7 = vsub.s32 3, %v5319_v30 }
 0x5e9   : > { %s5891_s6 = scalar_lea.vmem %s5890_s21, %s5908_s2 }
 0x5ea   : > { %v3726_v33 = vld [vmem:[%s5891_s6] ss:$0 sm:$0xff] }
 0x631   : > { %v1811_v11 = vpop.permute.xlu1 %1810 }
 0x632   : > { %1817 = vst.msk [vmem:[#allocation6] sm:$0xff] %vm1816_vm2, %v1811_v11  ;;  %v4294_v11 = vld [vmem:[%s5218_s24 + $0xc4] ss:$16 sps:$4 sm:$0xff]  }
 0x633   : > { %v1813_v62 = vpop.permute.xlu0 %1812  ;;  %2270 = vmatprep.subr.bf16.mxu0 %v4294_v11 }
 0x634   : > { %1818 = vst.msk [vmem:[#allocation6 + $0x8] sm:$0xff] %vm1816_vm2, %v1813_v62  ;;  %v4297_v62 = vld [vmem:[%s5218_s24 + $0xcc] ss:$16 sps:$4 sm:$0xff]  }
 0x639   : > { %v1833_v12 = vpop.permute.xlu1 %1832 }
 0x63d   : > { %v1822_v14 = vpop.permute.xlu1 %1821 }
 0x63e   : > { %1828 = vst.msk [vmem:[#allocation6] sm:$0xff] %vm1827_vm3, %v1822_v14  ;;  %v4295_v14 = vld [vmem:[%s5218_s24 + $0xc8] ss:$16 sps:$4 sm:$0xff]  }
 0x63f   : > { %1839 = vst.msk [vmem:[#allocation6] sm:$0xff] %vm1838_vm4, %v1833_v12  ;;  %v4292_v12 = vld [vmem:[%s5218_s24 + $0xc0] ss:$16 sps:$4 sm:$0xff]  }
 0x640   : > { %2271 = vmatpush1.bf16.msra.mxu0 %v4292_v12 }
 0x641   : > { %v1835_v15 = vpop.permute.xlu1 %1834 }
 0x643   : > { %v1857_v23 = vpop.permute.xlu0 %1856 }
 0x645   : > { %v1824_v16 = vpop.permute.xlu1 %1823 }
 0x646   : > { %1829 = vst.msk [vmem:[#allocation6 + $0x8] sm:$0xff] %vm1827_vm3, %v1824_v16  ;;  %v4301_v16 = vld [vmem:[%s5218_s24 + $0xe8] ss:$16 sps:$4 sm:$0xff]  }
 0x647   : > { %1840 = vst.msk [vmem:[#allocation6 + $0x8] sm:$0xff] %vm1838_vm4, %v1835_v15  ;;  %v1846_v17 = vpop.permute.xlu0 %1845  ;;  %v4298_v15 = vld [vmem:[%s5218_s24 + $0xe0] ss:$16 sps:$4 sm:$0xff]  }
 0x648   : > { %1851 = vst.msk [vmem:[#allocation6 + $0x8] sm:$0xff] %vm1849_vm5, %v1846_v17  ;;  %v4303_v17 = vld [vmem:[%s5218_s24 + $0xec] ss:$16 sps:$4 sm:$0xff]  }
 0x649   : > { %v1855_v18 = vpop.permute.xlu1 %1854  ;;  %1862 = vst.msk [vmem:[#allocation6 + $0x8] sm:$0xff] %vm1860_vm6, %v1857_v23  ;;  %v4300_v23 = vld [vmem:[%s5218_s24 + $0xe4] ss:$16 sps:$4 sm:$0xff]  }
 0x64a   : > { %2272 = vmatprep.subr.bf16.mxu0 %v4300_v23 }
 0x64b   : > { %2273 = vmatpush1.bf16.msra.mxu0 %v4298_v15 }
 0x64c   : > { %v1868_v9 = vpop.permute.xlu0 %1867 }
 0x64d   : > { %1873 = vst.msk [vmem:[#allocation6 + $0x8] sm:$0xff] %vm1871_vm7, %v1868_v9  ;;  %v1844_v25 = vpop.permute.xlu1 %1843  ;;  %v4305_v9 = vld [vmem:[%s5224_s1 + $0xc0] sm:$0xff]  }
 0x64e   : > { %1850 = vst.msk [vmem:[#allocation6] sm:$0xff] %vm1849_vm5, %v1844_v25 }
 0x64f   : > { %1861 = vst.msk [vmem:[#allocation6] sm:$0xff] %vm1860_vm6, %v1855_v18  ;;  %v4304_v18 = vld [vmem:[%s5224_s1 + $0x40] sm:$0xff]  }
 0x650   : > { %v1879_v19 = vpop.permute.xlu0 %1878  ;;  %3942 = vmatprep.subr.bf16.mxu0 %v4304_v18 }
 0x651   : > { %1884 = vst.msk [vmem:[#allocation6 + $0x8] sm:$0xff] %vm1882_vm8, %v1879_v19  ;;  %v1866_v56 = vpop.permute.xlu1 %1865 }
 0x652   : > { %1872 = vst.msk [vmem:[#allocation6] sm:$0xff] %vm1871_vm7, %v1866_v56 }
 0x655   : > { %v1877_v26 = vpop.permute.xlu1 %1876 }
 0x656   : > { %1883 = vst.msk [vmem:[#allocation6] sm:$0xff] %vm1882_vm8, %v1877_v26 }
 0x658   : > { %v1886_v13 = vld [vmem:[#allocation6 + $0x8] sm:$0xff] }
 0x65d   : > { %v1885_v27 = vld [vmem:[#allocation6] sm:$0xff] }
 0x65e   : > { %v1887_v20 = vpack.c.bf16 %v1886_v13, %v1885_v27 }
 0x660   : > { %4087 = vmatmul.mubr.bf16.vlgmr.msra.gmra.mrb[20].mxu1 %v1887_v20 }
 0x661   : > { %2333 = vmatprep.mubr.bf16.mxu1 %v4823_v4  ;;  %v4409_v4 = vld [vmem:[#allocation2 + $0x8] sm:$0xff]  ;;  %2302 = vmatpush1.bf16.msra.mxu1 %v4259_v48 }
 0x662   : > { %2303 = vmatprep.subr.bf16.mxu1 %v4267_v51  ;;  %v4309_v48 = vld [vmem:[%s5224_s1 + $0xc8] sm:$0xff]   ;;  %v4312_v51 = vld [vmem:[%s5224_s1 + $0x50] sm:$0xff]  }
 0x665   : > { %2304 = vmatpush1.bf16.msra.mxu1 %v4265_v47  ;;  %v4314_v47 = vld [vmem:[%s5224_s1 + $0x10] sm:$0xff]  }
 0x666   : > { %2305 = vmatprep.subr.bf16.mxu1 %v4273_v57  ;;  %v4324_v57 = vld [vmem:[%s5224_s1 + $0x68] sm:$0xff]  }
 0x669   : > { %2306 = vmatpush1.bf16.msra.mxu1 %v4271_v58  ;;  %v4326_v58 = vld [vmem:[%s5224_s1 + $0x28] sm:$0xff]  }
 0x66a   : > { %2307 = vmatprep.subr.bf16.mxu1 %v4279_v60  ;;  %v4328_v60 = vld [vmem:[%s5224_s1 + $0x70] sm:$0xff]  }
 0x66d   : > { %2308 = vmatpush1.bf16.msra.mxu1 %v4277_v63  ;;  %v4330_v63 = vld [vmem:[%s5224_s1 + $0x30] sm:$0xff]  }
 0x66e   : > { %2309 = vmatprep.subr.bf16.mxu1 %v4285_v1  ;;  %v4332_v1 = vld [vmem:[%s5224_s1 + $0x78] sm:$0xff]  }
 0x671   : > { %2310 = vmatpush1.bf16.msra.mxu1 %v4283_v3  ;;  %v4334_v3 = vld [vmem:[%s5224_s1 + $0x38] sm:$0xff]  }
 0x672   : > { %2311 = vmatprep.subr.bf16.mxu1 %v4291_v8  ;;  %v2076_v8 = vld [vmem:[%s5266_s5] sm:$0xf] }
 0x673   : > { %v2089_v11 = vrot.slane %v2076_v8, %v1061_v22  ;;  %v2093_v12 = vrot.slane %v2076_v8, %v2092_v7 }
 0x675   : > { %2312 = vmatpush1.bf16.msra.mxu1 %v4289_v10  ;;  %v2081_v10 = vrot.slane %v2076_v8, %v1053_v31 }
 0x676   : > { %2313 = vmatprep.subr.bf16.mxu1 %v4297_v62  ;;  %v2085_v62 = vrot.slane %v2076_v8, %v1057_v34 }
 0x679   : > { %2314 = vmatpush1.bf16.msra.mxu1 %v4295_v14 }
 0x67a   : > { %2315 = vmatprep.subr.bf16.mxu1 %v4303_v17 }
 0x67d   : > { %2316 = vmatpush1.bf16.msra.mxu1 %v4301_v16 }
 0x67e   : > { %3964 = vmatprep.subr.bf16.mxu1 %v4305_v9 }
 0x733   : > { %v1993_v37 = vpop.f32.mrb[20].mxu1 }
 0x734   : > { %v1994_v38 = vadd.f32 %v3726_v33, %v1993_v37  ;;  %v4088_v40 = vpop.f32.mrb[21].mxu1 }
 0x735   : > { %v1996_v28 = vpop.f32.mrb[22].mxu1 }
 0x736   : > { %v1997_v24 = vadd.f32 %v3726_v33, %v1996_v28  ;;  %v4089_v41 = vpop.f32.mrb[23].mxu1  ;;  %v2000_v6 = vadd.f32 %v4408_v43, %v1994_v38  ;;  %v3735_v33 = vld [vmem:[%s5893_s11] ss:$0 sm:$0xff] }
 0x738   : > { %2004 = vadd.xlane.f32.xlu1 %v2000_v6  ;;  %v2001_v42 = vadd.f32 %v4409_v4, %v1997_v24  ;;  %v3736_v24 = vld [vmem:[%s5895_s26] ss:$0 sm:$0xff] }
 0x739   : > { %v4306_v4 = vld [vmem:[%s5224_s1] sm:$0xff]  }
 0x73a   : > { %2006 = vadd.xlane.f32.xlu0 %v2001_v42 }
 0x7c5   : > { %v2005_v21 = vpop.xlane.xlu1 %2004 }
 0x7c6   : > { %v2009_v52 = vmul.f32 0.0078125, %v2005_v21  ;;  %v4315_v21 = vld [vmem:[%s5224_s1 + $0x90] sm:$0xff]  }
 0x7c7   : > { %v2007_v45 = vpop.xlane.xlu0 %2006 }
 0x7c8   : > { %v5645_v29 = vsub.f32 %v2000_v6, %v2009_v52  ;;  %v2010_v35 = vmul.f32 0.0078125, %v2007_v45  ;;  %v4316_v52 = vld [vmem:[%s5224_s1 + $0x58] sm:$0xff]  }
 0x7c9   : > { %v4317_v45 = vld [vmem:[%s5224_s1 + $0xd8] sm:$0xff]  }
 0x7ca   : > { %v5647_v46 = vsub.f32 %v2001_v42, %v2010_v35  ;;  %v2013_v55 = vmul.f32 %v5645_v29, %v5645_v29  ;;  %v4307_v42 = vld [vmem:[%s5224_s1 + $0x80] sm:$0xff]   ;;  %v4319_v35 = vld [vmem:[%s5224_s1 + $0x98] sm:$0xff]  }
 0x7cc   : > { %2015 = vadd.xlane.f32.xlu0 %v2013_v55  ;;  %v2014_v54 = vmul.f32 %v5647_v46, %v5647_v46  ;;  %v4321_v55 = vld [vmem:[%s5224_s1 + $0xe0] sm:$0xff]  }
 0x7ce   : > { %2017 = vadd.xlane.f32.xlu1 %v2014_v54  ;;  %v4322_v54 = vld [vmem:[%s5224_s1 + $0x20] sm:$0xff]  }
 0x859   : > { %v2016_v25 = vpop.xlane.xlu0 %2015 }
 0x85a   : > { %v2019_v19 = vmul.f32 0.0078125, %v2016_v25 }
 0x85b   : > { %v2018_v56 = vpop.xlane.xlu1 %2017 }
 0x85c   : > { %v2021_v26 = vadd.f32 1e-05, %v2019_v19  ;;  %v2020_v27 = vmul.f32 0.0078125, %v2018_v56 }
 0x85e   : > { %4400 = vrsqrt.f32 %v2021_v26  ;;  %v2022_v13 = vadd.f32 1e-05, %v2020_v27 }
 0x860   : > { %4402 = vrsqrt.f32 %v2022_v13 }
 0x868   : > { %v4401_v20 = vpop.eup %4400 }
 0x869   : > { %v2025_v37 = vmul.f32 %v4401_v20, %v5645_v29  ;;  %v4318_v29 = vld [vmem:[%s5224_s1 + $0x18] sm:$0xff]  }
 0x86a   : > { %v4403_v38 = vpop.eup %4402 }
 0x86b   : > { %v2033_v40 = vmul.f32 %v3735_v33, %v2025_v37  ;;  %v2026_v28 = vmul.f32 %v4403_v38, %v5647_v46  ;;  %v4320_v46 = vld [vmem:[%s5224_s1 + $0x60] sm:$0xff]  }
 0x86d   : > { %v2034_v41 = vmul.f32 %v3735_v33, %v2026_v28  ;;  %v5691_v43 = vadd.f32 %v3736_v24, %v2033_v40 }
 0x86f   : > { %v5693_v6 = vadd.f32 %v3736_v24, %v2034_v41 }
 0x871   : > { %v2043_v32 = vpack.c.bf16 %v5693_v6, %v5691_v43 }
 0x873   : > { %2291 = vmatmul.mubr.bf16.vlgmr.msra.gmra.mrb[20].mxu0 %v2043_v32  ;;  %2334 = vmatmul.mubr.bf16.vlgmr.msra.gmra.mrb[24].mxu1 %v2043_v32 }
 0x874   : > { %3943 = vmatpush3.bf16.msra.mxu0 %v4306_v4  ;;  %3965 = vmatpush3.bf16.msra.mxu1 %v4307_v42 }
 0x875   : > { %3944 = vmatprep.subr.bf16.mxu0 %v4308_v44  ;;  %3966 = vmatprep.subr.bf16.mxu1 %v4309_v48 }
 0x878   : > { %3945 = vmatpush3.bf16.msra.mxu0 %v4310_v49  ;;  %3967 = vmatpush3.bf16.msra.mxu1 %v4311_v50  ;;  %v3769_v49 = vld [vmem:[%s984_s19] ss:$0 sm:$0xff] }
 0x879   : > { %3946 = vmatprep.subr.bf16.mxu0 %v4312_v51  ;;  %3968 = vmatprep.subr.bf16.mxu1 %v4313_v39 }
 0x87c   : > { %3947 = vmatpush3.bf16.msra.mxu0 %v4314_v47  ;;  %3969 = vmatpush3.bf16.msra.mxu1 %v4315_v21 }
 0x87d   : > { %3948 = vmatprep.subr.bf16.mxu0 %v4316_v52  ;;  %3970 = vmatprep.subr.bf16.mxu1 %v4317_v45 }
 0x880   : > { %3949 = vmatpush3.bf16.msra.mxu0 %v4318_v29  ;;  %3971 = vmatpush3.bf16.msra.mxu1 %v4319_v35 }
 0x881   : > { %3950 = vmatprep.subr.bf16.mxu0 %v4320_v46  ;;  %3972 = vmatprep.subr.bf16.mxu1 %v4321_v55 }
 0x884   : > { %3951 = vmatpush3.bf16.msra.mxu0 %v4322_v54  ;;  %3973 = vmatpush3.bf16.msra.mxu1 %v4323_v36 }
 0x885   : > { %3952 = vmatprep.subr.bf16.mxu0 %v4324_v57  ;;  %3974 = vmatprep.subr.bf16.mxu1 %v4325_v59 }
 0x888   : > { %3953 = vmatpush3.bf16.msra.mxu0 %v4326_v58  ;;  %3975 = vmatpush3.bf16.msra.mxu1 %v4327_v53 }
 0x889   : > { %3954 = vmatprep.subr.bf16.mxu0 %v4328_v60  ;;  %3976 = vmatprep.subr.bf16.mxu1 %v4329_v61 }
 0x88c   : > { %3955 = vmatpush3.bf16.msra.mxu0 %v4330_v63  ;;  %3977 = vmatpush3.bf16.msra.mxu1 %v4331_v0 }
 0x88d   : > { %3956 = vmatprep.subr.bf16.mxu0 %v4332_v1  ;;  %3978 = vmatprep.subr.bf16.mxu1 %v4333_v2 }
 0x890   : > { %3957 = vmatpush3.bf16.msra.mxu0 %v4334_v3  ;;  %3979 = vmatpush3.bf16.msra.mxu1 %v4335_v5 }
 0x946   : > { %v2292_v14 = vpop.f32.mrb[20].mxu0  ;;  %v2335_v15 = vpop.f32.mrb[24].mxu1 }
 0x947   : > { %v2293_v23 = vadd.f32 %v2292_v14, %v2081_v10  ;;  %v2336_v16 = vadd.f32 %v2335_v15, %v2089_v11  ;;  %v2294_v17 = vpop.f32.mrb[21].mxu0  ;;  %v2337_v18 = vpop.f32.mrb[25].mxu1  ;;  %v3803_v15 = vld [vmem:[%s998_s25] ss:$0 sm:$0xff] }
 0x948   : > { %v2295_v9 = vadd.f32 %v2294_v17, %v2085_v62  ;;  %v2338_v25 = vadd.f32 %v2337_v18, %v2093_v12  ;;  %v2296_v19 = vpop.f32.mrb[22].mxu0  ;;  %v2339_v56 = vpop.f32.mrb[26].mxu1 }
 0x949   : > { %v2297_v26 = vadd.f32 %v2296_v19, %v2081_v10  ;;  %v2340_v27 = vadd.f32 %v2339_v56, %v2089_v11  ;;  %v2298_v31 = vpop.f32.mrb[23].mxu0  ;;  %v2341_v13 = vpop.f32.mrb[27].mxu1  ;;  %v2344_v33 = vmax.f32 %v2293_v23, 0.0  ;;  %v2346_v30 = vmax.f32 %v2336_v16, 0.0 }
 0x94a   : > { %v2299_v20 = vadd.f32 %v2298_v31, %v2085_v62  ;;  %v2342_v22 = vadd.f32 %v2341_v13, %v2093_v12  ;;  %v2345_v38 = vmax.f32 %v2295_v9, 0.0  ;;  %v2347_v40 = vmax.f32 %v2338_v25, 0.0  ;;  %v3802_v62 = vld [vmem:[%s991_s30] ss:$0 sm:$0xff] }
 0x94b   : > { %v2348_v34 = vmax.f32 %v2297_v26, 0.0  ;;  %v2350_v37 = vmax.f32 %v2340_v27, 0.0 }
 0x94c   : > { %v2349_v28 = vmax.f32 %v2299_v20, 0.0  ;;  %v2351_v24 = vmax.f32 %v2342_v22, 0.0 }
 0x94d   : > { %v2352_v41 = vpack.c.bf16 %v2348_v34, %v2344_v33  ;;  %v2354_v4 = vpack.c.bf16 %v2350_v37, %v2346_v30 }
 0x94e   : > { %v2353_v42 = vpack.c.bf16 %v2349_v28, %v2345_v38  ;;  %v2355_v32 = vpack.c.bf16 %v2351_v24, %v2347_v40 }
 0x950   : > { %2651 = vmatprep.mubr.bf16.mxu0 %v2353_v42  ;;  %2692 = vmatprep.mubr.bf16.mxu1 %v2355_v32 }
 0x951   : > { %2652 = vmatmul.mubr.bf16.vlgmr.msra.gmra.mrb[24].mxu0 %v2352_v41  ;;  %2693 = vmatmul.mubr.bf16.vlgmr.msra.gmra.mrb[28].mxu1 %v2354_v4 }
 0xa24   : > { %v3958_v44 = vpop.f32.mrb[24].mxu0  ;;  %v3980_v48 = vpop.f32.mrb[28].mxu1 }
 0xa25   : > { %v3959_v50 = vpop.f32.mrb[25].mxu0  ;;  %v3981_v51 = vpop.f32.mrb[29].mxu1 }
 0xa26   : > { %v3960_v39 = vadd.f32 %v3959_v50, %v3958_v44  ;;  %v3982_v47 = vadd.f32 %v3981_v51, %v3980_v48  ;;  %v3961_v21 = vpop.f32.mrb[26].mxu0  ;;  %v3983_v52 = vpop.f32.mrb[30].mxu1 }
 0xa27   : > { %v3962_v45 = vpop.f32.mrb[27].mxu0  ;;  %v3984_v29 = vpop.f32.mrb[31].mxu1 }
 0xa28   : > { %v2654_v35 = vadd.f32 %v3960_v39, %v3769_v49  ;;  %v3963_v46 = vadd.f32 %v3962_v45, %v3961_v21  ;;  %v3985_v55 = vadd.f32 %v3984_v29, %v3983_v52 }
 0xa2a   : > { %v2695_v54 = vadd.f32 %v3982_v47, %v2654_v35  ;;  %v2657_v36 = vadd.f32 %v3963_v46, %v3769_v49 }
 0xa2c   : > { %v2698_v57 = vadd.f32 %v3985_v55, %v2657_v36  ;;  %v2701_v59 = vadd.f32 %v2695_v54, %v5691_v43 }
 0xa2e   : > { %2705 = vadd.xlane.f32.xlu0 %v2701_v59  ;;  %v2702_v58 = vadd.f32 %v2698_v57, %v5693_v6 }
 0xa30   : > { %2707 = vadd.xlane.f32.xlu1 %v2702_v58 }
 0xabb   : > { %v2706_v53 = vpop.xlane.xlu0 %2705 }
 0xabc   : > { %v2709_v60 = vmul.f32 0.0078125, %v2706_v53 }
 0xabd   : > { %v2708_v61 = vpop.xlane.xlu1 %2707 }
 0xabe   : > { %v2711_v63 = vsub.f32 %v2701_v59, %v2709_v60  ;;  %v2710_v0 = vmul.f32 0.0078125, %v2708_v61 }
 0xac0   : > { %v2712_v1 = vsub.f32 %v2702_v58, %v2710_v0  ;;  %v2713_v2 = vmul.f32 %v2711_v63, %v2711_v63 }
 0xac2   : > { %2715 = vadd.xlane.f32.xlu0 %v2713_v2  ;;  %v2714_v3 = vmul.f32 %v2712_v1, %v2712_v1 }
 0xac4   : > { %2717 = vadd.xlane.f32.xlu1 %v2714_v3 }
 0xb4f   : > { %v2716_v5 = vpop.xlane.xlu0 %2715 }
 0xb50   : > { %v2719_v8 = vmul.f32 0.0078125, %v2716_v5 }
 0xb51   : > { %v2718_v7 = vpop.xlane.xlu1 %2717 }
 0xb52   : > { %v2721_v43 = vadd.f32 1e-05, %v2719_v8  ;;  %v2720_v10 = vmul.f32 0.0078125, %v2718_v7 }
 0xb54   : > { %4404 = vrsqrt.f32 %v2721_v43  ;;  %v2722_v6 = vadd.f32 1e-05, %v2720_v10 }
 0xb56   : > { %4406 = vrsqrt.f32 %v2722_v6 }
 0xb5e   : > { %v4405_v11 = vpop.eup %4404 }
 0xb5f   : > { %v2725_v12 = vmul.f32 %v4405_v11, %v2711_v63 }
 0xb60   : > { %v4407_v14 = vpop.eup %4406 }
 0xb61   : > { %v2733_v23 = vmul.f32 %v3802_v62, %v2725_v12  ;;  %v2726_v16 = vmul.f32 %v4407_v14, %v2712_v1 }
 0xb63   : > { %v2741_v17 = vadd.f32 %v3803_v15, %v2733_v23  ;;  %v2734_v18 = vmul.f32 %v3802_v62, %v2726_v16 }
 0xb65   : > { %2743 = vst [vmem:[#allocation2] sm:$0xff] %v2741_v17  ;;  %v2742_v9 = vadd.f32 %v3803_v15, %v2734_v18 }
 0xb67   : > { %2744 = vst [vmem:[#allocation2 + $0x8] sm:$0xff] %v2742_v9 }
 0xb68 PF: > { %s5899_s13 = sld [smem:[#allocation26_spill]] }
 0xb6e   : > { %p3804_p4 = scmp.ne.s32.totalorder %s5899_s13, 6 }
 0xb6f   : > { %v4410_v25 = vld [vmem:[#allocation13 + $0x4] ss:$8 sps:$4 sm:$0xff] (!%p3804_p4)   ;;  %v4412_v19 = vld [vmem:[#allocation13] ss:$8 sps:$4 sm:$0xff] (!%p3804_p4)   ;;  %v4833_v56 = vmov (!%p3804_p4), 0  }
 0xb70   : > { %2748 = sbr.rel (%p3804_p4) target bundleno = 3400 (0xd48), region = 132  ;;  %2892 = vmatprep.mubr.bf16.mxu0 (!%p3804_p4), %v4833_v56  ;;  %2860 = vmatprep.subr.bf16.mxu0 (!%p3804_p4), %v4410_v25  ;;  %v4413_v26 = vld [vmem:[#allocation13 + $0x14] ss:$8 sps:$4 sm:$0xff] (!%p3804_p4)   ;;  %v4415_v27 = vld [vmem:[#allocation13 + $0x10] ss:$8 sps:$4 sm:$0xff] (!%p3804_p4)   ;;  %v2749_v39 = vld [vmem:[#allocation2] sm:$0xff] (!%p3804_p4) }
 0xb71   : > { %2861 = vmatpush1.bf16.msra.mxu0 (!%p3804_p4), %v4412_v19  ;;  %v4416_v31 = vld [vmem:[#allocation13 + $0x24] ss:$8 sps:$4 sm:$0xff] (!%p3804_p4)   ;;  %v4418_v13 = vld [vmem:[#allocation13 + $0x20] ss:$8 sps:$4 sm:$0xff] (!%p3804_p4)   ;;  %v4419_v20 = vld [vmem:[#allocation13 + $0x34] ss:$8 sps:$4 sm:$0xff] (!%p3804_p4)  }
 0xb72   : > { %2862 = vmatprep.subr.bf16.mxu0 (!%p3804_p4), %v4413_v26  ;;  %v4421_v22 = vld [vmem:[#allocation13 + $0x30] ss:$8 sps:$4 sm:$0xff] (!%p3804_p4)   ;;  %v4422_v33 = vld [vmem:[#allocation13 + $0x44] ss:$8 sps:$4 sm:$0xff] (!%p3804_p4)   ;;  %v4424_v38 = vld [vmem:[#allocation13 + $0x40] ss:$8 sps:$4 sm:$0xff] (!%p3804_p4)  }
 0xb73   : > { %v4434_v30 = vld [vmem:[#allocation16 + $0x4] ss:$16 sps:$4 sm:$0xff] (!%p3804_p4)   ;;  %v4439_v34 = vld [vmem:[#allocation16] ss:$16 sps:$4 sm:$0xff] (!%p3804_p4)   ;;  %v4438_v21 = vld [vmem:[#allocation16 + $0xc] ss:$16 sps:$4 sm:$0xff] (!%p3804_p4)  }
 0xb74   : > { %3315 = vmatprep.subr.bf16.mxu1 (!%p3804_p4), %v4434_v30  ;;  %v4440_v37 = vld [vmem:[#allocation16 + $0x24] ss:$16 sps:$4 sm:$0xff] (!%p3804_p4)   ;;  %v4445_v28 = vld [vmem:[#allocation16 + $0x20] ss:$16 sps:$4 sm:$0xff] (!%p3804_p4)   ;;  %v4436_v35 = vld [vmem:[#allocation16 + $0x8] ss:$16 sps:$4 sm:$0xff] (!%p3804_p4)  }
 0xb75   : > { %2863 = vmatpush1.bf16.msra.mxu0 (!%p3804_p4), %v4415_v27  ;;  %3316 = vmatpush1.bf16.msra.mxu1 (!%p3804_p4), %v4439_v34  ;;  %v4425_v40 = vld [vmem:[#allocation13 + $0x54] ss:$8 sps:$4 sm:$0xff] (!%p3804_p4)   ;;  %v4427_v41 = vld [vmem:[#allocation13 + $0x50] ss:$8 sps:$4 sm:$0xff] (!%p3804_p4)   ;;  %v4428_v4 = vld [vmem:[#allocation13 + $0x64] ss:$8 sps:$4 sm:$0xff] (!%p3804_p4)  }
 0xb76   : > { %2864 = vmatprep.subr.bf16.mxu0 (!%p3804_p4), %v4416_v31  ;;  %3317 = vmatprep.subr.bf16.mxu1 (!%p3804_p4), %v4440_v37  ;;  %v4446_v24 = vld [vmem:[#allocation16 + $0x44] ss:$16 sps:$4 sm:$0xff] (!%p3804_p4)   ;;  %v4451_v42 = vld [vmem:[#allocation16 + $0x40] ss:$16 sps:$4 sm:$0xff] (!%p3804_p4)   ;;  %v4444_v55 = vld [vmem:[#allocation16 + $0x2c] ss:$16 sps:$4 sm:$0xff] (!%p3804_p4)  }
 0xb77   : > { %v4452_v32 = vld [vmem:[#allocation16 + $0x64] ss:$16 sps:$4 sm:$0xff]   ;;  %v4457_v48 = vld [vmem:[#allocation16 + $0x60] ss:$16 sps:$4 sm:$0xff]   ;;  %v4442_v36 = vld [vmem:[#allocation16 + $0x28] ss:$16 sps:$4 sm:$0xff]  }
 0xb78   : > { %v4430_v44 = vld [vmem:[#allocation13 + $0x60] ss:$8 sps:$4 sm:$0xff]   ;;  %v4431_v49 = vld [vmem:[#allocation13 + $0x74] ss:$8 sps:$4 sm:$0xff]   ;;  %v4433_v51 = vld [vmem:[#allocation13 + $0x70] ss:$8 sps:$4 sm:$0xff]  }
 0xb79   : > { %2865 = vmatpush1.bf16.msra.mxu0 %v4418_v13  ;;  %3318 = vmatpush1.bf16.msra.mxu1 %v4445_v28  ;;  %v4458_v50 = vld [vmem:[#allocation16 + $0x84] ss:$16 sps:$4 sm:$0xff]   ;;  %v4463_v52 = vld [vmem:[#allocation16 + $0x80] ss:$16 sps:$4 sm:$0xff]   ;;  %v4450_v57 = vld [vmem:[#allocation16 + $0x4c] ss:$16 sps:$4 sm:$0xff]  }
 0xb7a   : > { %2866 = vmatprep.subr.bf16.mxu0 %v4419_v20  ;;  %3319 = vmatprep.subr.bf16.mxu1 %v4446_v24  ;;  %v2750_v47 = vld [vmem:[#allocation2 + $0x8] sm:$0xff]  ;;  %v4469_v46 = vld [vmem:[#allocation16 + $0xa0] ss:$16 sps:$4 sm:$0xff]  }
 0xb7b   : > { %v4464_v45 = vld [vmem:[#allocation16 + $0xa4] ss:$16 sps:$4 sm:$0xff]   ;;  %v2751_v29 = vpack.c.bf16 %v2750_v47, %v2749_v39  ;;  %v4475_v59 = vld [vmem:[#allocation16 + $0xc0] ss:$16 sps:$4 sm:$0xff]   ;;  %v4448_v53 = vld [vmem:[#allocation16 + $0x48] ss:$16 sps:$4 sm:$0xff]  }
 0xb7c   : > { %v4470_v54 = vld [vmem:[#allocation16 + $0xc4] ss:$16 sps:$4 sm:$0xff]   ;;  %v4481_v60 = vld [vmem:[#allocation16 + $0xe0] ss:$16 sps:$4 sm:$0xff]   ;;  %v4456_v61 = vld [vmem:[#allocation16 + $0x6c] ss:$16 sps:$4 sm:$0xff]  }
 0xb7d   : > { %2867 = vmatpush1.bf16.msra.mxu0 %v4421_v22  ;;  %3320 = vmatpush1.bf16.msra.mxu1 %v4451_v42  ;;  %v4476_v58 = vld [vmem:[#allocation16 + $0xe4] ss:$16 sps:$4 sm:$0xff]   ;;  %v4454_v0 = vld [vmem:[#allocation16 + $0x68] ss:$16 sps:$4 sm:$0xff]   ;;  %v4462_v1 = vld [vmem:[#allocation16 + $0x8c] ss:$16 sps:$4 sm:$0xff]  }
 0xb7e   : > { %2868 = vmatprep.subr.bf16.mxu0 %v4422_v33  ;;  %3321 = vmatprep.subr.bf16.mxu1 %v4452_v32  ;;  %v4482_v63 = vld [vmem:[#allocation16 + $0x104] ss:$16 sps:$4 sm:$0xff]   ;;  %v4487_v2 = vld [vmem:[#allocation16 + $0x100] ss:$16 sps:$4 sm:$0xff]   ;;  %v4460_v5 = vld [vmem:[#allocation16 + $0x88] ss:$16 sps:$4 sm:$0xff]   ;;  %v2770_v32 = vlaneseq }
 0xb7f   : > { %v4488_v3 = vld [vmem:[#allocation16 + $0x124] ss:$16 sps:$4 sm:$0xff]   ;;  %v4493_v8 = vld [vmem:[#allocation16 + $0x120] ss:$16 sps:$4 sm:$0xff]   ;;  %v4468_v7 = vld [vmem:[#allocation16 + $0xac] ss:$16 sps:$4 sm:$0xff]  }
 0xb80   : > { %v4494_v43 = vld [vmem:[#allocation16 + $0x144] ss:$16 sps:$4 sm:$0xff]   ;;  %v4466_v10 = vld [vmem:[#allocation16 + $0xa8] ss:$16 sps:$4 sm:$0xff]   ;;  %v4499_v6 = vld [vmem:[#allocation16 + $0x140] ss:$16 sps:$4 sm:$0xff]  }
 0xb81   : > { %2869 = vmatpush1.bf16.msra.mxu0 %v4424_v38  ;;  %3322 = vmatpush1.bf16.msra.mxu1 %v4457_v48  ;;  %v4474_v11 = vld [vmem:[#allocation16 + $0xcc] ss:$16 sps:$4 sm:$0xff]   ;;  %v4500_v62 = vld [vmem:[#allocation16 + $0x164] ss:$16 sps:$4 sm:$0xff]   ;;  %v4472_v12 = vld [vmem:[#allocation16 + $0xc8] ss:$16 sps:$4 sm:$0xff]  }
 0xb82   : > { %2870 = vmatprep.subr.bf16.mxu0 %v4425_v40  ;;  %3323 = vmatprep.subr.bf16.mxu1 %v4458_v50  ;;  %v4505_v14 = vld [vmem:[#allocation16 + $0x160] ss:$16 sps:$4 sm:$0xff]   ;;  %v4480_v15 = vld [vmem:[#allocation16 + $0xec] ss:$16 sps:$4 sm:$0xff]   ;;  %v4506_v23 = vld [vmem:[#allocation16 + $0x184] ss:$16 sps:$4 sm:$0xff]  }
 0xb83   : > { %v4478_v16 = vld [vmem:[#allocation16 + $0xe8] ss:$16 sps:$4 sm:$0xff]   ;;  %v4511_v17 = vld [vmem:[#allocation16 + $0x180] ss:$16 sps:$4 sm:$0xff]   ;;  %v4486_v18 = vld [vmem:[#allocation16 + $0x10c] ss:$16 sps:$4 sm:$0xff]  }
 0xb84   : > { %v4512_v9 = vld [vmem:[#allocation16 + $0x1a4] ss:$16 sps:$4 sm:$0xff]   ;;  %v4484_v25 = vld [vmem:[#allocation16 + $0x108] ss:$16 sps:$4 sm:$0xff]   ;;  %v4492_v19 = vld [vmem:[#allocation16 + $0x12c] ss:$16 sps:$4 sm:$0xff]  }
 0xb85   : > { %2871 = vmatpush1.bf16.msra.mxu0 %v4427_v41  ;;  %3324 = vmatpush1.bf16.msra.mxu1 %v4463_v52  ;;  %v4490_v56 = vld [vmem:[#allocation16 + $0x128] ss:$16 sps:$4 sm:$0xff]   ;;  %v4498_v26 = vld [vmem:[#allocation16 + $0x14c] ss:$16 sps:$4 sm:$0xff]   ;;  %v4517_v34 = vld [vmem:[#allocation16 + $0x1a0] ss:$16 sps:$4 sm:$0xff]  }
 0xb86   : > { %2872 = vmatprep.subr.bf16.mxu0 %v4428_v4  ;;  %3325 = vmatprep.subr.bf16.mxu1 %v4464_v45  ;;  %v4496_v27 = vld [vmem:[#allocation16 + $0x148] ss:$16 sps:$4 sm:$0xff]   ;;  %v4504_v31 = vld [vmem:[#allocation16 + $0x16c] ss:$16 sps:$4 sm:$0xff]   ;;  %v4518_v37 = vld [vmem:[#allocation16 + $0x1c4] ss:$16 sps:$4 sm:$0xff]  }
 0xb87   : > { %v4502_v13 = vld [vmem:[#allocation16 + $0x168] ss:$16 sps:$4 sm:$0xff]   ;;  %v4510_v20 = vld [vmem:[#allocation16 + $0x18c] ss:$16 sps:$4 sm:$0xff]   ;;  %v4523_v28 = vld [vmem:[#allocation16 + $0x1c0] ss:$16 sps:$4 sm:$0xff]  }
 0xb88   : > { %v4508_v22 = vld [vmem:[#allocation16 + $0x188] ss:$16 sps:$4 sm:$0xff]   ;;  %v4516_v33 = vld [vmem:[#allocation16 + $0x1ac] ss:$16 sps:$4 sm:$0xff]   ;;  %v4524_v24 = vld [vmem:[#allocation16 + $0x1e4] ss:$16 sps:$4 sm:$0xff]  }
 0xb89   : > { %2873 = vmatpush1.bf16.msra.mxu0 %v4430_v44  ;;  %3326 = vmatpush1.bf16.msra.mxu1 %v4469_v46  ;;  %v4514_v30 = vld [vmem:[#allocation16 + $0x1a8] ss:$16 sps:$4 sm:$0xff]   ;;  %v4522_v38 = vld [vmem:[#allocation16 + $0x1cc] ss:$16 sps:$4 sm:$0xff]   ;;  %v4529_v42 = vld [vmem:[#allocation16 + $0x1e0] ss:$16 sps:$4 sm:$0xff]  }
 0xb8a   : > { %2874 = vmatprep.subr.bf16.mxu0 %v4431_v49  ;;  %3327 = vmatprep.subr.bf16.mxu1 %v4470_v54  ;;  %v4520_v40 = vld [vmem:[#allocation16 + $0x1c8] ss:$16 sps:$4 sm:$0xff]   ;;  %v4528_v41 = vld [vmem:[#allocation16 + $0x1ec] ss:$16 sps:$4 sm:$0xff]   ;;  %v2771_v44 = vshrl.u32 %v2770_v32, 7 }
 0xb8b   : > { %v4526_v4 = vld [vmem:[#allocation16 + $0x1e8] ss:$16 sps:$4 sm:$0xff]   ;;  %v2768_v49 = vld [vmem:[#allocation15] sm:$0x3] }
 0xb8c   : > { %v2772_v48 = vsub.s32 0, %v2771_v44  ;;  %v2776_v50 = vsub.s32 1, %v2771_v44 }
 0xb8d   : > { %2875 = vmatpush1.bf16.msra.mxu0 %v4433_v51  ;;  %3328 = vmatpush1.bf16.msra.mxu1 %v4475_v59 }
 0xb8e   : > { %3358 = vmatprep.subr.bf16.mxu0 %v4438_v21  ;;  %3329 = vmatprep.subr.bf16.mxu1 %v4476_v58  ;;  %v2773_v51 = vrot.slane %v2768_v49, %v2772_v48  ;;  %v2777_v39 = vrot.slane %v2768_v49, %v2776_v50 }
 0xb90   : > { %2893 = vmatmul.mubr.bf16.vlgmr.msra.gmra.mrb[0].mxu0 %v2751_v29 }
 0xb91   : > { %3359 = vmatpush1.bf16.msra.mxu0 %v4436_v35  ;;  %3330 = vmatpush1.bf16.msra.mxu1 %v4481_v60  ;;  %v2985_v60 = vsub.s32 2, %v2771_v44 }
 0xb92   : > { %3360 = vmatprep.subr.bf16.mxu0 %v4444_v55  ;;  %3331 = vmatprep.subr.bf16.mxu1 %v4482_v63  ;;  %v2989_v63 = vsub.s32 3, %v2771_v44 }
 0xb95   : > { %3361 = vmatpush1.bf16.msra.mxu0 %v4442_v36  ;;  %3332 = vmatpush1.bf16.msra.mxu1 %v4487_v2 }
 0xb96   : > { %3362 = vmatprep.subr.bf16.mxu0 %v4450_v57  ;;  %3333 = vmatprep.subr.bf16.mxu1 %v4488_v3 }
 0xb99   : > { %3363 = vmatpush1.bf16.msra.mxu0 %v4448_v53  ;;  %3334 = vmatpush1.bf16.msra.mxu1 %v4493_v8 }
 0xb9a   : > { %3364 = vmatprep.subr.bf16.mxu0 %v4456_v61  ;;  %3335 = vmatprep.subr.bf16.mxu1 %v4494_v43  ;;  %v2973_v61 = vld [vmem:[#allocation18] sm:$0xf] }
 0xb9b   : > { %v2982_v2 = vrot.slane %v2973_v61, %v2776_v50  ;;  %v2990_v3 = vrot.slane %v2973_v61, %v2989_v63 }
 0xb9d   : > { %3365 = vmatpush1.bf16.msra.mxu0 %v4454_v0  ;;  %3336 = vmatpush1.bf16.msra.mxu1 %v4499_v6  ;;  %v2978_v0 = vrot.slane %v2973_v61, %v2772_v48 }
 0xb9e   : > { %3366 = vmatprep.subr.bf16.mxu0 %v4462_v1  ;;  %3337 = vmatprep.subr.bf16.mxu1 %v4500_v62  ;;  %v2986_v1 = vrot.slane %v2973_v61, %v2985_v60 }
 0xba1   : > { %3367 = vmatpush1.bf16.msra.mxu0 %v4460_v5  ;;  %3338 = vmatpush1.bf16.msra.mxu1 %v4505_v14 }
 0xba2   : > { %3368 = vmatprep.subr.bf16.mxu0 %v4468_v7  ;;  %3339 = vmatprep.subr.bf16.mxu1 %v4506_v23 }
 0xba5   : > { %3369 = vmatpush1.bf16.msra.mxu0 %v4466_v10  ;;  %3340 = vmatpush1.bf16.msra.mxu1 %v4511_v17 }
 0xba6   : > { %3370 = vmatprep.subr.bf16.mxu0 %v4474_v11  ;;  %3341 = vmatprep.subr.bf16.mxu1 %v4512_v9 }
 0xba9   : > { %3371 = vmatpush1.bf16.msra.mxu0 %v4472_v12  ;;  %3342 = vmatpush1.bf16.msra.mxu1 %v4517_v34 }
 0xbaa   : > { %3372 = vmatprep.subr.bf16.mxu0 %v4480_v15  ;;  %3343 = vmatprep.subr.bf16.mxu1 %v4518_v37 }
 0xbad   : > { %3373 = vmatpush1.bf16.msra.mxu0 %v4478_v16  ;;  %3344 = vmatpush1.bf16.msra.mxu1 %v4523_v28 }
 0xbae   : > { %3374 = vmatprep.subr.bf16.mxu0 %v4486_v18  ;;  %3345 = vmatprep.subr.bf16.mxu1 %v4524_v24 }
 0xbb1   : > { %3375 = vmatpush1.bf16.msra.mxu0 %v4484_v25  ;;  %3346 = vmatpush1.bf16.msra.mxu1 %v4529_v42 }
 0xbb2   : > { %3376 = vmatprep.subr.bf16.mxu0 %v4492_v19 }
 0xbb5   : > { %3377 = vmatpush1.bf16.msra.mxu0 %v4490_v56 }
 0xbb6   : > { %3378 = vmatprep.subr.bf16.mxu0 %v4498_v26 }
 0xbb9   : > { %3379 = vmatpush1.bf16.msra.mxu0 %v4496_v27 }
 0xbba   : > { %3380 = vmatprep.subr.bf16.mxu0 %v4504_v31 }
 0xbbd   : > { %3381 = vmatpush1.bf16.msra.mxu0 %v4502_v13 }
 0xbbe   : > { %3382 = vmatprep.subr.bf16.mxu0 %v4510_v20 }
 0xbc1   : > { %3383 = vmatpush1.bf16.msra.mxu0 %v4508_v22 }
 0xbc2   : > { %3384 = vmatprep.subr.bf16.mxu0 %v4516_v33 }
 0xbc5   : > { %3385 = vmatpush1.bf16.msra.mxu0 %v4514_v30 }
 0xbc6   : > { %3386 = vmatprep.subr.bf16.mxu0 %v4522_v38 }
 0xbc9   : > { %3387 = vmatpush1.bf16.msra.mxu0 %v4520_v40 }
 0xbca   : > { %3388 = vmatprep.subr.bf16.mxu0 %v4528_v41 }
 0xbcd   : > { %3389 = vmatpush1.bf16.msra.mxu0 %v4526_v4 }
 0xc63   : > { %v2894_v47 = vpop.f32.mrb[0].mxu0 }
 0xc64   : > { %v2895_v21 = vadd.f32 %v2894_v47, %v2773_v51  ;;  %v2896_v52 = vpop.f32.mrb[1].mxu0 }
 0xc65   : > { %v2897_v45 = vadd.f32 %v2896_v52, %v2777_v39  ;;  %v2898_v29 = vpop.f32.mrb[2].mxu0 }
 0xc66   : > { %v2899_v35 = vadd.f32 %v2898_v29, %v2773_v51  ;;  %v2900_v46 = vpop.f32.mrb[3].mxu0  ;;  %v2903_v54 = vmax.f32 %v2895_v21, 0.0 }
 0xc67   : > { %v2901_v55 = vadd.f32 %v2900_v46, %v2777_v39  ;;  %v2904_v57 = vmax.f32 %v2897_v45, 0.0 }
 0xc68   : > { %v2905_v36 = vmax.f32 %v2899_v35, 0.0 }
 0xc69   : > { %v2906_v59 = vmax.f32 %v2901_v55, 0.0 }
 0xc6a   : > { %v2907_v58 = vpack.c.bf16 %v2905_v36, %v2903_v54 }
 0xc6b   : > { %v2908_v53 = vpack.c.bf16 %v2906_v59, %v2904_v57 }
 0xc6d   : > { %3347 = vmatprep.mubr.bf16.mxu1 %v2908_v53  ;;  %3390 = vmatprep.mubr.bf16.mxu0 %v2908_v53 }
 0xc6e   : > { %3348 = vmatmul.mubr.bf16.vlgmr.msra.gmra.mrb[0].mxu1 %v2907_v58  ;;  %3391 = vmatmul.mubr.bf16.vlgmr.msra.gmra.mrb[4].mxu0 %v2907_v58 }
 0xd41   : > { %v3349_v5 = vpop.f32.mrb[0].mxu1  ;;  %v3392_v8 = vpop.f32.mrb[4].mxu0 }
 0xd42   : > { %v3350_v7 = vadd.f32 %v3349_v5, %v2978_v0  ;;  %v3393_v43 = vadd.f32 %v3392_v8, %v2986_v1  ;;  %v3351_v10 = vpop.f32.mrb[1].mxu1  ;;  %v3394_v6 = vpop.f32.mrb[5].mxu0 }
 0xd43   : > { %v3352_v11 = vadd.f32 %v3351_v10, %v2982_v2  ;;  %v3395_v62 = vadd.f32 %v3394_v6, %v2990_v3  ;;  %v3353_v12 = vpop.f32.mrb[2].mxu1  ;;  %v3396_v14 = vpop.f32.mrb[6].mxu0 }
 0xd44   : > { %3401 = vst [vmem:[#allocation19] sm:$0xff] %v3350_v7  ;;  %3403 = vst [vmem:[#allocation19 + $0x10] sm:$0xff] %v3393_v43  ;;  %v3354_v15 = vadd.f32 %v3353_v12, %v2978_v0  ;;  %v3397_v23 = vadd.f32 %v3396_v14, %v2986_v1  ;;  %v3355_v16 = vpop.f32.mrb[3].mxu1  ;;  %v3398_v17 = vpop.f32.mrb[7].mxu0 }
 0xd45   : > { %3402 = vst [vmem:[#allocation19 + $0x8] sm:$0xff] %v3352_v11  ;;  %3404 = vst [vmem:[#allocation19 + $0x18] sm:$0xff] %v3395_v62  ;;  %v3356_v18 = vadd.f32 %v3355_v16, %v2982_v2  ;;  %v3399_v9 = vadd.f32 %v3398_v17, %v2990_v3 }
 0xd46   : > { %3405 = vst [vmem:[#allocation19 + $0x20] sm:$0xff] %v3354_v15  ;;  %3407 = vst [vmem:[#allocation19 + $0x30] sm:$0xff] %v3397_v23 }
 0xd47   : > { %3406 = vst [vmem:[#allocation19 + $0x28] sm:$0xff] %v3356_v18  ;;  %3408 = vst [vmem:[#allocation19 + $0x38] sm:$0xff] %v3399_v9 }
 0xd48 PF: > { %s5900_s2 = sld [smem:[#allocation26_spill]]  ;;  %s4834_s30 = smov [#allocation19]  }
 0xd49   : > { %s3415_s25 = sshll.u32 %s4834_s30, 4  ;;  %s3416_s25 = int_to_ptr.vmem [resolvable:$true] %s3415_s25 }
 0xd4a   : > { %s4732_s27 = scalar_lea.vmem %s3416_s25, 1024  ;;  %p4739_p10 = scmp.lt.s32.totalorder %s3416_s25, %s3416_s25 }
 0xd4b   : > { %p4733_p13 = scmp.ne.s32.totalorder %s3416_s25, %s4732_s27  ;;  %p4740_p6 = scmp.lt.s32.totalorder %s4732_s27, %s4732_s27 }
 0xd4d   : > { %p4741_p7 = por %p4740_p6, %p4739_p10 }
 0xd4e   : > { %p4158_p5 = scmp.eq.s32.totalorder %s5900_s2, 6 }
 0xd50   : > { %p4734_p11 = pnand %p4733_p13, %p4158_p5 }
 0xd52   : > { %p4735_p12 = pneg %p4734_p11 }
 0xd54   : > { %p4742_p0 = pnand %p4741_p7, %p4735_p12 }
 0xd56   : > { %4745 = shalt.err (!%p4742_p0)
}
 0xd57   : > { %s5901_s6 = sld [smem:[#allocation44_spill]] }
 0xd5d   : > { %s4746_s24 = scalar_lea.hbm %s5901_s6, 1024 }
 0xd5e   : > { %p4747_p3 = scmp.ne.s32.totalorder %s5901_s6, %s4746_s24  ;;  %p4752_p2 = scmp.lt.u32.totalorder %s4746_s24, %s5901_s6 }
 0xd60   : > { %p4748_p9 = pnand %p4747_p3, %p4158_p5 }
 0xd62   : > { %p4749_p1 = pneg %p4748_p9 }
 0xd64   : > { %p4754_p8 = pnand %p4752_p2, %p4749_p1 }
 0xd66   : > { %4757 = shalt.err (!%p4754_p8)
}
 0xd67   : > { %s4835_s7 = smov 512   ;;  %s4836_s16 = smov 32  }
 0xd68   : > { %4123 = dma.vmem_to_hbm [thread:$0]  (%p4158_p5), %s3416_s25, 1024, %s5901_s6, [#allocation9], %s4835_s7, %s4835_s7, %s4836_s16  }
 0xd69   : > { %4791 = dma.done.wait (%p4158_p5), [#allocation9], 1024  }
 0xd6a   : > { %4793 = vsyncadd (%p4158_p5), [#allocation9], 4294966272 }
 0xd6b PF: > { %s5902_s30 = sld [smem:[#allocation27_spill]]  ;;  %s5903_s5 = sld [smem:[#allocation25_spill]] }
 0xd6c   : > { %s5904_s29 = sld [smem:[#allocation28_spill]]  ;;  %s5905_s27 = smov %s4800_s28 }
 0xd71   : > { %p34_p4 = scmp.ge.s32.totalorder %s5902_s30, 9   ;;  %s5906_s28 = smov %s5903_s5 }
 0xd73   :  { %36 = sbr.rel (!%p34_p4) target bundleno = 25 (0x19), region = 208 }
 0xd7a   :  { %3431 = vsyncpa [#allocation8], 1 }
 0xd7b   :  { %3433 = vsyncpa [#allocation8 + $0x1], 1 }
 0xd7c   :  { %3434 = vsyncpa [#allocation11], 1 }
 0xd7d   :  { %3436 = vsyncpa [#allocation11 + $0x1], 1 }
 0xd7e   :  { %3437 = vsyncpa [#allocation14], 1 }
 0xd7f   :  { %3438 = vsyncpa [#allocation17], 1 }
 0xd80   :  { %3439 = vsyncpa [#allocation9], 1 }
 0xd81   :  { %3441 = vsyncpa [#allocation9 + $0x1], 1 }

</bundles_post_ra>
